<compile_context>
chip_gen: v7x
topology: tpu7x:2x2x1
jax: 0.10.0
libtpu: 0.0.40
codegen_flags: <defaults>
</compile_context>

<pallas_src>
import functools

import jax
import jax.numpy as jnp
from jax.experimental import pallas as pl
from jax.experimental.pallas import tpu as pltpu

# ------------------------- small synthetic config -------------------------
B = 2
N = 64            # number of input points
C_IN = 6          # in_channels
NUM_POINTS = [32, 16]          # self.num_points (only [:-1] used for FPS levels)
NUM_GROUPS = 16                # embed_args['num_groups']
GROUP_SIZE = 8                 # embed_args['group_size']
ENC_DIM = 32                   # encoder_dim
DEPTH = 2                      # depth
NUM_HEADS = 4                  # num_heads
MLP_RATIO = 2.0                # mlp_ratio
EMBED_HIDDEN = 16              # hidden width of group/pos embed MLPs
FP_MLPS = [[32, 32], [24, 24]]  # fp_mlps (level0 = finest); head in = FP_MLPS[0][0]
NUM_PARTS = 10                 # num_parts (small synthetic stand-in for 50)
LOGIT_PAD = 128                # lane-dense padded width for the head logits
SLAB_W = 128                   # lane-dense width of the packed bias/LN slab
LN_EPS = 1e-6                  # norm_args eps


# ----------------------------- small helpers ------------------------------

def _batch_spec(a):
    """(1, full, full) block that walks the leading batch grid axis."""
    return pl.BlockSpec((1,) + a.shape[1:], lambda i: (i,) + (0,) * (a.ndim - 1))


def _const_spec(a):
    """Full-array block whose index does not move with the grid (stays resident)."""
    zeros = (0,) * a.ndim
    return pl.BlockSpec(a.shape, lambda i, _z=zeros: _z)


def _ln(x, g, b):
    """f32 LayerNorm over last dim (stats in f32, v5e-safe)."""
    mu = jnp.mean(x, axis=-1, keepdims=True)
    var = jnp.mean(jnp.square(x - mu), axis=-1, keepdims=True)
    return (x - mu) * jax.lax.rsqrt(var + LN_EPS) * g + b


# ---------------- packed 1-D parameter slab (one resident input) ----------------

def _encoder_vec_layout():
    hid = int(ENC_DIM * MLP_RATIO)
    rows = [('embed_b1', EMBED_HIDDEN), ('embed_b2', ENC_DIM),
            ('pos_b1', EMBED_HIDDEN), ('pos_b2', ENC_DIM), ('cls', ENC_DIM)]
    for d in range(DEPTH):
        rows += [(f'ln1_g{d}', ENC_DIM), (f'ln1_b{d}', ENC_DIM),
                 (f'proj_b{d}', ENC_DIM),
                 (f'ln2_g{d}', ENC_DIM), (f'ln2_b{d}', ENC_DIM),
                 (f'fc1_b{d}', hid), (f'fc2_b{d}', ENC_DIM)]
    rows += [('norm_g', ENC_DIM), ('norm_b', ENC_DIM)]
    return rows


def _decoder_vec_layout():
    return [('fp1_b1', FP_MLPS[1][0]), ('fp1_b2', FP_MLPS[1][1]),
            ('fp0_b1', FP_MLPS[0][0]), ('fp0_b2', FP_MLPS[0][1]),
            ('head_b1', FP_MLPS[0][0]), ('head_b2', LOGIT_PAD)]


def _layout_offsets(layout):
    return {name: (i, w) for i, (name, w) in enumerate(layout)}


def _pack_vec_slab(layout, values):
    rows = []
    for name, w in layout:
        v = jnp.asarray(values[name], jnp.float32).reshape(-1)
        assert v.shape[0] == w, (name, v.shape, w)
        rows.append(jnp.pad(v, (0, SLAB_W - w)))
    pad_rows = (-len(rows)) % 8
    rows += [jnp.zeros((SLAB_W,), jnp.float32)] * pad_rows
    return jnp.stack(rows, axis=0)


# --------------------------- fused encoder kernel ---------------------------
# group-embed + pos-embed + cls + DEPTH transformer blocks + final LN, one call.

def _encoder_kernel(*refs, offsets, depth, num_heads, n_tokens, t_pad, group_size):
    nbr_ref, ctr_ref, ew1, ew2, pw1, pw2 = refs[:6]
    blk = refs[6:6 + 4 * depth]
    vec_ref = refs[6 + 4 * depth]
    o_ref = refs[-1]

    slab = vec_ref[...]                                   # (rows, 128) f32, resident

    def vec(name):
        r, w = offsets[name]
        return slab[r:r + 1, :w]                          # (1, w) static slice

    # ---- group embedding: shared MLP over kNN neighbor feats + max-pool ----
    nbr = nbr_ref[0].astype(jnp.bfloat16)                 # (G*K, C_IN)
    h = jnp.dot(nbr, ew1[...], preferred_element_type=jnp.float32) + vec('embed_b1')
    h = jax.nn.gelu(h, approximate=True)
    h = jnp.dot(h.astype(jnp.bfloat16), ew2[...],
                preferred_element_type=jnp.float32) + vec('embed_b2')
    g = h.shape[0] // group_size
    grp = jnp.max(h.reshape(g, group_size, h.shape[-1]), axis=1)     # (G, D)

    # ---- positional embedding of group centers ----
    ctr = ctr_ref[0].astype(jnp.bfloat16)                 # (G, 3)
    pe = jnp.dot(ctr, pw1[...], preferred_element_type=jnp.float32) + vec('pos_b1')
    pe = jax.nn.gelu(pe, approximate=True)
    pe = jnp.dot(pe.astype(jnp.bfloat16), pw2[...],
                 preferred_element_type=jnp.float32) + vec('pos_b2')

    d_model = grp.shape[-1]
    dh = d_model // num_heads
    scale = 1.0 / (dh ** 0.5)

    # token slab padded to a sublane multiple; group tokens first, cls last
    # (attention is permutation-equivariant, so token order does not matter).
    x = jnp.concatenate(
        [grp + pe, vec('cls'),
         jnp.zeros((t_pad - n_tokens, d_model), jnp.float32)], axis=0)   # (t_pad, D)

    # additive key-padding mask, built once and reused by every block
    col = jax.lax.broadcasted_iota(jnp.int32, (num_heads, t_pad, t_pad), 2)
    kmask = jnp.where(col < n_tokens, 0.0, -1e30).astype(jnp.float32)

    for d_i in range(depth):                              # static unroll over depth
        qkv_w, proj_w, fc1_w, fc2_w = blk[4 * d_i:4 * d_i + 4]

        # --- attention (heads batched: no per-head lane slicing of K/V, no
        #     per-head output concat; qkv_bias=False) ---
        h1 = _ln(x, vec(f'ln1_g{d_i}'), vec(f'ln1_b{d_i}'))
        qkv = jnp.dot(h1.astype(jnp.bfloat16), qkv_w[...],
                      preferred_element_type=jnp.float32)          # (T, 3D)
        kvT = qkv.T.reshape(3 * num_heads, dh, t_pad)              # head-major (3H, dh, T)
        kT = kvT[num_heads:2 * num_heads].astype(jnp.bfloat16)     # (H, dh, T)
        vT = kvT[2 * num_heads:].astype(jnp.bfloat16)              # (H, dh, T)
        q3 = jnp.stack([qkv[:, hh * dh:(hh + 1) * dh]
                        for hh in range(num_heads)], axis=0)       # (H, T, dh)
        s = jax.lax.dot_general(q3.astype(jnp.bfloat16), kT,
                                (((2,), (1,)), ((0,), (0,))),
                                preferred_element_type=jnp.float32) * scale   # (H,T,T)
        s = s + kmask
        s = s - jnp.max(s, axis=-1, keepdims=True)
        p = jnp.exp(s)
        p = p * pl.reciprocal(jnp.sum(p, axis=-1, keepdims=True), approx=True)
        oT = jax.lax.dot_general(vT, p.astype(jnp.bfloat16),
                                 (((2,), (2,)), ((0,), (0,))),
                                 preferred_element_type=jnp.float32)   # (H, dh, T)
        attn = oT.reshape(d_model, t_pad).T                            # (T, D)
        a = jnp.dot(attn.astype(jnp.bfloat16), proj_w[...],
                    preferred_element_type=jnp.float32) + vec(f'proj_b{d_i}')
        x = x + a

        # --- MLP ---
        h2 = _ln(x, vec(f'ln2_g{d_i}'), vec(f'ln2_b{d_i}'))
        h2 = jnp.dot(h2.astype(jnp.bfloat16), fc1_w[...],
                     preferred_element_type=jnp.float32) + vec(f'fc1_b{d_i}')
        h2 = jax.nn.gelu(h2, approximate=True)
        h2 = jnp.dot(h2.astype(jnp.bfloat16), fc2_w[...],
                     preferred_element_type=jnp.float32) + vec(f'fc2_b{d_i}')
        x = x + h2

    x = _ln(x, vec('norm_g'), vec('norm_b'))              # final encoder LN, fused
    o_ref[0] = x[:n_tokens - 1].astype(o_ref.dtype)       # group tokens only (cls dropped)


def pallas_encoder(nbr, ctr, p):
    Bb = nbr.shape[0]
    G = ctr.shape[1]
    D = ENC_DIM
    n_tokens = G + 1
    t_pad = ((n_tokens + 7) // 8) * 8
    offsets = _layout_offsets(_encoder_vec_layout())
    weights = [p['embed_w1'], p['embed_w2'], p['pos_w1'], p['pos_w2']]
    for bp in p['blocks']:
        weights += [bp['qkv_w'], bp['proj_w'], bp['fc1_w'], bp['fc2_w']]
    weights.append(p['enc_vec'])
    kern = functools.partial(_encoder_kernel, offsets=offsets, depth=DEPTH,
                             num_heads=NUM_HEADS, n_tokens=n_tokens,
                             t_pad=t_pad, group_size=GROUP_SIZE)
    return pl.pallas_call(
        kern, grid=(Bb,),
        in_specs=[_batch_spec(nbr), _batch_spec(ctr)]
                 + [_const_spec(a) for a in weights],
        out_specs=pl.BlockSpec((1, G, D), lambda i: (i, 0, 0)),
        out_shape=jax.ShapeDtypeStruct((Bb, G, D), jnp.float32),
        compiler_params=pltpu.CompilerParams(dimension_semantics=("parallel",)),
    )(nbr, ctr, *weights)


# --------------------------- fused decoder kernel ---------------------------
# both FP levels + pcsHead in one call; level-1 activations never leave VMEM.

def _decoder_kernel(w1_ref, w0_ref, enc_ref, skm_ref, skf_ref,
                    fp1_w1, fp1_w2, fp0_w1, fp0_w2, head_w1, head_w2,
                    vec_ref, o_ref, *, offsets):
    slab = vec_ref[...]

    def vec(name):
        r, w = offsets[name]
        return slab[r:r + 1, :w]

    def mlp(x, w_ref, bname, act=True):
        y = jnp.dot(x.astype(jnp.bfloat16), w_ref[...],
                    preferred_element_type=jnp.float32) + vec(bname)
        return jax.nn.gelu(y, approximate=True) if act else y

    # FP level 1: 3-NN interp (coarse tokens -> mid points) + skip concat + MLP
    x1 = jnp.dot(w1_ref[0], enc_ref[0].astype(jnp.bfloat16),
                 preferred_element_type=jnp.float32)                 # (Nm, D)
    x1 = jnp.concatenate([x1, skm_ref[0]], axis=-1)                  # (Nm, D + C_IN)
    x1 = mlp(x1, fp1_w1, 'fp1_b1')
    x1 = mlp(x1, fp1_w2, 'fp1_b2')                                   # stays in VMEM

    # FP level 0: 3-NN interp (mid -> fine) + skip concat + MLP
    x0 = jnp.dot(w0_ref[0], x1.astype(jnp.bfloat16),
                 preferred_element_type=jnp.float32)                 # (Nf, 24)
    x0 = jnp.concatenate([x0, skf_ref[0]], axis=-1)                  # (Nf, 30)
    x0 = mlp(x0, fp0_w1, 'fp0_b1')
    x0 = mlp(x0, fp0_w2, 'fp0_b2')                                   # (Nf, 32)

    # pcsHead: MLP + zero-padded final projection -> lane-dense (Nf, 128) logits
    hh = mlp(x0, head_w1, 'head_b1')
    logits = mlp(hh, head_w2, 'head_b2', act=False)
    o_ref[0] = logits.astype(o_ref.dtype)


def pallas_decoder(W1, W0, enc_tok, skip_mid, skip_fine, p):
    Bb, Nf, _ = W0.shape
    offsets = _layout_offsets(_decoder_vec_layout())
    data = [W1, W0, enc_tok, skip_mid, skip_fine]
    weights = [p['fp1_w1'], p['fp1_w2'], p['fp0_w1'], p['fp0_w2'],
               p['head_w1'], p['head_w2'], p['dec_vec']]
    return pl.pallas_call(
        functools.partial(_decoder_kernel, offsets=offsets),
        grid=(Bb,),
        in_specs=[_batch_spec(a) for a in data] + [_const_spec(a) for a in weights],
        out_specs=pl.BlockSpec((1, Nf, LOGIT_PAD), lambda i: (i, 0, 0)),
        out_shape=jax.ShapeDtypeStruct((Bb, Nf, LOGIT_PAD), jnp.float32),
        compiler_params=pltpu.CompilerParams(dimension_semantics=("parallel",)),
    )(*data, *weights)


# ------------------------------ JAX glue ops -------------------------------
# TODO(synk): FPS (serial greedy argmax), kNN / 3-NN top-k selection, index
# gathers and the interpolation-matrix build stay in XLA; a Pallas FPS with
# SMEM state is only worthwhile at real model scale.

def sqdist(a, b):
    return (jnp.sum(a * a, -1)[:, :, None] + jnp.sum(b * b, -1)[:, None, :]
            - 2.0 * jnp.einsum('bmd,bnd->bmn', a, b))


def gather_points(x, idx):
    Bb, Nn, C = x.shape
    M = idx.shape[1]
    return jnp.take_along_axis(
        x, jnp.broadcast_to(idx[:, :, None], (Bb, M, C)), axis=1)


def furthest_point_sample(xyz, npoint):
    Bb, Nn, _ = xyz.shape

    def body(i, state):
        idxs, dists, farthest = state
        idxs = idxs.at[:, i].set(farthest)
        centroid = jnp.take_along_axis(
            xyz, jnp.broadcast_to(farthest[:, None, None], (Bb, 1, 3)), axis=1)
        d = jnp.sum((xyz - centroid) ** 2, axis=-1)
        dists = jnp.minimum(dists, d)
        farthest = jnp.argmax(dists, axis=-1).astype(jnp.int32)
        return idxs, dists, farthest

    idxs = jnp.zeros((Bb, npoint), dtype=jnp.int32)
    dists = jnp.full((Bb, Nn), 1e10, dtype=xyz.dtype)
    farthest = jnp.zeros((Bb,), dtype=jnp.int32)
    idxs, _, _ = jax.lax.fori_loop(0, npoint, body, (idxs, dists, farthest))
    return idxs


def interp_weights(xyz_fine, xyz_coarse):
    """Dense (B, Nf, Nc) 3-NN inverse-distance interpolation matrix (bf16 out).
    TODO(synk): at real scale replace with a 3-NN gather (scalar-prefetch idx)."""
    d2 = sqdist(xyz_fine, xyz_coarse)
    negd, idx = jax.lax.top_k(-d2, 3)
    d = jnp.maximum(-negd, 0.0)
    wgt = 1.0 / (d + 1e-8)
    wgt = wgt / jnp.sum(wgt, axis=-1, keepdims=True)
    Nc = xyz_coarse.shape[1]
    dense = jnp.sum(jax.nn.one_hot(idx, Nc, dtype=jnp.float32) * wgt[..., None], axis=2)
    return dense.astype(jnp.bfloat16)        # bf16 MXU operand, f32 accumulate in-kernel


# ------------------------------ parameters ---------------------------------

def init_params(key):
    keys = iter(jax.random.split(key, 32))

    def w(shape, scale=0.02):
        return (scale * jax.random.normal(next(keys), shape, jnp.float32)
                ).astype(jnp.bfloat16)

    hid = int(ENC_DIM * MLP_RATIO)
    p = {}
    # TODO(synk): real groupembed widths (embed_dim=256 -> proj to encoder_dim)
    # are approximated by a single [C_IN -> hidden -> ENC_DIM] shared MLP.
    p['embed_w1'] = w((C_IN, EMBED_HIDDEN))
    p['embed_w2'] = w((EMBED_HIDDEN, ENC_DIM))
    p['pos_w1'] = w((3, EMBED_HIDDEN))
    p['pos_w2'] = w((EMBED_HIDDEN, ENC_DIM))
    cls_token = 0.02 * jax.random.normal(next(keys), (ENC_DIM,), jnp.float32)
    cls_pos = 0.02 * jax.random.normal(next(keys), (ENC_DIM,), jnp.float32)
    # transformer blocks (qkv_bias=False)
    p['blocks'] = [dict(qkv_w=w((ENC_DIM, 3 * ENC_DIM)),
                        proj_w=w((ENC_DIM, ENC_DIM)),
                        fc1_w=w((ENC_DIM, hid)),
                        fc2_w=w((hid, ENC_DIM))) for _ in range(DEPTH)]
    # packed f32 slab: LN gains/biases, matmul biases, cls row
    enc_vals = {'embed_b1': jnp.zeros((EMBED_HIDDEN,)),
                'embed_b2': jnp.zeros((ENC_DIM,)),
                'pos_b1': jnp.zeros((EMBED_HIDDEN,)),
                'pos_b2': jnp.zeros((ENC_DIM,)),
                'cls': cls_token + cls_pos,
                'norm_g': jnp.ones((ENC_DIM,)), 'norm_b': jnp.zeros((ENC_DIM,))}
    for d in range(DEPTH):
        enc_vals.update({
            f'ln1_g{d}': jnp.ones((ENC_DIM,)), f'ln1_b{d}': jnp.zeros((ENC_DIM,)),
            f'proj_b{d}': jnp.zeros((ENC_DIM,)),
            f'ln2_g{d}': jnp.ones((ENC_DIM,)), f'ln2_b{d}': jnp.zeros((ENC_DIM,)),
            f'fc1_b{d}': jnp.zeros((hid,)), f'fc2_b{d}': jnp.zeros((ENC_DIM,))})
    p['enc_vec'] = _pack_vec_slab(_encoder_vec_layout(), enc_vals)

    # PointNet2PartDecoder FP MLPs (level0 = finest) + pcsHead
    # TODO(synk): real pcsHead also consumes a shape-category one-hot; forward
    # here only receives up_features, so that branch is omitted.
    p['fp1_w1'] = w((ENC_DIM + C_IN, FP_MLPS[1][0]))
    p['fp1_w2'] = w((FP_MLPS[1][0], FP_MLPS[1][1]))
    p['fp0_w1'] = w((FP_MLPS[1][-1] + C_IN, FP_MLPS[0][0]))
    p['fp0_w2'] = w((FP_MLPS[0][0], FP_MLPS[0][1]))
    p['head_w1'] = w((FP_MLPS[0][-1], FP_MLPS[0][0]))
    head_w2 = w((FP_MLPS[0][0], NUM_PARTS))
    # zero-pad final projection to 128 lanes -> unmasked lane-dense store,
    # no in-kernel zero-pad concat needed.
    p['head_w2'] = jnp.pad(head_w2, ((0, 0), (0, LOGIT_PAD - NUM_PARTS)))
    dec_vals = {'fp1_b1': jnp.zeros((FP_MLPS[1][0],)),
                'fp1_b2': jnp.zeros((FP_MLPS[1][1],)),
                'fp0_b1': jnp.zeros((FP_MLPS[0][0],)),
                'fp0_b2': jnp.zeros((FP_MLPS[0][1],)),
                'head_b1': jnp.zeros((FP_MLPS[0][0],)),
                'head_b2': jnp.zeros((LOGIT_PAD,))}
    p['dec_vec'] = _pack_vec_slab(_decoder_vec_layout(), dec_vals)
    return p


# ------------------------------ model forward -------------------------------

def point_vit_seg_forward(xyz, features_ncl, p):
    """xyz: (B, N, 3); features: (B, C_IN, N) NCL. Returns (B, NUM_PARTS, N)."""
    Bb, Nn, _ = xyz.shape
    feats_cl = jnp.transpose(features_ncl, (0, 2, 1))            # (B, N, C)

    # one shared serial FPS run; greedy prefixes give both subsets
    n_fps = max([NUM_GROUPS] + list(NUM_POINTS[:-1]))
    fps_idx = furthest_point_sample(xyz, n_fps)                  # (B, n_fps)
    cidx = fps_idx[:, :NUM_GROUPS]
    center_xyz = gather_points(xyz, cidx)                        # (B, G, 3)

    # kNN grouping, feature_type='fj' (neighbor features only)
    d2 = sqdist(center_xyz, xyz)                                 # (B, G, N)
    _, nidx = jax.lax.top_k(-d2, GROUP_SIZE)                     # (B, G, K)
    nbr = gather_points(feats_cl, nidx.reshape(Bb, -1))          # (B, G*K, C_IN)

    # --- fused encoder: embed + pos + DEPTH ViT blocks + final LN (1 call) ---
    l_feature = pallas_encoder(nbr, center_xyz, p)               # (B, G, D), cls dropped

    # decoder point hierarchy
    l_xyz, l_feats = [xyz], [feats_cl]
    for npoints in NUM_POINTS[:-1]:
        idx = fps_idx[:, :npoints]
        l_xyz.append(gather_points(xyz, idx))
        l_feats.append(gather_points(feats_cl, idx))
    l_xyz.append(center_xyz)
    l_feats.append(l_feature)

    # 3-NN inverse-distance interpolation matrices (bf16 MXU operands)
    W1 = interp_weights(l_xyz[1], l_xyz[2])                      # (B, 32, 16)
    W0 = interp_weights(l_xyz[0], l_xyz[1])                      # (B, 64, 32)

    # --- fused decoder: both FP levels + pcsHead (1 call), padded logits ---
    logits_pad = pallas_decoder(W1, W0, l_feats[2], l_feats[1], l_feats[0], p)
    logits = logits_pad[:, :, :NUM_PARTS]                        # (B, N, P)
    return jnp.transpose(logits, (0, 2, 1))                      # (B, P, N)


if __name__ == "__main__":
    key = jax.random.PRNGKey(0)
    kx, kf, kp = jax.random.split(key, 3)
    xyz = jax.random.normal(kx, (B, N, 3), jnp.float32)
    features = jax.random.normal(kf, (B, C_IN, N), jnp.float32)
    params = init_params(kp)

    fwd = jax.jit(point_vit_seg_forward)
    out = jax.block_until_ready(fwd(xyz, features, params))
    assert out.shape == (B, NUM_PARTS, N), out.shape
    assert bool(jnp.all(jnp.isfinite(out)))
    print("KERNEL_OK")
</pallas_src>

<mosaic_0001>
module attributes {stable_mosaic.version = 11 : i64} {
  func.func @_encoder_kernel(%arg0: i32, %arg1: memref<1x128x6xf32, #tpu.memory_space<vmem>>, %arg2: memref<1x16x3xf32, #tpu.memory_space<vmem>>, %arg3: memref<6x16xbf16, #tpu.memory_space<vmem>>, %arg4: memref<16x32xbf16, #tpu.memory_space<vmem>>, %arg5: memref<3x16xbf16, #tpu.memory_space<vmem>>, %arg6: memref<16x32xbf16, #tpu.memory_space<vmem>>, %arg7: memref<32x96xbf16, #tpu.memory_space<vmem>>, %arg8: memref<32x32xbf16, #tpu.memory_space<vmem>>, %arg9: memref<32x64xbf16, #tpu.memory_space<vmem>>, %arg10: memref<64x32xbf16, #tpu.memory_space<vmem>>, %arg11: memref<32x96xbf16, #tpu.memory_space<vmem>>, %arg12: memref<32x32xbf16, #tpu.memory_space<vmem>>, %arg13: memref<32x64xbf16, #tpu.memory_space<vmem>>, %arg14: memref<64x32xbf16, #tpu.memory_space<vmem>>, %arg15: memref<24x128xf32, #tpu.memory_space<vmem>>, %arg16: memref<1x16x32xf32, #tpu.memory_space<vmem>>) attributes {dimension_semantics = [#tpu.dimension_semantics<parallel>], iteration_bounds = array<i64: 2>, scalar_prefetch = 0 : i64, scratch_operands = 0 : i64, tpu.core_type = #tpu.core_type<tc>, window_params = [{transform_indices = @transform_0, window_bounds = array<i64: 1, 128, 6>}, {transform_indices = @transform_1, window_bounds = array<i64: 1, 16, 3>}, {pipeline_mode = #tpu.pipeline_mode<synchronous>, transform_indices = @transform_2, window_bounds = array<i64: 6, 16>}, {pipeline_mode = #tpu.pipeline_mode<synchronous>, transform_indices = @transform_3, window_bounds = array<i64: 16, 32>}, {pipeline_mode = #tpu.pipeline_mode<synchronous>, transform_indices = @transform_4, window_bounds = array<i64: 3, 16>}, {pipeline_mode = #tpu.pipeline_mode<synchronous>, transform_indices = @transform_5, window_bounds = array<i64: 16, 32>}, {pipeline_mode = #tpu.pipeline_mode<synchronous>, transform_indices = @transform_6, window_bounds = array<i64: 32, 96>}, {pipeline_mode = #tpu.pipeline_mode<synchronous>, transform_indices = @transform_7, window_bounds = array<i64: 32, 32>}, {pipeline_mode = #tpu.pipeline_mode<synchronous>, transform_indices = @transform_8, window_bounds = array<i64: 32, 64>}, {pipeline_mode = #tpu.pipeline_mode<synchronous>, transform_indices = @transform_9, window_bounds = array<i64: 64, 32>}, {pipeline_mode = #tpu.pipeline_mode<synchronous>, transform_indices = @transform_10, window_bounds = array<i64: 32, 96>}, {pipeline_mode = #tpu.pipeline_mode<synchronous>, transform_indices = @transform_11, window_bounds = array<i64: 32, 32>}, {pipeline_mode = #tpu.pipeline_mode<synchronous>, transform_indices = @transform_12, window_bounds = array<i64: 32, 64>}, {pipeline_mode = #tpu.pipeline_mode<synchronous>, transform_indices = @transform_13, window_bounds = array<i64: 64, 32>}, {pipeline_mode = #tpu.pipeline_mode<synchronous>, transform_indices = @transform_14, window_bounds = array<i64: 24, 128>}, {transform_indices = @transform_15, window_bounds = array<i64: 1, 16, 32>}]} {
    %c0 = arith.constant 0 : index
    %c0_0 = arith.constant 0 : index
    %0 = vector.load %arg15[%c0, %c0_0] : memref<24x128xf32, #tpu.memory_space<vmem>>, vector<24x128xf32>
    %c0_1 = arith.constant 0 : index
    %c0_2 = arith.constant 0 : index
    %c0_3 = arith.constant 0 : index
    %1 = vector.load %arg1[%c0_1, %c0_2, %c0_3] : memref<1x128x6xf32, #tpu.memory_space<vmem>>, vector<1x128x6xf32>
    %2 = vector.shape_cast %1 : vector<1x128x6xf32> to vector<128x6xf32>
    %3 = arith.truncf %2 : vector<128x6xf32> to vector<128x6xbf16>
    %c0_4 = arith.constant 0 : index
    %c0_5 = arith.constant 0 : index
    %4 = vector.load %arg3[%c0_4, %c0_5] : memref<6x16xbf16, #tpu.memory_space<vmem>>, vector<6x16xbf16>
    %cst = arith.constant dense<0.000000e+00> : vector<128x16xf32>
    %5 = tpu.matmul %3, %4, %cst {dimension_numbers = #tpu.dot_dimension_numbers<[1], [0], [0], [1], [0, 0, 1, 1], [], []>} : vector<128x6xbf16>, vector<6x16xbf16>, vector<128x16xf32> -> vector<128x16xf32>
    %6 = vector.extract_strided_slice %0 {offsets = [0, 0], sizes = [1, 16], strides = [1, 1]} : vector<24x128xf32> to vector<1x16xf32>
    %7 = vector.broadcast %6 : vector<1x16xf32> to vector<128x16xf32>
    %8 = arith.addf %5, %7 : vector<128x16xf32>
    %9 = arith.mulf %8, %8 : vector<128x16xf32>
    %10 = arith.mulf %8, %9 : vector<128x16xf32>
    %cst_6 = arith.constant 4.471500e-02 : f32
    %11 = vector.broadcast %cst_6 : f32 to vector<128x16xf32>
    %12 = arith.mulf %11, %10 : vector<128x16xf32>
    %13 = arith.addf %8, %12 : vector<128x16xf32>
    %cst_7 = arith.constant 0.797884583 : f32
    %14 = vector.broadcast %cst_7 : f32 to vector<128x16xf32>
    %15 = arith.mulf %14, %13 : vector<128x16xf32>
    %16 = math.tanh %15 : vector<128x16xf32>
    %cst_8 = arith.constant 1.000000e+00 : f32
    %17 = vector.broadcast %cst_8 : f32 to vector<128x16xf32>
    %18 = arith.addf %17, %16 : vector<128x16xf32>
    %cst_9 = arith.constant 5.000000e-01 : f32
    %19 = vector.broadcast %cst_9 : f32 to vector<128x16xf32>
    %20 = arith.mulf %19, %18 : vector<128x16xf32>
    %21 = arith.mulf %8, %20 : vector<128x16xf32>
    %22 = arith.truncf %21 : vector<128x16xf32> to vector<128x16xbf16>
    %c0_10 = arith.constant 0 : index
    %c0_11 = arith.constant 0 : index
    %23 = vector.load %arg4[%c0_10, %c0_11] : memref<16x32xbf16, #tpu.memory_space<vmem>>, vector<16x32xbf16>
    %cst_12 = arith.constant dense<0.000000e+00> : vector<128x32xf32>
    %24 = tpu.matmul %22, %23, %cst_12 {dimension_numbers = #tpu.dot_dimension_numbers<[1], [0], [0], [1], [0, 0, 1, 1], [], []>} : vector<128x16xbf16>, vector<16x32xbf16>, vector<128x32xf32> -> vector<128x32xf32>
    %25 = vector.extract_strided_slice %0 {offsets = [1, 0], sizes = [1, 32], strides = [1, 1]} : vector<24x128xf32> to vector<1x32xf32>
    %26 = vector.broadcast %25 : vector<1x32xf32> to vector<128x32xf32>
    %27 = arith.addf %24, %26 : vector<128x32xf32>
    %28 = vector.shape_cast %27 : vector<128x32xf32> to vector<16x8x32xf32>
    %cst_13 = arith.constant dense<0xFF800000> : vector<16x32xf32>
    %29 = vector.multi_reduction <maximumf>, %28, %cst_13 [1] : vector<16x8x32xf32> to vector<16x32xf32>
    %c0_14 = arith.constant 0 : index
    %c0_15 = arith.constant 0 : index
    %c0_16 = arith.constant 0 : index
    %30 = vector.load %arg2[%c0_14, %c0_15, %c0_16] : memref<1x16x3xf32, #tpu.memory_space<vmem>>, vector<1x16x3xf32>
    %31 = vector.shape_cast %30 : vector<1x16x3xf32> to vector<16x3xf32>
    %32 = arith.truncf %31 : vector<16x3xf32> to vector<16x3xbf16>
    %c0_17 = arith.constant 0 : index
    %c0_18 = arith.constant 0 : index
    %33 = vector.load %arg5[%c0_17, %c0_18] : memref<3x16xbf16, #tpu.memory_space<vmem>>, vector<3x16xbf16>
    %cst_19 = arith.constant dense<0.000000e+00> : vector<16x16xf32>
    %34 = tpu.matmul %32, %33, %cst_19 {dimension_numbers = #tpu.dot_dimension_numbers<[1], [0], [0], [1], [0, 0, 1, 1], [], []>} : vector<16x3xbf16>, vector<3x16xbf16>, vector<16x16xf32> -> vector<16x16xf32>
    %35 = vector.extract_strided_slice %0 {offsets = [2, 0], sizes = [1, 16], strides = [1, 1]} : vector<24x128xf32> to vector<1x16xf32>
    %36 = vector.broadcast %35 : vector<1x16xf32> to vector<16x16xf32>
    %37 = arith.addf %34, %36 : vector<16x16xf32>
    %38 = arith.mulf %37, %37 : vector<16x16xf32>
    %39 = arith.mulf %37, %38 : vector<16x16xf32>
    %cst_20 = arith.constant 4.471500e-02 : f32
    %40 = vector.broadcast %cst_20 : f32 to vector<16x16xf32>
    %41 = arith.mulf %40, %39 : vector<16x16xf32>
    %42 = arith.addf %37, %41 : vector<16x16xf32>
    %cst_21 = arith.constant 0.797884583 : f32
    %43 = vector.broadcast %cst_21 : f32 to vector<16x16xf32>
    %44 = arith.mulf %43, %42 : vector<16x16xf32>
    %45 = math.tanh %44 : vector<16x16xf32>
    %cst_22 = arith.constant 1.000000e+00 : f32
    %46 = vector.broadcast %cst_22 : f32 to vector<16x16xf32>
    %47 = arith.addf %46, %45 : vector<16x16xf32>
    %cst_23 = arith.constant 5.000000e-01 : f32
    %48 = vector.broadcast %cst_23 : f32 to vector<16x16xf32>
    %49 = arith.mulf %48, %47 : vector<16x16xf32>
    %50 = arith.mulf %37, %49 : vector<16x16xf32>
    %51 = arith.truncf %50 : vector<16x16xf32> to vector<16x16xbf16>
    %c0_24 = arith.constant 0 : index
    %c0_25 = arith.constant 0 : index
    %52 = vector.load %arg6[%c0_24, %c0_25] : memref<16x32xbf16, #tpu.memory_space<vmem>>, vector<16x32xbf16>
    %cst_26 = arith.constant dense<0.000000e+00> : vector<16x32xf32>
    %53 = tpu.matmul %51, %52, %cst_26 {dimension_numbers = #tpu.dot_dimension_numbers<[1], [0], [0], [1], [0, 0, 1, 1], [], []>} : vector<16x16xbf16>, vector<16x32xbf16>, vector<16x32xf32> -> vector<16x32xf32>
    %54 = vector.extract_strided_slice %0 {offsets = [3, 0], sizes = [1, 32], strides = [1, 1]} : vector<24x128xf32> to vector<1x32xf32>
    %55 = vector.broadcast %54 : vector<1x32xf32> to vector<16x32xf32>
    %56 = arith.addf %53, %55 : vector<16x32xf32>
    %57 = arith.addf %29, %56 : vector<16x32xf32>
    %58 = vector.extract_strided_slice %0 {offsets = [4, 0], sizes = [1, 32], strides = [1, 1]} : vector<24x128xf32> to vector<1x32xf32>
    %cst_27 = arith.constant 0.000000e+00 : f32
    %59 = vector.broadcast %cst_27 : f32 to vector<7x32xf32>
    %60 = tpu.concatenate %57, %58, %59 in 0 : vector<16x32xf32>, vector<1x32xf32>, vector<7x32xf32> -> vector<24x32xf32>
    %61 = tpu.iota {dimensions = array<i32: 2>} : vector<4x24x24xi32>
    %c17_i32 = arith.constant 17 : i32
    %62 = vector.broadcast %c17_i32 : i32 to vector<4x24x24xi32>
    %63 = arith.cmpi slt, %61, %62 : vector<4x24x24xi32>
    %cst_28 = arith.constant 0.000000e+00 : f32
    %cst_29 = arith.constant -1.000000e+30 : f32
    %64 = vector.broadcast %cst_28 : f32 to vector<4x24x24xf32>
    %65 = vector.broadcast %cst_29 : f32 to vector<4x24x24xf32>
    %66 = arith.select %63, %64, %65 : vector<4x24x24xi1>, vector<4x24x24xf32>
    %67 = vector.extract_strided_slice %0 {offsets = [5, 0], sizes = [1, 32], strides = [1, 1]} : vector<24x128xf32> to vector<1x32xf32>
    %68 = vector.extract_strided_slice %0 {offsets = [6, 0], sizes = [1, 32], strides = [1, 1]} : vector<24x128xf32> to vector<1x32xf32>
    %cst_30 = arith.constant dense<0.000000e+00> : vector<24xf32>
    %69 = vector.multi_reduction <add>, %60, %cst_30 [1] : vector<24x32xf32> to vector<24xf32>
    %70 = vector.shape_cast %69 : vector<24xf32> to vector<24x1xf32>
    %cst_31 = arith.constant 3.200000e+01 : f32
    %71 = vector.broadcast %cst_31 : f32 to vector<24x1xf32>
    %72 = arith.divf %70, %71 : vector<24x1xf32>
    %73 = vector.broadcast %72 : vector<24x1xf32> to vector<24x32xf32>
    %74 = arith.subf %60, %73 : vector<24x32xf32>
    %75 = arith.mulf %74, %74 : vector<24x32xf32>
    %cst_32 = arith.constant dense<0.000000e+00> : vector<24xf32>
    %76 = vector.multi_reduction <add>, %75, %cst_32 [1] : vector<24x32xf32> to vector<24xf32>
    %77 = vector.shape_cast %76 : vector<24xf32> to vector<24x1xf32>
    %cst_33 = arith.constant 3.200000e+01 : f32
    %78 = vector.broadcast %cst_33 : f32 to vector<24x1xf32>
    %79 = arith.divf %77, %78 : vector<24x1xf32>
    %80 = vector.broadcast %72 : vector<24x1xf32> to vector<24x32xf32>
    %81 = arith.subf %60, %80 : vector<24x32xf32>
    %cst_34 = arith.constant 9.99999997E-7 : f32
    %82 = vector.broadcast %cst_34 : f32 to vector<24x1xf32>
    %83 = arith.addf %79, %82 : vector<24x1xf32>
    %84 = math.rsqrt %83 : vector<24x1xf32>
    %85 = vector.broadcast %84 : vector<24x1xf32> to vector<24x32xf32>
    %86 = arith.mulf %81, %85 : vector<24x32xf32>
    %87 = vector.broadcast %67 : vector<1x32xf32> to vector<24x32xf32>
    %88 = arith.mulf %86, %87 : vector<24x32xf32>
    %89 = vector.broadcast %68 : vector<1x32xf32> to vector<24x32xf32>
    %90 = arith.addf %88, %89 : vector<24x32xf32>
    %91 = arith.truncf %90 : vector<24x32xf32> to vector<24x32xbf16>
    %c0_35 = arith.constant 0 : index
    %c0_36 = arith.constant 0 : index
    %92 = vector.load %arg7[%c0_35, %c0_36] : memref<32x96xbf16, #tpu.memory_space<vmem>>, vector<32x96xbf16>
    %cst_37 = arith.constant dense<0.000000e+00> : vector<24x96xf32>
    %93 = tpu.matmul %91, %92, %cst_37 {dimension_numbers = #tpu.dot_dimension_numbers<[1], [0], [0], [1], [0, 0, 1, 1], [], []>} : vector<24x32xbf16>, vector<32x96xbf16>, vector<24x96xf32> -> vector<24x96xf32>
    %94 = tpu.transpose %93, [1, 0] : vector<24x96xf32> -> vector<96x24xf32>
    %95 = vector.shape_cast %94 : vector<96x24xf32> to vector<12x8x24xf32>
    %96 = vector.extract_strided_slice %95 {offsets = [4, 0, 0], sizes = [4, 8, 24], strides = [1, 1, 1]} : vector<12x8x24xf32> to vector<4x8x24xf32>
    %97 = arith.truncf %96 : vector<4x8x24xf32> to vector<4x8x24xbf16>
    %98 = vector.extract_strided_slice %95 {offsets = [8, 0, 0], sizes = [4, 8, 24], strides = [1, 1, 1]} : vector<12x8x24xf32> to vector<4x8x24xf32>
    %99 = arith.truncf %98 : vector<4x8x24xf32> to vector<4x8x24xbf16>
    %100 = vector.extract_strided_slice %93 {offsets = [0, 0], sizes = [24, 8], strides = [1, 1]} : vector<24x96xf32> to vector<24x8xf32>
    %101 = vector.extract_strided_slice %93 {offsets = [0, 8], sizes = [24, 8], strides = [1, 1]} : vector<24x96xf32> to vector<24x8xf32>
    %102 = vector.extract_strided_slice %93 {offsets = [0, 16], sizes = [24, 8], strides = [1, 1]} : vector<24x96xf32> to vector<24x8xf32>
    %103 = vector.extract_strided_slice %93 {offsets = [0, 24], sizes = [24, 8], strides = [1, 1]} : vector<24x96xf32> to vector<24x8xf32>
    %104 = vector.shape_cast %100 : vector<24x8xf32> to vector<1x24x8xf32>
    %105 = vector.shape_cast %101 : vector<24x8xf32> to vector<1x24x8xf32>
    %106 = vector.shape_cast %102 : vector<24x8xf32> to vector<1x24x8xf32>
    %107 = vector.shape_cast %103 : vector<24x8xf32> to vector<1x24x8xf32>
    %108 = tpu.concatenate %104, %105, %106, %107 in 0 : vector<1x24x8xf32>, vector<1x24x8xf32>, vector<1x24x8xf32>, vector<1x24x8xf32> -> vector<4x24x8xf32>
    %109 = arith.truncf %108 : vector<4x24x8xf32> to vector<4x24x8xbf16>
    %cst_38 = arith.constant dense<0.000000e+00> : vector<4x24x24xf32>
    %110 = tpu.matmul %109, %97, %cst_38 {dimension_numbers = #tpu.dot_dimension_numbers<[2], [1], [1], [2], [0, 0, 0, 1, 1, 2], [0], [0]>} : vector<4x24x8xbf16>, vector<4x8x24xbf16>, vector<4x24x24xf32> -> vector<4x24x24xf32>
    %cst_39 = arith.constant 0.353553385 : f32
    %111 = vector.broadcast %cst_39 : f32 to vector<4x24x24xf32>
    %112 = arith.mulf %110, %111 : vector<4x24x24xf32>
    %113 = arith.addf %112, %66 : vector<4x24x24xf32>
    %cst_40 = arith.constant dense<0xFF800000> : vector<4x24xf32>
    %114 = vector.multi_reduction <maximumf>, %113, %cst_40 [2] : vector<4x24x24xf32> to vector<4x24xf32>
    %115 = vector.shape_cast %114 : vector<4x24xf32> to vector<4x24x1xf32>
    %116 = vector.broadcast %115 : vector<4x24x1xf32> to vector<4x24x24xf32>
    %117 = arith.subf %113, %116 : vector<4x24x24xf32>
    %118 = math.exp %117 : vector<4x24x24xf32>
    %cst_41 = arith.constant dense<0.000000e+00> : vector<4x24xf32>
    %119 = vector.multi_reduction <add>, %118, %cst_41 [2] : vector<4x24x24xf32> to vector<4x24xf32>
    %120 = vector.shape_cast %119 : vector<4x24xf32> to vector<4x24x1xf32>
    %121 = tpu.reciprocal %120 {approx = true} : vector<4x24x1xf32> -> vector<4x24x1xf32>
    %122 = vector.broadcast %121 : vector<4x24x1xf32> to vector<4x24x24xf32>
    %123 = arith.mulf %118, %122 : vector<4x24x24xf32>
    %124 = arith.truncf %123 : vector<4x24x24xf32> to vector<4x24x24xbf16>
    %cst_42 = arith.constant dense<0.000000e+00> : vector<4x8x24xf32>
    %125 = tpu.matmul %99, %124, %cst_42 {dimension_numbers = #tpu.dot_dimension_numbers<[2], [2], [1], [1], [0, 0, 0, 1, 1, 1], [0], [0]>} : vector<4x8x24xbf16>, vector<4x24x24xbf16>, vector<4x8x24xf32> -> vector<4x8x24xf32>
    %126 = vector.shape_cast %125 : vector<4x8x24xf32> to vector<32x24xf32>
    %127 = tpu.transpose %126, [1, 0] : vector<32x24xf32> -> vector<24x32xf32>
    %128 = arith.truncf %127 : vector<24x32xf32> to vector<24x32xbf16>
    %c0_43 = arith.constant 0 : index
    %c0_44 = arith.constant 0 : index
    %129 = vector.load %arg8[%c0_43, %c0_44] : memref<32x32xbf16, #tpu.memory_space<vmem>>, vector<32x32xbf16>
    %cst_45 = arith.constant dense<0.000000e+00> : vector<24x32xf32>
    %130 = tpu.matmul %128, %129, %cst_45 {dimension_numbers = #tpu.dot_dimension_numbers<[1], [0], [0], [1], [0, 0, 1, 1], [], []>} : vector<24x32xbf16>, vector<32x32xbf16>, vector<24x32xf32> -> vector<24x32xf32>
    %131 = vector.extract_strided_slice %0 {offsets = [7, 0], sizes = [1, 32], strides = [1, 1]} : vector<24x128xf32> to vector<1x32xf32>
    %132 = vector.broadcast %131 : vector<1x32xf32> to vector<24x32xf32>
    %133 = arith.addf %130, %132 : vector<24x32xf32>
    %134 = arith.addf %60, %133 : vector<24x32xf32>
    %135 = vector.extract_strided_slice %0 {offsets = [8, 0], sizes = [1, 32], strides = [1, 1]} : vector<24x128xf32> to vector<1x32xf32>
    %136 = vector.extract_strided_slice %0 {offsets = [9, 0], sizes = [1, 32], strides = [1, 1]} : vector<24x128xf32> to vector<1x32xf32>
    %cst_46 = arith.constant dense<0.000000e+00> : vector<24xf32>
    %137 = vector.multi_reduction <add>, %134, %cst_46 [1] : vector<24x32xf32> to vector<24xf32>
    %138 = vector.shape_cast %137 : vector<24xf32> to vector<24x1xf32>
    %cst_47 = arith.constant 3.200000e+01 : f32
    %139 = vector.broadcast %cst_47 : f32 to vector<24x1xf32>
    %140 = arith.divf %138, %139 : vector<24x1xf32>
    %141 = vector.broadcast %140 : vector<24x1xf32> to vector<24x32xf32>
    %142 = arith.subf %134, %141 : vector<24x32xf32>
    %143 = arith.mulf %142, %142 : vector<24x32xf32>
    %cst_48 = arith.constant dense<0.000000e+00> : vector<24xf32>
    %144 = vector.multi_reduction <add>, %143, %cst_48 [1] : vector<24x32xf32> to vector<24xf32>
    %145 = vector.shape_cast %144 : vector<24xf32> to vector<24x1xf32>
    %cst_49 = arith.constant 3.200000e+01 : f32
    %146 = vector.broadcast %cst_49 : f32 to vector<24x1xf32>
    %147 = arith.divf %145, %146 : vector<24x1xf32>
    %148 = vector.broadcast %140 : vector<24x1xf32> to vector<24x32xf32>
    %149 = arith.subf %134, %148 : vector<24x32xf32>
    %cst_50 = arith.constant 9.99999997E-7 : f32
    %150 = vector.broadcast %cst_50 : f32 to vector<24x1xf32>
    %151 = arith.addf %147, %150 : vector<24x1xf32>
    %152 = math.rsqrt %151 : vector<24x1xf32>
    %153 = vector.broadcast %152 : vector<24x1xf32> to vector<24x32xf32>
    %154 = arith.mulf %149, %153 : vector<24x32xf32>
    %155 = vector.broadcast %135 : vector<1x32xf32> to vector<24x32xf32>
    %156 = arith.mulf %154, %155 : vector<24x32xf32>
    %157 = vector.broadcast %136 : vector<1x32xf32> to vector<24x32xf32>
    %158 = arith.addf %156, %157 : vector<24x32xf32>
    %159 = arith.truncf %158 : vector<24x32xf32> to vector<24x32xbf16>
    %c0_51 = arith.constant 0 : index
    %c0_52 = arith.constant 0 : index
    %160 = vector.load %arg9[%c0_51, %c0_52] : memref<32x64xbf16, #tpu.memory_space<vmem>>, vector<32x64xbf16>
    %cst_53 = arith.constant dense<0.000000e+00> : vector<24x64xf32>
    %161 = tpu.matmul %159, %160, %cst_53 {dimension_numbers = #tpu.dot_dimension_numbers<[1], [0], [0], [1], [0, 0, 1, 1], [], []>} : vector<24x32xbf16>, vector<32x64xbf16>, vector<24x64xf32> -> vector<24x64xf32>
    %162 = vector.extract_strided_slice %0 {offsets = [10, 0], sizes = [1, 64], strides = [1, 1]} : vector<24x128xf32> to vector<1x64xf32>
    %163 = vector.broadcast %162 : vector<1x64xf32> to vector<24x64xf32>
    %164 = arith.addf %161, %163 : vector<24x64xf32>
    %165 = arith.mulf %164, %164 : vector<24x64xf32>
    %166 = arith.mulf %164, %165 : vector<24x64xf32>
    %cst_54 = arith.constant 4.471500e-02 : f32
    %167 = vector.broadcast %cst_54 : f32 to vector<24x64xf32>
    %168 = arith.mulf %167, %166 : vector<24x64xf32>
    %169 = arith.addf %164, %168 : vector<24x64xf32>
    %cst_55 = arith.constant 0.797884583 : f32
    %170 = vector.broadcast %cst_55 : f32 to vector<24x64xf32>
    %171 = arith.mulf %170, %169 : vector<24x64xf32>
    %172 = math.tanh %171 : vector<24x64xf32>
    %cst_56 = arith.constant 1.000000e+00 : f32
    %173 = vector.broadcast %cst_56 : f32 to vector<24x64xf32>
    %174 = arith.addf %173, %172 : vector<24x64xf32>
    %cst_57 = arith.constant 5.000000e-01 : f32
    %175 = vector.broadcast %cst_57 : f32 to vector<24x64xf32>
    %176 = arith.mulf %175, %174 : vector<24x64xf32>
    %177 = arith.mulf %164, %176 : vector<24x64xf32>
    %178 = arith.truncf %177 : vector<24x64xf32> to vector<24x64xbf16>
    %c0_58 = arith.constant 0 : index
    %c0_59 = arith.constant 0 : index
    %179 = vector.load %arg10[%c0_58, %c0_59] : memref<64x32xbf16, #tpu.memory_space<vmem>>, vector<64x32xbf16>
    %cst_60 = arith.constant dense<0.000000e+00> : vector<24x32xf32>
    %180 = tpu.matmul %178, %179, %cst_60 {dimension_numbers = #tpu.dot_dimension_numbers<[1], [0], [0], [1], [0, 0, 1, 1], [], []>} : vector<24x64xbf16>, vector<64x32xbf16>, vector<24x32xf32> -> vector<24x32xf32>
    %181 = vector.extract_strided_slice %0 {offsets = [11, 0], sizes = [1, 32], strides = [1, 1]} : vector<24x128xf32> to vector<1x32xf32>
    %182 = vector.broadcast %181 : vector<1x32xf32> to vector<24x32xf32>
    %183 = arith.addf %180, %182 : vector<24x32xf32>
    %184 = arith.addf %134, %183 : vector<24x32xf32>
    %185 = vector.extract_strided_slice %0 {offsets = [12, 0], sizes = [1, 32], strides = [1, 1]} : vector<24x128xf32> to vector<1x32xf32>
    %186 = vector.extract_strided_slice %0 {offsets = [13, 0], sizes = [1, 32], strides = [1, 1]} : vector<24x128xf32> to vector<1x32xf32>
    %cst_61 = arith.constant dense<0.000000e+00> : vector<24xf32>
    %187 = vector.multi_reduction <add>, %184, %cst_61 [1] : vector<24x32xf32> to vector<24xf32>
    %188 = vector.shape_cast %187 : vector<24xf32> to vector<24x1xf32>
    %cst_62 = arith.constant 3.200000e+01 : f32
    %189 = vector.broadcast %cst_62 : f32 to vector<24x1xf32>
    %190 = arith.divf %188, %189 : vector<24x1xf32>
    %191 = vector.broadcast %190 : vector<24x1xf32> to vector<24x32xf32>
    %192 = arith.subf %184, %191 : vector<24x32xf32>
    %193 = arith.mulf %192, %192 : vector<24x32xf32>
    %cst_63 = arith.constant dense<0.000000e+00> : vector<24xf32>
    %194 = vector.multi_reduction <add>, %193, %cst_63 [1] : vector<24x32xf32> to vector<24xf32>
    %195 = vector.shape_cast %194 : vector<24xf32> to vector<24x1xf32>
    %cst_64 = arith.constant 3.200000e+01 : f32
    %196 = vector.broadcast %cst_64 : f32 to vector<24x1xf32>
    %197 = arith.divf %195, %196 : vector<24x1xf32>
    %198 = vector.broadcast %190 : vector<24x1xf32> to vector<24x32xf32>
    %199 = arith.subf %184, %198 : vector<24x32xf32>
    %cst_65 = arith.constant 9.99999997E-7 : f32
    %200 = vector.broadcast %cst_65 : f32 to vector<24x1xf32>
    %201 = arith.addf %197, %200 : vector<24x1xf32>
    %202 = math.rsqrt %201 : vector<24x1xf32>
    %203 = vector.broadcast %202 : vector<24x1xf32> to vector<24x32xf32>
    %204 = arith.mulf %199, %203 : vector<24x32xf32>
    %205 = vector.broadcast %185 : vector<1x32xf32> to vector<24x32xf32>
    %206 = arith.mulf %204, %205 : vector<24x32xf32>
    %207 = vector.broadcast %186 : vector<1x32xf32> to vector<24x32xf32>
    %208 = arith.addf %206, %207 : vector<24x32xf32>
    %209 = arith.truncf %208 : vector<24x32xf32> to vector<24x32xbf16>
    %c0_66 = arith.constant 0 : index
    %c0_67 = arith.constant 0 : index
    %210 = vector.load %arg11[%c0_66, %c0_67] : memref<32x96xbf16, #tpu.memory_space<vmem>>, vector<32x96xbf16>
    %cst_68 = arith.constant dense<0.000000e+00> : vector<24x96xf32>
    %211 = tpu.matmul %209, %210, %cst_68 {dimension_numbers = #tpu.dot_dimension_numbers<[1], [0], [0], [1], [0, 0, 1, 1], [], []>} : vector<24x32xbf16>, vector<32x96xbf16>, vector<24x96xf32> -> vector<24x96xf32>
    %212 = tpu.transpose %211, [1, 0] : vector<24x96xf32> -> vector<96x24xf32>
    %213 = vector.shape_cast %212 : vector<96x24xf32> to vector<12x8x24xf32>
    %214 = vector.extract_strided_slice %213 {offsets = [4, 0, 0], sizes = [4, 8, 24], strides = [1, 1, 1]} : vector<12x8x24xf32> to vector<4x8x24xf32>
    %215 = arith.truncf %214 : vector<4x8x24xf32> to vector<4x8x24xbf16>
    %216 = vector.extract_strided_slice %213 {offsets = [8, 0, 0], sizes = [4, 8, 24], strides = [1, 1, 1]} : vector<12x8x24xf32> to vector<4x8x24xf32>
    %217 = arith.truncf %216 : vector<4x8x24xf32> to vector<4x8x24xbf16>
    %218 = vector.extract_strided_slice %211 {offsets = [0, 0], sizes = [24, 8], strides = [1, 1]} : vector<24x96xf32> to vector<24x8xf32>
    %219 = vector.extract_strided_slice %211 {offsets = [0, 8], sizes = [24, 8], strides = [1, 1]} : vector<24x96xf32> to vector<24x8xf32>
    %220 = vector.extract_strided_slice %211 {offsets = [0, 16], sizes = [24, 8], strides = [1, 1]} : vector<24x96xf32> to vector<24x8xf32>
    %221 = vector.extract_strided_slice %211 {offsets = [0, 24], sizes = [24, 8], strides = [1, 1]} : vector<24x96xf32> to vector<24x8xf32>
    %222 = vector.shape_cast %218 : vector<24x8xf32> to vector<1x24x8xf32>
    %223 = vector.shape_cast %219 : vector<24x8xf32> to vector<1x24x8xf32>
    %224 = vector.shape_cast %220 : vector<24x8xf32> to vector<1x24x8xf32>
    %225 = vector.shape_cast %221 : vector<24x8xf32> to vector<1x24x8xf32>
    %226 = tpu.concatenate %222, %223, %224, %225 in 0 : vector<1x24x8xf32>, vector<1x24x8xf32>, vector<1x24x8xf32>, vector<1x24x8xf32> -> vector<4x24x8xf32>
    %227 = arith.truncf %226 : vector<4x24x8xf32> to vector<4x24x8xbf16>
    %cst_69 = arith.constant dense<0.000000e+00> : vector<4x24x24xf32>
    %228 = tpu.matmul %227, %215, %cst_69 {dimension_numbers = #tpu.dot_dimension_numbers<[2], [1], [1], [2], [0, 0, 0, 1, 1, 2], [0], [0]>} : vector<4x24x8xbf16>, vector<4x8x24xbf16>, vector<4x24x24xf32> -> vector<4x24x24xf32>
    %cst_70 = arith.constant 0.353553385 : f32
    %229 = vector.broadcast %cst_70 : f32 to vector<4x24x24xf32>
    %230 = arith.mulf %228, %229 : vector<4x24x24xf32>
    %231 = arith.addf %230, %66 : vector<4x24x24xf32>
    %cst_71 = arith.constant dense<0xFF800000> : vector<4x24xf32>
    %232 = vector.multi_reduction <maximumf>, %231, %cst_71 [2] : vector<4x24x24xf32> to vector<4x24xf32>
    %233 = vector.shape_cast %232 : vector<4x24xf32> to vector<4x24x1xf32>
    %234 = vector.broadcast %233 : vector<4x24x1xf32> to vector<4x24x24xf32>
    %235 = arith.subf %231, %234 : vector<4x24x24xf32>
    %236 = math.exp %235 : vector<4x24x24xf32>
    %cst_72 = arith.constant dense<0.000000e+00> : vector<4x24xf32>
    %237 = vector.multi_reduction <add>, %236, %cst_72 [2] : vector<4x24x24xf32> to vector<4x24xf32>
    %238 = vector.shape_cast %237 : vector<4x24xf32> to vector<4x24x1xf32>
    %239 = tpu.reciprocal %238 {approx = true} : vector<4x24x1xf32> -> vector<4x24x1xf32>
    %240 = vector.broadcast %239 : vector<4x24x1xf32> to vector<4x24x24xf32>
    %241 = arith.mulf %236, %240 : vector<4x24x24xf32>
    %242 = arith.truncf %241 : vector<4x24x24xf32> to vector<4x24x24xbf16>
    %cst_73 = arith.constant dense<0.000000e+00> : vector<4x8x24xf32>
    %243 = tpu.matmul %217, %242, %cst_73 {dimension_numbers = #tpu.dot_dimension_numbers<[2], [2], [1], [1], [0, 0, 0, 1, 1, 1], [0], [0]>} : vector<4x8x24xbf16>, vector<4x24x24xbf16>, vector<4x8x24xf32> -> vector<4x8x24xf32>
    %244 = vector.shape_cast %243 : vector<4x8x24xf32> to vector<32x24xf32>
    %245 = tpu.transpose %244, [1, 0] : vector<32x24xf32> -> vector<24x32xf32>
    %246 = arith.truncf %245 : vector<24x32xf32> to vector<24x32xbf16>
    %c0_74 = arith.constant 0 : index
    %c0_75 = arith.constant 0 : index
    %247 = vector.load %arg12[%c0_74, %c0_75] : memref<32x32xbf16, #tpu.memory_space<vmem>>, vector<32x32xbf16>
    %cst_76 = arith.constant dense<0.000000e+00> : vector<24x32xf32>
    %248 = tpu.matmul %246, %247, %cst_76 {dimension_numbers = #tpu.dot_dimension_numbers<[1], [0], [0], [1], [0, 0, 1, 1], [], []>} : vector<24x32xbf16>, vector<32x32xbf16>, vector<24x32xf32> -> vector<24x32xf32>
    %249 = vector.extract_strided_slice %0 {offsets = [14, 0], sizes = [1, 32], strides = [1, 1]} : vector<24x128xf32> to vector<1x32xf32>
    %250 = vector.broadcast %249 : vector<1x32xf32> to vector<24x32xf32>
    %251 = arith.addf %248, %250 : vector<24x32xf32>
    %252 = arith.addf %184, %251 : vector<24x32xf32>
    %253 = vector.extract_strided_slice %0 {offsets = [15, 0], sizes = [1, 32], strides = [1, 1]} : vector<24x128xf32> to vector<1x32xf32>
    %254 = vector.extract_strided_slice %0 {offsets = [16, 0], sizes = [1, 32], strides = [1, 1]} : vector<24x128xf32> to vector<1x32xf32>
    %cst_77 = arith.constant dense<0.000000e+00> : vector<24xf32>
    %255 = vector.multi_reduction <add>, %252, %cst_77 [1] : vector<24x32xf32> to vector<24xf32>
    %256 = vector.shape_cast %255 : vector<24xf32> to vector<24x1xf32>
    %cst_78 = arith.constant 3.200000e+01 : f32
    %257 = vector.broadcast %cst_78 : f32 to vector<24x1xf32>
    %258 = arith.divf %256, %257 : vector<24x1xf32>
    %259 = vector.broadcast %258 : vector<24x1xf32> to vector<24x32xf32>
    %260 = arith.subf %252, %259 : vector<24x32xf32>
    %261 = arith.mulf %260, %260 : vector<24x32xf32>
    %cst_79 = arith.constant dense<0.000000e+00> : vector<24xf32>
    %262 = vector.multi_reduction <add>, %261, %cst_79 [1] : vector<24x32xf32> to vector<24xf32>
    %263 = vector.shape_cast %262 : vector<24xf32> to vector<24x1xf32>
    %cst_80 = arith.constant 3.200000e+01 : f32
    %264 = vector.broadcast %cst_80 : f32 to vector<24x1xf32>
    %265 = arith.divf %263, %264 : vector<24x1xf32>
    %266 = vector.broadcast %258 : vector<24x1xf32> to vector<24x32xf32>
    %267 = arith.subf %252, %266 : vector<24x32xf32>
    %cst_81 = arith.constant 9.99999997E-7 : f32
    %268 = vector.broadcast %cst_81 : f32 to vector<24x1xf32>
    %269 = arith.addf %265, %268 : vector<24x1xf32>
    %270 = math.rsqrt %269 : vector<24x1xf32>
    %271 = vector.broadcast %270 : vector<24x1xf32> to vector<24x32xf32>
    %272 = arith.mulf %267, %271 : vector<24x32xf32>
    %273 = vector.broadcast %253 : vector<1x32xf32> to vector<24x32xf32>
    %274 = arith.mulf %272, %273 : vector<24x32xf32>
    %275 = vector.broadcast %254 : vector<1x32xf32> to vector<24x32xf32>
    %276 = arith.addf %274, %275 : vector<24x32xf32>
    %277 = arith.truncf %276 : vector<24x32xf32> to vector<24x32xbf16>
    %c0_82 = arith.constant 0 : index
    %c0_83 = arith.constant 0 : index
    %278 = vector.load %arg13[%c0_82, %c0_83] : memref<32x64xbf16, #tpu.memory_space<vmem>>, vector<32x64xbf16>
    %cst_84 = arith.constant dense<0.000000e+00> : vector<24x64xf32>
    %279 = tpu.matmul %277, %278, %cst_84 {dimension_numbers = #tpu.dot_dimension_numbers<[1], [0], [0], [1], [0, 0, 1, 1], [], []>} : vector<24x32xbf16>, vector<32x64xbf16>, vector<24x64xf32> -> vector<24x64xf32>
    %280 = vector.extract_strided_slice %0 {offsets = [17, 0], sizes = [1, 64], strides = [1, 1]} : vector<24x128xf32> to vector<1x64xf32>
    %281 = vector.broadcast %280 : vector<1x64xf32> to vector<24x64xf32>
    %282 = arith.addf %279, %281 : vector<24x64xf32>
    %283 = arith.mulf %282, %282 : vector<24x64xf32>
    %284 = arith.mulf %282, %283 : vector<24x64xf32>
    %cst_85 = arith.constant 4.471500e-02 : f32
    %285 = vector.broadcast %cst_85 : f32 to vector<24x64xf32>
    %286 = arith.mulf %285, %284 : vector<24x64xf32>
    %287 = arith.addf %282, %286 : vector<24x64xf32>
    %cst_86 = arith.constant 0.797884583 : f32
    %288 = vector.broadcast %cst_86 : f32 to vector<24x64xf32>
    %289 = arith.mulf %288, %287 : vector<24x64xf32>
    %290 = math.tanh %289 : vector<24x64xf32>
    %cst_87 = arith.constant 1.000000e+00 : f32
    %291 = vector.broadcast %cst_87 : f32 to vector<24x64xf32>
    %292 = arith.addf %291, %290 : vector<24x64xf32>
    %cst_88 = arith.constant 5.000000e-01 : f32
    %293 = vector.broadcast %cst_88 : f32 to vector<24x64xf32>
    %294 = arith.mulf %293, %292 : vector<24x64xf32>
    %295 = arith.mulf %282, %294 : vector<24x64xf32>
    %296 = arith.truncf %295 : vector<24x64xf32> to vector<24x64xbf16>
    %c0_89 = arith.constant 0 : index
    %c0_90 = arith.constant 0 : index
    %297 = vector.load %arg14[%c0_89, %c0_90] : memref<64x32xbf16, #tpu.memory_space<vmem>>, vector<64x32xbf16>
    %cst_91 = arith.constant dense<0.000000e+00> : vector<24x32xf32>
    %298 = tpu.matmul %296, %297, %cst_91 {dimension_numbers = #tpu.dot_dimension_numbers<[1], [0], [0], [1], [0, 0, 1, 1], [], []>} : vector<24x64xbf16>, vector<64x32xbf16>, vector<24x32xf32> -> vector<24x32xf32>
    %299 = vector.extract_strided_slice %0 {offsets = [18, 0], sizes = [1, 32], strides = [1, 1]} : vector<24x128xf32> to vector<1x32xf32>
    %300 = vector.broadcast %299 : vector<1x32xf32> to vector<24x32xf32>
    %301 = arith.addf %298, %300 : vector<24x32xf32>
    %302 = arith.addf %252, %301 : vector<24x32xf32>
    %303 = vector.extract_strided_slice %0 {offsets = [19, 0], sizes = [1, 32], strides = [1, 1]} : vector<24x128xf32> to vector<1x32xf32>
    %304 = vector.extract_strided_slice %0 {offsets = [20, 0], sizes = [1, 32], strides = [1, 1]} : vector<24x128xf32> to vector<1x32xf32>
    %cst_92 = arith.constant dense<0.000000e+00> : vector<24xf32>
    %305 = vector.multi_reduction <add>, %302, %cst_92 [1] : vector<24x32xf32> to vector<24xf32>
    %306 = vector.shape_cast %305 : vector<24xf32> to vector<24x1xf32>
    %cst_93 = arith.constant 3.200000e+01 : f32
    %307 = vector.broadcast %cst_93 : f32 to vector<24x1xf32>
    %308 = arith.divf %306, %307 : vector<24x1xf32>
    %309 = vector.broadcast %308 : vector<24x1xf32> to vector<24x32xf32>
    %310 = arith.subf %302, %309 : vector<24x32xf32>
    %311 = arith.mulf %310, %310 : vector<24x32xf32>
    %cst_94 = arith.constant dense<0.000000e+00> : vector<24xf32>
    %312 = vector.multi_reduction <add>, %311, %cst_94 [1] : vector<24x32xf32> to vector<24xf32>
    %313 = vector.shape_cast %312 : vector<24xf32> to vector<24x1xf32>
    %cst_95 = arith.constant 3.200000e+01 : f32
    %314 = vector.broadcast %cst_95 : f32 to vector<24x1xf32>
    %315 = arith.divf %313, %314 : vector<24x1xf32>
    %316 = vector.broadcast %308 : vector<24x1xf32> to vector<24x32xf32>
    %317 = arith.subf %302, %316 : vector<24x32xf32>
    %cst_96 = arith.constant 9.99999997E-7 : f32
    %318 = vector.broadcast %cst_96 : f32 to vector<24x1xf32>
    %319 = arith.addf %315, %318 : vector<24x1xf32>
    %320 = math.rsqrt %319 : vector<24x1xf32>
    %321 = vector.broadcast %320 : vector<24x1xf32> to vector<24x32xf32>
    %322 = arith.mulf %317, %321 : vector<24x32xf32>
    %323 = vector.broadcast %303 : vector<1x32xf32> to vector<24x32xf32>
    %324 = arith.mulf %322, %323 : vector<24x32xf32>
    %325 = vector.broadcast %304 : vector<1x32xf32> to vector<24x32xf32>
    %326 = arith.addf %324, %325 : vector<24x32xf32>
    %327 = vector.extract_strided_slice %326 {offsets = [0, 0], sizes = [16, 32], strides = [1, 1]} : vector<24x32xf32> to vector<16x32xf32>
    %c0_97 = arith.constant 0 : index
    %c0_98 = arith.constant 0 : index
    %c0_99 = arith.constant 0 : index
    %328 = vector.load %arg16[%c0_97, %c0_98, %c0_99] : memref<1x16x32xf32, #tpu.memory_space<vmem>>, vector<1x16x32xf32>
    %329 = vector.shape_cast %328 : vector<1x16x32xf32> to vector<16x32xf32>
    %330 = vector.shape_cast %327 : vector<16x32xf32> to vector<1x16x32xf32>
    tpu.vector_store %arg16[%c0_97, %c0_98, %c0_99], %330 {strides = array<i32>} : memref<1x16x32xf32, #tpu.memory_space<vmem>>, vector<1x16x32xf32>,
    return
  }
  func.func @transform_0(%arg0: i32) -> (i32, i32, i32) {
    %c0_i32 = arith.constant 0 : i32
    %c0_i32_0 = arith.constant 0 : i32
    %c0_i32_1 = arith.constant 0 : i32
    return %arg0, %c0_i32, %c0_i32_0 : i32, i32, i32
  }
  func.func @transform_1(%arg0: i32) -> (i32, i32, i32) {
    %c0_i32 = arith.constant 0 : i32
    %c0_i32_0 = arith.constant 0 : i32
    %c0_i32_1 = arith.constant 0 : i32
    return %arg0, %c0_i32, %c0_i32_0 : i32, i32, i32
  }
  func.func @transform_2(%arg0: i32) -> (i32, i32) {
    %c0_i32 = arith.constant 0 : i32
    %c0_i32_0 = arith.constant 0 : i32
    %c0_i32_1 = arith.constant 0 : i32
    return %c0_i32, %c0_i32_0 : i32, i32
  }
  func.func @transform_3(%arg0: i32) -> (i32, i32) {
    %c0_i32 = arith.constant 0 : i32
    %c0_i32_0 = arith.constant 0 : i32
    %c0_i32_1 = arith.constant 0 : i32
    return %c0_i32, %c0_i32_0 : i32, i32
  }
  func.func @transform_4(%arg0: i32) -> (i32, i32) {
    %c0_i32 = arith.constant 0 : i32
    %c0_i32_0 = arith.constant 0 : i32
    %c0_i32_1 = arith.constant 0 : i32
    return %c0_i32, %c0_i32_0 : i32, i32
  }
  func.func @transform_5(%arg0: i32) -> (i32, i32) {
    %c0_i32 = arith.constant 0 : i32
    %c0_i32_0 = arith.constant 0 : i32
    %c0_i32_1 = arith.constant 0 : i32
    return %c0_i32, %c0_i32_0 : i32, i32
  }
  func.func @transform_6(%arg0: i32) -> (i32, i32) {
    %c0_i32 = arith.constant 0 : i32
    %c0_i32_0 = arith.constant 0 : i32
    %c0_i32_1 = arith.constant 0 : i32
    return %c0_i32, %c0_i32_0 : i32, i32
  }
  func.func @transform_7(%arg0: i32) -> (i32, i32) {
    %c0_i32 = arith.constant 0 : i32
    %c0_i32_0 = arith.constant 0 : i32
    %c0_i32_1 = arith.constant 0 : i32
    return %c0_i32, %c0_i32_0 : i32, i32
  }
  func.func @transform_8(%arg0: i32) -> (i32, i32) {
    %c0_i32 = arith.constant 0 : i32
    %c0_i32_0 = arith.constant 0 : i32
    %c0_i32_1 = arith.constant 0 : i32
    return %c0_i32, %c0_i32_0 : i32, i32
  }
  func.func @transform_9(%arg0: i32) -> (i32, i32) {
    %c0_i32 = arith.constant 0 : i32
    %c0_i32_0 = arith.constant 0 : i32
    %c0_i32_1 = arith.constant 0 : i32
    return %c0_i32, %c0_i32_0 : i32, i32
  }
  func.func @transform_10(%arg0: i32) -> (i32, i32) {
    %c0_i32 = arith.constant 0 : i32
    %c0_i32_0 = arith.constant 0 : i32
    %c0_i32_1 = arith.constant 0 : i32
    return %c0_i32, %c0_i32_0 : i32, i32
  }
  func.func @transform_11(%arg0: i32) -> (i32, i32) {
    %c0_i32 = arith.constant 0 : i32
    %c0_i32_0 = arith.constant 0 : i32
    %c0_i32_1 = arith.constant 0 : i32
    return %c0_i32, %c0_i32_0 : i32, i32
  }
  func.func @transform_12(%arg0: i32) -> (i32, i32) {
    %c0_i32 = arith.constant 0 : i32
    %c0_i32_0 = arith.constant 0 : i32
    %c0_i32_1 = arith.constant 0 : i32
    return %c0_i32, %c0_i32_0 : i32, i32
  }
  func.func @transform_13(%arg0: i32) -> (i32, i32) {
    %c0_i32 = arith.constant 0 : i32
    %c0_i32_0 = arith.constant 0 : i32
    %c0_i32_1 = arith.constant 0 : i32
    return %c0_i32, %c0_i32_0 : i32, i32
  }
  func.func @transform_14(%arg0: i32) -> (i32, i32) {
    %c0_i32 = arith.constant 0 : i32
    %c0_i32_0 = arith.constant 0 : i32
    %c0_i32_1 = arith.constant 0 : i32
    return %c0_i32, %c0_i32_0 : i32, i32
  }
  func.func @transform_15(%arg0: i32) -> (i32, i32, i32) {
    %c0_i32 = arith.constant 0 : i32
    %c0_i32_0 = arith.constant 0 : i32
    %c0_i32_1 = arith.constant 0 : i32
    return %arg0, %c0_i32, %c0_i32_0 : i32, i32, i32
  }
}

module attributes {stable_mosaic.version = 11 : i64} {
  func.func @_decoder_kernel(%arg0: i32, %arg1: memref<1x32x16xbf16, #tpu.memory_space<vmem>>, %arg2: memref<1x64x32xbf16, #tpu.memory_space<vmem>>, %arg3: memref<1x16x32xf32, #tpu.memory_space<vmem>>, %arg4: memref<1x32x6xf32, #tpu.memory_space<vmem>>, %arg5: memref<1x64x6xf32, #tpu.memory_space<vmem>>, %arg6: memref<38x24xbf16, #tpu.memory_space<vmem>>, %arg7: memref<24x24xbf16, #tpu.memory_space<vmem>>, %arg8: memref<30x32xbf16, #tpu.memory_space<vmem>>, %arg9: memref<32x32xbf16, #tpu.memory_space<vmem>>, %arg10: memref<32x32xbf16, #tpu.memory_space<vmem>>, %arg11: memref<32x128xbf16, #tpu.memory_space<vmem>>, %arg12: memref<8x128xf32, #tpu.memory_space<vmem>>, %arg13: memref<1x64x128xf32, #tpu.memory_space<vmem>>) attributes {dimension_semantics = [#tpu.dimension_semantics<parallel>], iteration_bounds = array<i64: 2>, scalar_prefetch = 0 : i64, scratch_operands = 0 : i64, tpu.core_type = #tpu.core_type<tc>, window_params = [{transform_indices = @transform_0, window_bounds = array<i64: 1, 32, 16>}, {transform_indices = @transform_1, window_bounds = array<i64: 1, 64, 32>}, {transform_indices = @transform_2, window_bounds = array<i64: 1, 16, 32>}, {transform_indices = @transform_3, window_bounds = array<i64: 1, 32, 6>}, {transform_indices = @transform_4, window_bounds = array<i64: 1, 64, 6>}, {pipeline_mode = #tpu.pipeline_mode<synchronous>, transform_indices = @transform_5, window_bounds = array<i64: 38, 24>}, {pipeline_mode = #tpu.pipeline_mode<synchronous>, transform_indices = @transform_6, window_bounds = array<i64: 24, 24>}, {pipeline_mode = #tpu.pipeline_mode<synchronous>, transform_indices = @transform_7, window_bounds = array<i64: 30, 32>}, {pipeline_mode = #tpu.pipeline_mode<synchronous>, transform_indices = @transform_8, window_bounds = array<i64: 32, 32>}, {pipeline_mode = #tpu.pipeline_mode<synchronous>, transform_indices = @transform_9, window_bounds = array<i64: 32, 32>}, {pipeline_mode = #tpu.pipeline_mode<synchronous>, transform_indices = @transform_10, window_bounds = array<i64: 32, 128>}, {pipeline_mode = #tpu.pipeline_mode<synchronous>, transform_indices = @transform_11, window_bounds = array<i64: 8, 128>}, {transform_indices = @transform_12, window_bounds = array<i64: 1, 64, 128>}]} {
    %c0 = arith.constant 0 : index
    %c0_0 = arith.constant 0 : index
    %0 = vector.load %arg12[%c0, %c0_0] : memref<8x128xf32, #tpu.memory_space<vmem>>, vector<8x128xf32>
    %c0_1 = arith.constant 0 : index
    %c0_2 = arith.constant 0 : index
    %c0_3 = arith.constant 0 : index
    %1 = vector.load %arg1[%c0_1, %c0_2, %c0_3] : memref<1x32x16xbf16, #tpu.memory_space<vmem>>, vector<1x32x16xbf16>
    %2 = vector.shape_cast %1 : vector<1x32x16xbf16> to vector<32x16xbf16>
    %c0_4 = arith.constant 0 : index
    %c0_5 = arith.constant 0 : index
    %c0_6 = arith.constant 0 : index
    %3 = vector.load %arg3[%c0_4, %c0_5, %c0_6] : memref<1x16x32xf32, #tpu.memory_space<vmem>>, vector<1x16x32xf32>
    %4 = vector.shape_cast %3 : vector<1x16x32xf32> to vector<16x32xf32>
    %5 = arith.truncf %4 : vector<16x32xf32> to vector<16x32xbf16>
    %cst = arith.constant dense<0.000000e+00> : vector<32x32xf32>
    %6 = tpu.matmul %2, %5, %cst {dimension_numbers = #tpu.dot_dimension_numbers<[1], [0], [0], [1], [0, 0, 1, 1], [], []>} : vector<32x16xbf16>, vector<16x32xbf16>, vector<32x32xf32> -> vector<32x32xf32>
    %c0_7 = arith.constant 0 : index
    %c0_8 = arith.constant 0 : index
    %c0_9 = arith.constant 0 : index
    %7 = vector.load %arg4[%c0_7, %c0_8, %c0_9] : memref<1x32x6xf32, #tpu.memory_space<vmem>>, vector<1x32x6xf32>
    %8 = vector.shape_cast %7 : vector<1x32x6xf32> to vector<32x6xf32>
    %9 = tpu.concatenate %6, %8 in 1 : vector<32x32xf32>, vector<32x6xf32> -> vector<32x38xf32>
    %10 = arith.truncf %9 : vector<32x38xf32> to vector<32x38xbf16>
    %c0_10 = arith.constant 0 : index
    %c0_11 = arith.constant 0 : index
    %11 = vector.load %arg6[%c0_10, %c0_11] : memref<38x24xbf16, #tpu.memory_space<vmem>>, vector<38x24xbf16>
    %cst_12 = arith.constant dense<0.000000e+00> : vector<32x24xf32>
    %12 = tpu.matmul %10, %11, %cst_12 {dimension_numbers = #tpu.dot_dimension_numbers<[1], [0], [0], [1], [0, 0, 1, 1], [], []>} : vector<32x38xbf16>, vector<38x24xbf16>, vector<32x24xf32> -> vector<32x24xf32>
    %13 = vector.extract_strided_slice %0 {offsets = [0, 0], sizes = [1, 24], strides = [1, 1]} : vector<8x128xf32> to vector<1x24xf32>
    %14 = vector.broadcast %13 : vector<1x24xf32> to vector<32x24xf32>
    %15 = arith.addf %12, %14 : vector<32x24xf32>
    %16 = arith.mulf %15, %15 : vector<32x24xf32>
    %17 = arith.mulf %15, %16 : vector<32x24xf32>
    %cst_13 = arith.constant 4.471500e-02 : f32
    %18 = vector.broadcast %cst_13 : f32 to vector<32x24xf32>
    %19 = arith.mulf %18, %17 : vector<32x24xf32>
    %20 = arith.addf %15, %19 : vector<32x24xf32>
    %cst_14 = arith.constant 0.797884583 : f32
    %21 = vector.broadcast %cst_14 : f32 to vector<32x24xf32>
    %22 = arith.mulf %21, %20 : vector<32x24xf32>
    %23 = math.tanh %22 : vector<32x24xf32>
    %cst_15 = arith.constant 1.000000e+00 : f32
    %24 = vector.broadcast %cst_15 : f32 to vector<32x24xf32>
    %25 = arith.addf %24, %23 : vector<32x24xf32>
    %cst_16 = arith.constant 5.000000e-01 : f32
    %26 = vector.broadcast %cst_16 : f32 to vector<32x24xf32>
    %27 = arith.mulf %26, %25 : vector<32x24xf32>
    %28 = arith.mulf %15, %27 : vector<32x24xf32>
    %29 = arith.truncf %28 : vector<32x24xf32> to vector<32x24xbf16>
    %c0_17 = arith.constant 0 : index
    %c0_18 = arith.constant 0 : index
    %30 = vector.load %arg7[%c0_17, %c0_18] : memref<24x24xbf16, #tpu.memory_space<vmem>>, vector<24x24xbf16>
    %cst_19 = arith.constant dense<0.000000e+00> : vector<32x24xf32>
    %31 = tpu.matmul %29, %30, %cst_19 {dimension_numbers = #tpu.dot_dimension_numbers<[1], [0], [0], [1], [0, 0, 1, 1], [], []>} : vector<32x24xbf16>, vector<24x24xbf16>, vector<32x24xf32> -> vector<32x24xf32>
    %32 = vector.extract_strided_slice %0 {offsets = [1, 0], sizes = [1, 24], strides = [1, 1]} : vector<8x128xf32> to vector<1x24xf32>
    %33 = vector.broadcast %32 : vector<1x24xf32> to vector<32x24xf32>
    %34 = arith.addf %31, %33 : vector<32x24xf32>
    %35 = arith.mulf %34, %34 : vector<32x24xf32>
    %36 = arith.mulf %34, %35 : vector<32x24xf32>
    %cst_20 = arith.constant 4.471500e-02 : f32
    %37 = vector.broadcast %cst_20 : f32 to vector<32x24xf32>
    %38 = arith.mulf %37, %36 : vector<32x24xf32>
    %39 = arith.addf %34, %38 : vector<32x24xf32>
    %cst_21 = arith.constant 0.797884583 : f32
    %40 = vector.broadcast %cst_21 : f32 to vector<32x24xf32>
    %41 = arith.mulf %40, %39 : vector<32x24xf32>
    %42 = math.tanh %41 : vector<32x24xf32>
    %cst_22 = arith.constant 1.000000e+00 : f32
    %43 = vector.broadcast %cst_22 : f32 to vector<32x24xf32>
    %44 = arith.addf %43, %42 : vector<32x24xf32>
    %cst_23 = arith.constant 5.000000e-01 : f32
    %45 = vector.broadcast %cst_23 : f32 to vector<32x24xf32>
    %46 = arith.mulf %45, %44 : vector<32x24xf32>
    %47 = arith.mulf %34, %46 : vector<32x24xf32>
    %c0_24 = arith.constant 0 : index
    %c0_25 = arith.constant 0 : index
    %c0_26 = arith.constant 0 : index
    %48 = vector.load %arg2[%c0_24, %c0_25, %c0_26] : memref<1x64x32xbf16, #tpu.memory_space<vmem>>, vector<1x64x32xbf16>
    %49 = vector.shape_cast %48 : vector<1x64x32xbf16> to vector<64x32xbf16>
    %50 = arith.truncf %47 : vector<32x24xf32> to vector<32x24xbf16>
    %cst_27 = arith.constant dense<0.000000e+00> : vector<64x24xf32>
    %51 = tpu.matmul %49, %50, %cst_27 {dimension_numbers = #tpu.dot_dimension_numbers<[1], [0], [0], [1], [0, 0, 1, 1], [], []>} : vector<64x32xbf16>, vector<32x24xbf16>, vector<64x24xf32> -> vector<64x24xf32>
    %c0_28 = arith.constant 0 : index
    %c0_29 = arith.constant 0 : index
    %c0_30 = arith.constant 0 : index
    %52 = vector.load %arg5[%c0_28, %c0_29, %c0_30] : memref<1x64x6xf32, #tpu.memory_space<vmem>>, vector<1x64x6xf32>
    %53 = vector.shape_cast %52 : vector<1x64x6xf32> to vector<64x6xf32>
    %54 = tpu.concatenate %51, %53 in 1 : vector<64x24xf32>, vector<64x6xf32> -> vector<64x30xf32>
    %55 = arith.truncf %54 : vector<64x30xf32> to vector<64x30xbf16>
    %c0_31 = arith.constant 0 : index
    %c0_32 = arith.constant 0 : index
    %56 = vector.load %arg8[%c0_31, %c0_32] : memref<30x32xbf16, #tpu.memory_space<vmem>>, vector<30x32xbf16>
    %cst_33 = arith.constant dense<0.000000e+00> : vector<64x32xf32>
    %57 = tpu.matmul %55, %56, %cst_33 {dimension_numbers = #tpu.dot_dimension_numbers<[1], [0], [0], [1], [0, 0, 1, 1], [], []>} : vector<64x30xbf16>, vector<30x32xbf16>, vector<64x32xf32> -> vector<64x32xf32>
    %58 = vector.extract_strided_slice %0 {offsets = [2, 0], sizes = [1, 32], strides = [1, 1]} : vector<8x128xf32> to vector<1x32xf32>
    %59 = vector.broadcast %58 : vector<1x32xf32> to vector<64x32xf32>
    %60 = arith.addf %57, %59 : vector<64x32xf32>
    %61 = arith.mulf %60, %60 : vector<64x32xf32>
    %62 = arith.mulf %60, %61 : vector<64x32xf32>
    %cst_34 = arith.constant 4.471500e-02 : f32
    %63 = vector.broadcast %cst_34 : f32 to vector<64x32xf32>
    %64 = arith.mulf %63, %62 : vector<64x32xf32>
    %65 = arith.addf %60, %64 : vector<64x32xf32>
    %cst_35 = arith.constant 0.797884583 : f32
    %66 = vector.broadcast %cst_35 : f32 to vector<64x32xf32>
    %67 = arith.mulf %66, %65 : vector<64x32xf32>
    %68 = math.tanh %67 : vector<64x32xf32>
    %cst_36 = arith.constant 1.000000e+00 : f32
    %69 = vector.broadcast %cst_36 : f32 to vector<64x32xf32>
    %70 = arith.addf %69, %68 : vector<64x32xf32>
    %cst_37 = arith.constant 5.000000e-01 : f32
    %71 = vector.broadcast %cst_37 : f32 to vector<64x32xf32>
    %72 = arith.mulf %71, %70 : vector<64x32xf32>
    %73 = arith.mulf %60, %72 : vector<64x32xf32>
    %74 = arith.truncf %73 : vector<64x32xf32> to vector<64x32xbf16>
    %c0_38 = arith.constant 0 : index
    %c0_39 = arith.constant 0 : index
    %75 = vector.load %arg9[%c0_38, %c0_39] : memref<32x32xbf16, #tpu.memory_space<vmem>>, vector<32x32xbf16>
    %cst_40 = arith.constant dense<0.000000e+00> : vector<64x32xf32>
    %76 = tpu.matmul %74, %75, %cst_40 {dimension_numbers = #tpu.dot_dimension_numbers<[1], [0], [0], [1], [0, 0, 1, 1], [], []>} : vector<64x32xbf16>, vector<32x32xbf16>, vector<64x32xf32> -> vector<64x32xf32>
    %77 = vector.extract_strided_slice %0 {offsets = [3, 0], sizes = [1, 32], strides = [1, 1]} : vector<8x128xf32> to vector<1x32xf32>
    %78 = vector.broadcast %77 : vector<1x32xf32> to vector<64x32xf32>
    %79 = arith.addf %76, %78 : vector<64x32xf32>
    %80 = arith.mulf %79, %79 : vector<64x32xf32>
    %81 = arith.mulf %79, %80 : vector<64x32xf32>
    %cst_41 = arith.constant 4.471500e-02 : f32
    %82 = vector.broadcast %cst_41 : f32 to vector<64x32xf32>
    %83 = arith.mulf %82, %81 : vector<64x32xf32>
    %84 = arith.addf %79, %83 : vector<64x32xf32>
    %cst_42 = arith.constant 0.797884583 : f32
    %85 = vector.broadcast %cst_42 : f32 to vector<64x32xf32>
    %86 = arith.mulf %85, %84 : vector<64x32xf32>
    %87 = math.tanh %86 : vector<64x32xf32>
    %cst_43 = arith.constant 1.000000e+00 : f32
    %88 = vector.broadcast %cst_43 : f32 to vector<64x32xf32>
    %89 = arith.addf %88, %87 : vector<64x32xf32>
    %cst_44 = arith.constant 5.000000e-01 : f32
    %90 = vector.broadcast %cst_44 : f32 to vector<64x32xf32>
    %91 = arith.mulf %90, %89 : vector<64x32xf32>
    %92 = arith.mulf %79, %91 : vector<64x32xf32>
    %93 = arith.truncf %92 : vector<64x32xf32> to vector<64x32xbf16>
    %c0_45 = arith.constant 0 : index
    %c0_46 = arith.constant 0 : index
    %94 = vector.load %arg10[%c0_45, %c0_46] : memref<32x32xbf16, #tpu.memory_space<vmem>>, vector<32x32xbf16>
    %cst_47 = arith.constant dense<0.000000e+00> : vector<64x32xf32>
    %95 = tpu.matmul %93, %94, %cst_47 {dimension_numbers = #tpu.dot_dimension_numbers<[1], [0], [0], [1], [0, 0, 1, 1], [], []>} : vector<64x32xbf16>, vector<32x32xbf16>, vector<64x32xf32> -> vector<64x32xf32>
    %96 = vector.extract_strided_slice %0 {offsets = [4, 0], sizes = [1, 32], strides = [1, 1]} : vector<8x128xf32> to vector<1x32xf32>
    %97 = vector.broadcast %96 : vector<1x32xf32> to vector<64x32xf32>
    %98 = arith.addf %95, %97 : vector<64x32xf32>
    %99 = arith.mulf %98, %98 : vector<64x32xf32>
    %100 = arith.mulf %98, %99 : vector<64x32xf32>
    %cst_48 = arith.constant 4.471500e-02 : f32
    %101 = vector.broadcast %cst_48 : f32 to vector<64x32xf32>
    %102 = arith.mulf %101, %100 : vector<64x32xf32>
    %103 = arith.addf %98, %102 : vector<64x32xf32>
    %cst_49 = arith.constant 0.797884583 : f32
    %104 = vector.broadcast %cst_49 : f32 to vector<64x32xf32>
    %105 = arith.mulf %104, %103 : vector<64x32xf32>
    %106 = math.tanh %105 : vector<64x32xf32>
    %cst_50 = arith.constant 1.000000e+00 : f32
    %107 = vector.broadcast %cst_50 : f32 to vector<64x32xf32>
    %108 = arith.addf %107, %106 : vector<64x32xf32>
    %cst_51 = arith.constant 5.000000e-01 : f32
    %109 = vector.broadcast %cst_51 : f32 to vector<64x32xf32>
    %110 = arith.mulf %109, %108 : vector<64x32xf32>
    %111 = arith.mulf %98, %110 : vector<64x32xf32>
    %112 = arith.truncf %111 : vector<64x32xf32> to vector<64x32xbf16>
    %c0_52 = arith.constant 0 : index
    %c0_53 = arith.constant 0 : index
    %113 = vector.load %arg11[%c0_52, %c0_53] : memref<32x128xbf16, #tpu.memory_space<vmem>>, vector<32x128xbf16>
    %cst_54 = arith.constant dense<0.000000e+00> : vector<64x128xf32>
    %114 = tpu.matmul %112, %113, %cst_54 {dimension_numbers = #tpu.dot_dimension_numbers<[1], [0], [0], [1], [0, 0, 1, 1], [], []>} : vector<64x32xbf16>, vector<32x128xbf16>, vector<64x128xf32> -> vector<64x128xf32>
    %115 = vector.extract_strided_slice %0 {offsets = [5, 0], sizes = [1, 128], strides = [1, 1]} : vector<8x128xf32> to vector<1x128xf32>
    %116 = vector.broadcast %115 : vector<1x128xf32> to vector<64x128xf32>
    %117 = arith.addf %114, %116 : vector<64x128xf32>
    %c0_55 = arith.constant 0 : index
    %c0_56 = arith.constant 0 : index
    %c0_57 = arith.constant 0 : index
    %118 = vector.load %arg13[%c0_55, %c0_56, %c0_57] : memref<1x64x128xf32, #tpu.memory_space<vmem>>, vector<1x64x128xf32>
    %119 = vector.shape_cast %118 : vector<1x64x128xf32> to vector<64x128xf32>
    %120 = vector.shape_cast %117 : vector<64x128xf32> to vector<1x64x128xf32>
    tpu.vector_store %arg13[%c0_55, %c0_56, %c0_57], %120 {strides = array<i32>} : memref<1x64x128xf32, #tpu.memory_space<vmem>>, vector<1x64x128xf32>,
    return
  }
  func.func @transform_0(%arg0: i32) -> (i32, i32, i32) {
    %c0_i32 = arith.constant 0 : i32
    %c0_i32_0 = arith.constant 0 : i32
    %c0_i32_1 = arith.constant 0 : i32
    return %arg0, %c0_i32, %c0_i32_0 : i32, i32, i32
  }
  func.func @transform_1(%arg0: i32) -> (i32, i32, i32) {
    %c0_i32 = arith.constant 0 : i32
    %c0_i32_0 = arith.constant 0 : i32
    %c0_i32_1 = arith.constant 0 : i32
    return %arg0, %c0_i32, %c0_i32_0 : i32, i32, i32
  }
  func.func @transform_2(%arg0: i32) -> (i32, i32, i32) {
    %c0_i32 = arith.constant 0 : i32
    %c0_i32_0 = arith.constant 0 : i32
    %c0_i32_1 = arith.constant 0 : i32
    return %arg0, %c0_i32, %c0_i32_0 : i32, i32, i32
  }
  func.func @transform_3(%arg0: i32) -> (i32, i32, i32) {
    %c0_i32 = arith.constant 0 : i32
    %c0_i32_0 = arith.constant 0 : i32
    %c0_i32_1 = arith.constant 0 : i32
    return %arg0, %c0_i32, %c0_i32_0 : i32, i32, i32
  }
  func.func @transform_4(%arg0: i32) -> (i32, i32, i32) {
    %c0_i32 = arith.constant 0 : i32
    %c0_i32_0 = arith.constant 0 : i32
    %c0_i32_1 = arith.constant 0 : i32
    return %arg0, %c0_i32, %c0_i32_0 : i32, i32, i32
  }
  func.func @transform_5(%arg0: i32) -> (i32, i32) {
    %c0_i32 = arith.constant 0 : i32
    %c0_i32_0 = arith.constant 0 : i32
    %c0_i32_1 = arith.constant 0 : i32
    return %c0_i32, %c0_i32_0 : i32, i32
  }
  func.func @transform_6(%arg0: i32) -> (i32, i32) {
    %c0_i32 = arith.constant 0 : i32
    %c0_i32_0 = arith.constant 0 : i32
    %c0_i32_1 = arith.constant 0 : i32
    return %c0_i32, %c0_i32_0 : i32, i32
  }
  func.func @transform_7(%arg0: i32) -> (i32, i32) {
    %c0_i32 = arith.constant 0 : i32
    %c0_i32_0 = arith.constant 0 : i32
    %c0_i32_1 = arith.constant 0 : i32
    return %c0_i32, %c0_i32_0 : i32, i32
  }
  func.func @transform_8(%arg0: i32) -> (i32, i32) {
    %c0_i32 = arith.constant 0 : i32
    %c0_i32_0 = arith.constant 0 : i32
    %c0_i32_1 = arith.constant 0 : i32
    return %c0_i32, %c0_i32_0 : i32, i32
  }
  func.func @transform_9(%arg0: i32) -> (i32, i32) {
    %c0_i32 = arith.constant 0 : i32
    %c0_i32_0 = arith.constant 0 : i32
    %c0_i32_1 = arith.constant 0 : i32
    return %c0_i32, %c0_i32_0 : i32, i32
  }
  func.func @transform_10(%arg0: i32) -> (i32, i32) {
    %c0_i32 = arith.constant 0 : i32
    %c0_i32_0 = arith.constant 0 : i32
    %c0_i32_1 = arith.constant 0 : i32
    return %c0_i32, %c0_i32_0 : i32, i32
  }
  func.func @transform_11(%arg0: i32) -> (i32, i32) {
    %c0_i32 = arith.constant 0 : i32
    %c0_i32_0 = arith.constant 0 : i32
    %c0_i32_1 = arith.constant 0 : i32
    return %c0_i32, %c0_i32_0 : i32, i32
  }
  func.func @transform_12(%arg0: i32) -> (i32, i32, i32) {
    %c0_i32 = arith.constant 0 : i32
    %c0_i32_0 = arith.constant 0 : i32
    %c0_i32_1 = arith.constant 0 : i32
    return %arg0, %c0_i32, %c0_i32_0 : i32, i32, i32
  }
}

</mosaic_0001>

<bundles_post_ra>
// kernel: custom-call.10
= control target key start
LH: loop header
LB: loop body
LE: loop exit
PB: predicated region body
PF: predicated region fallthrough
CT: control target
= control target key end

     0   :  { %s6_s0 = inlined_call_operand.vmem [shape: f32[2,64], index: 0, kind: output, shape index: {}]  }

// kernel: point_vit_seg_forward.2
= control target key start
LH: loop header
LB: loop body
LE: loop exit
PB: predicated region body
PF: predicated region fallthrough
CT: control target
= control target key end

     0   :  { %s4515_s18 = smov 0   ;;  %s5457_s0 = inlined_call_operand.vmem [shape: f32[2,128,6], index: 0, kind: input, shape index: {}]   ;;  %s5458_s1 = inlined_call_operand.vmem [shape: f32[2,16,3], index: 1, kind: input, shape index: {}]   ;;  %s5459_s2 = inlined_call_operand.vmem [shape: bf16[6,16], index: 2, kind: input, shape index: {}]   ;;  %s5460_s3 = inlined_call_operand.vmem [shape: bf16[16,32], index: 3, kind: input, shape index: {}]   ;;  %s5461_s4 = inlined_call_operand.vmem [shape: bf16[3,16], index: 4, kind: input, shape index: {}]   ;;  %s5462_s5 = inlined_call_operand.vmem [shape: bf16[16,32], index: 5, kind: input, shape index: {}]   ;;  %s5463_s6 = inlined_call_operand.vmem [shape: bf16[32,96], index: 6, kind: input, shape index: {}]   ;;  %s5464_s7 = inlined_call_operand.vmem [shape: bf16[32,32], index: 7, kind: input, shape index: {}]   ;;  %s5465_s8 = inlined_call_operand.vmem [shape: bf16[32,64], index: 8, kind: input, shape index: {}]   ;;  %s5466_s9 = inlined_call_operand.vmem [shape: bf16[64,32], index: 9, kind: input, shape index: {}]   ;;  %s5467_s10 = inlined_call_operand.vmem [shape: bf16[32,96], index: 10, kind: input, shape index: {}]   ;;  %s5468_s11 = inlined_call_operand.vmem [shape: bf16[32,32], index: 11, kind: input, shape index: {}]   ;;  %s5469_s12 = inlined_call_operand.vmem [shape: bf16[32,64], index: 12, kind: input, shape index: {}]   ;;  %s5470_s13 = inlined_call_operand.vmem [shape: bf16[64,32], index: 13, kind: input, shape index: {}]   ;;  %s5471_s14 = inlined_call_operand.vmem [shape: f32[24,128], index: 14, kind: input, shape index: {}]   ;;  %s5472_s15 = inlined_call_operand.vmem [shape: f32[2,16,32], index: 15, kind: output, shape index: {}]  }
   0x1 LB: > { %s3733_s19 = sadd.s32 4294967295, %s4426_s18   ;;  %p3737_p0 = scmp.ge.s32.totalorder %s4426_s18, 1  ;;  %s4426_s18 = sphi %s4515_s18, %s25_s18  }
   0x2   : > { %p447_p1 = scmp.lt.s32.totalorder %s4426_s18, 3 }
   0x4   : > { %p448_p2 = pnand %p3737_p0, %p447_p1 }
   0x5   : > { %v543_v0 = vld [vmem:[%s5459_s2] sm:$0x7] (!%p448_p2)  ;;  %vm573_vm0 = vcmask (!%p448_p2), 1042432   ;;  %p500_p3 = scmp.lt.s32.totalorder (!%p448_p2), %s3733_s19, 1  ;;  %vm1085_vm1 = vcmask (!%p448_p2), 1040384   ;;  %vm1086_vm2 = vcmask (!%p448_p2), 1041408   ;;  %v544_v36 = vlaneseq (!%p448_p2) }
   0x6   : > { %451 = sbr.rel (%p448_p2) target bundleno = 6170 (0x181a), region = 80  ;;  %4169 = vmatprep.subr.msk.bf16.mxu0 (!%p448_p2), %vm573_vm0, %v543_v0  ;;  %4170 = vmatprep.subr.msk.bf16.mxu1 (!%p448_p2), %vm573_vm0, %v543_v0  ;;  %v575_v1 = vsel (!%p448_p2), %vm573_vm0, %v543_v0, 0  ;;  %v4428_v2 = vmov (!%p448_p2), 65535   ;;  %v4429_v4 = vmov (!%p448_p2), 0.0   ;;  %v1076_v5 = vld [vmem:[%s5461_s4] sm:$0x3] (!%p448_p2) }
   0x7   : > { %3936 = vmatpush3.bf16.msra.mxu0 (!%p448_p2), %v575_v1  ;;  %4168 = vmatpush3.bf16.msra.mxu1 (!%p448_p2), %v575_v1  ;;  %v1087_v3 = vsel (!%p448_p2), %vm1085_vm1, 4294967295, %v4428_v2  ;;  %vm548_vm3 = vcmask (!%p448_p2), 48128   ;;  %vm4430_vm4 = vmmov (!%p448_p2), 0   ;;  %vm1081_vm5 = vcmask (!%p448_p2), 23552   ;;  %v4224_v35 = vld [vmem:[%s5460_s3] sm:$0xff] (!%p448_p2)   ;;  %s4431_s17 = smov (!%p448_p2), 120  }
   0x8   : > { %3971 = vmatprep.subr.bf16.mxu0 (!%p448_p2), %v4429_v4  ;;  %v1088_v6 = vsel (!%p448_p2), %vm1086_vm2, %v1087_v3, 0  ;;  %3953 = vmatprep.subr.bf16.mxu1 (!%p448_p2), %v4224_v35  ;;  %v4576_v37 = vshrl.u32 (!%p448_p2), %v544_v36, 7  ;;  %v4584_v39 = vld [vmem:[%s5471_s14] sm:$0xff] (!%p448_p2)  ;;  %vm838_vm6 = vcmask (!%p448_p2), 130048   ;;  %vm960_vm7 = vcmask (!%p448_p2), 261120   ;;  %s4432_s20 = smov (!%p448_p2), 112  }
   0x9   : > { %v1090_v14 = vand.u32 (!%p448_p2), %v1088_v6, %v1076_v5  ;;  %vm1273_vm8 = vcmask (!%p448_p2), 1041409   ;;  %vm1276_vm9 = vcmask (!%p448_p2), 1042434   ;;  %vm1279_vm10 = vcmask (!%p448_p2), 1043459   ;;  %s4433_s21 = smov (!%p448_p2), 104  }
   0xa   : > { %v4579_v38 = vsub.s32 (!%p448_p2), 0, %v4576_v37  ;;  %v4608_v54 = vsub.s32 (!%p448_p2), 2, %v4576_v37  ;;  %vm1282_vm11 = vcmask (!%p448_p2), 1044484   ;;  %vm1285_vm12 = vcmask (!%p448_p2), 1045509  }
   0xb   : > { %vm1288_vm13 = vcmask (!%p448_p2), 1046534   ;;  %vm1291_vm14 = vcmask (!%p448_p2), 1047559   ;;  %vm1521_vm15 = vcmask (!%p448_p2), 64512   ;;  %vm1528_vm0 = vcmask (!%p448_p2), 1043456  }
   0xc   : > { %v4588_v40 = vrot.slane (!%p448_p2), %v4584_v39, %v4579_v38  ;;  %vm1775_vm2 = vcmask (!%p448_p2), 195584  }
   0xd   : > { %s5474_s19 = smov (!%p500_p3, %s3733_s19), 1 }
   0xe   : > { %s3826_s22 = sshll.u32 %s5474_s19, 7  ;;  %s3827_s28 = sshll.u32 %s5474_s19, 4 }
   0xf   : > { %s4537_s27 = scalar_lea.vmem %s5457_s0, %s3826_s22  ;;  %s509_s16 = scalar_lea.vmem %s5458_s1, %s3827_s28 }
  0x10   : > { %v519_v7 = vld [vmem:[%s4537_s27] sm:$0xff]  ;;  %v520_v8 = vld [vmem:[%s4537_s27 + $0x8] sm:$0xff]  ;;  %v521_v12 = vld [vmem:[%s4537_s27 + $0x10] sm:$0xff]  ;;  %s514_s24 = scalar_lea.vmem %s5472_s15, %s3827_s28 }
  0x11   : > { %v531_v9 = vld [vmem:[%s4537_s27 + $0x60] sm:$0xff]  ;;  %v535_v10 = vpack.c.bf16 %v520_v8, %v519_v7  ;;  %v532_v11 = vld [vmem:[%s4537_s27 + $0x68] sm:$0xff]  ;;  %v522_v13 = vld [vmem:[%s4537_s27 + $0x18] sm:$0xff] }
  0x12   : > { %v541_v15 = vpack.c.bf16 %v532_v11, %v531_v9  ;;  %v536_v16 = vpack.c.bf16 %v522_v13, %v521_v12  ;;  %v533_v17 = vld [vmem:[%s4537_s27 + $0x70] sm:$0xff]  ;;  %v534_v18 = vld [vmem:[%s4537_s27 + $0x78] sm:$0xff]  ;;  %v523_v19 = vld [vmem:[%s4537_s27 + $0x20] sm:$0xff] }
  0x13   : > { %3937 = vmatprep.mubr.msk.bf16.mxu0 %vm548_vm3, %v535_v10  ;;  %v542_v20 = vpack.c.bf16 %v534_v18, %v533_v17  ;;  %v524_v21 = vld [vmem:[%s4537_s27 + $0x28] sm:$0xff]  ;;  %v525_v23 = vld [vmem:[%s4537_s27 + $0x30] sm:$0xff]  ;;  %v526_v24 = vld [vmem:[%s4537_s27 + $0x38] sm:$0xff] }
  0x14   : > { %3949 = vmatprep.mubr.msk.bf16.mxu1 %vm548_vm3, %v541_v15  ;;  %3938 = vmatmul.mubr.msk.bf16.vlgmr.msra.gmra.mrb[0].mxu0 %vm548_vm3, %v536_v16  ;;  %v537_v22 = vpack.c.bf16 %v524_v21, %v523_v19  ;;  %v527_v25 = vld [vmem:[%s4537_s27 + $0x40] sm:$0xff]  ;;  %v528_v26 = vld [vmem:[%s4537_s27 + $0x48] sm:$0xff]  ;;  %v538_v27 = vpack.c.bf16 %v526_v24, %v525_v23  ;;  %v529_v29 = vld [vmem:[%s4537_s27 + $0x50] sm:$0xff] }
  0x15   : > { %3950 = vmatmul.mubr.msk.bf16.vlgmr.msra.gmra.mrb[0].mxu1 %vm548_vm3, %v542_v20  ;;  %3972 = vmatpush3.bf16.msra.mxu0 %v1090_v14  ;;  %v539_v28 = vpack.c.bf16 %v528_v26, %v527_v25  ;;  %v530_v30 = vld [vmem:[%s4537_s27 + $0x58] sm:$0xff]  ;;  %v1073_v32 = vld [vmem:[%s509_s16] sm:$0xff]  ;;  %v1074_v33 = vld [vmem:[%s509_s16 + $0x8] sm:$0xff] }
  0x16   : > { %3941 = vmatprep.mubr.msk.bf16.mxu0 %vm548_vm3, %v537_v22  ;;  %v540_v31 = vpack.c.bf16 %v530_v30, %v529_v29  ;;  %v1075_v34 = vpack.c.bf16 %v1074_v33, %v1073_v32  ;;  %3954 = vmatpush3.bf16.msra.mxu1 %v4224_v35 }
  0x17   : > { %3977 = vmatprep.subr.bf16.mxu1 %v4429_v4 }
  0x1c   : > { %3942 = vmatmul.mubr.msk.bf16.gmra.mrb[4].mxu0 %vm548_vm3, %v538_v27 }
  0x1d   : > { %3945 = vmatprep.mubr.msk.bf16.mxu0 %vm548_vm3, %v539_v28 }
  0x24   : > { %3946 = vmatmul.mubr.msk.bf16.gmra.mrb[8].mxu0 %vm548_vm3, %v540_v31  ;;  %vm2417_vm3 = vcmask 523264  }
  0x25   : > { %3973 = vmatprep.mubr.msk.bf16.mxu0 %vm4430_vm4, %v4429_v4 }
  0x2c   : > { %3974 = vmatmul.mubr.msk.bf16.vlgmr.msra.gmra.mrb[12].mxu0 %vm1081_vm5, %v1075_v34 }
  0xe7   : > { %v3939_v41 = vpop.f32.mrb[0].mxu0 }
  0xe8   : > { %v4591_v42 = vadd.f32 %v3939_v41, %v4588_v40  ;;  %v3951_v43 = vpop.f32.mrb[0].mxu1  ;;  %v611_v44 = vpop.f32.mrb[1].mxu0 }
  0xe9   : > { %v4594_v45 = vadd.f32 %v3951_v43, %v4588_v40  ;;  %v4597_v46 = vadd.f32 %v611_v44, %v4588_v40  ;;  %v659_v47 = vpop.f32.mrb[1].mxu1  ;;  %v3940_v48 = vpop.f32.mrb[2].mxu0  ;;  %v4654_v44 = vrot.slane %v4584_v39, %v4608_v54 }
  0xea   : > { %v676_v49 = vmul.f32 %v4591_v42, %v4591_v42  ;;  %v4602_v50 = vadd.f32 %v659_v47, %v4588_v40  ;;  %v4605_v51 = vadd.f32 %v3940_v48, %v4588_v40  ;;  %v3952_v52 = vpop.f32.mrb[2].mxu1  ;;  %v614_v53 = vpop.f32.mrb[3].mxu0 }
  0xeb   : > { %v688_v55 = vmul.f32 %v4594_v45, %v4594_v45  ;;  %v674_v56 = vmul.f32 %v4597_v46, %v4597_v46  ;;  %v4615_v57 = vadd.f32 %v3952_v52, %v4588_v40  ;;  %v4618_v58 = vadd.f32 %v614_v53, %v4588_v40  ;;  %v662_v59 = vpop.f32.mrb[3].mxu1 }
  0xec   : > { %v692_v60 = vmul.f32 %v676_v49, %v4591_v42  ;;  %v686_v61 = vmul.f32 %v4602_v50, %v4602_v50  ;;  %v677_v62 = vmul.f32 %v4605_v51, %v4605_v51  ;;  %v4626_v63 = vadd.f32 %v662_v59, %v4588_v40 }
  0xed   : > { %v704_v0 = vmul.f32 %v688_v55, %v4594_v45  ;;  %v690_v1 = vmul.f32 %v674_v56, %v4597_v46  ;;  %v689_v2 = vmul.f32 %v4615_v57, %v4615_v57  ;;  %v675_v3 = vmul.f32 %v4618_v58, %v4618_v58 }
  0xee   : > { %v708_v5 = vmul.f32 0.044715, %v692_v60  ;;  %v702_v6 = vmul.f32 %v686_v61, %v4602_v50  ;;  %v693_v7 = vmul.f32 %v677_v62, %v4605_v51  ;;  %v687_v8 = vmul.f32 %v4626_v63, %v4626_v63 }
  0xef   : > { %v720_v9 = vmul.f32 0.044715, %v704_v0  ;;  %v706_v10 = vmul.f32 0.044715, %v690_v1  ;;  %v705_v11 = vmul.f32 %v689_v2, %v4615_v57  ;;  %v691_v12 = vmul.f32 %v675_v3, %v4618_v58  ;;  %v3943_v13 = vpop.f32.mrb[4].mxu0 }
  0xf0   : > { %v724_v14 = vadd.f32 %v708_v5, %v4591_v42  ;;  %v718_v15 = vmul.f32 0.044715, %v702_v6  ;;  %v709_v16 = vmul.f32 0.044715, %v693_v7  ;;  %v703_v17 = vmul.f32 %v687_v8, %v4626_v63  ;;  %v627_v18 = vpop.f32.mrb[5].mxu0 }
  0xf1   : > { %v736_v19 = vadd.f32 %v720_v9, %v4594_v45  ;;  %v722_v20 = vadd.f32 %v706_v10, %v4597_v46  ;;  %v721_v21 = vmul.f32 0.044715, %v705_v11  ;;  %v707_v22 = vmul.f32 0.044715, %v691_v12  ;;  %v3944_v23 = vpop.f32.mrb[6].mxu0 }
  0xf2   : > { %v740_v24 = vmul.f32 0.7978846, %v724_v14  ;;  %v734_v25 = vadd.f32 %v718_v15, %v4602_v50  ;;  %v725_v26 = vadd.f32 %v709_v16, %v4605_v51  ;;  %v719_v27 = vmul.f32 0.044715, %v703_v17  ;;  %v630_v28 = vpop.f32.mrb[7].mxu0 }
  0xf3   : > { %v752_v29 = vmul.f32 0.7978846, %v736_v19  ;;  %v738_v30 = vmul.f32 0.7978846, %v722_v20  ;;  %v737_v31 = vadd.f32 %v721_v21, %v4615_v57  ;;  %v723_v32 = vadd.f32 %v707_v22, %v4618_v58 }
  0xf4   : > { %4246 = vtanh.f32 %v740_v24  ;;  %v750_v33 = vmul.f32 0.7978846, %v734_v25  ;;  %v741_v34 = vmul.f32 0.7978846, %v725_v26  ;;  %v735_v35 = vadd.f32 %v719_v27, %v4626_v63 }
  0xf5   : > { %4248 = vtanh.f32 %v752_v29  ;;  %v753_v41 = vmul.f32 0.7978846, %v737_v31  ;;  %v4650_v43 = vadd.f32 %v3943_v13, %v4588_v40  ;;  %v739_v47 = vmul.f32 0.7978846, %v723_v32 }
  0xf6   : > { %4250 = vtanh.f32 %v738_v30  ;;  %v4657_v48 = vadd.f32 %v627_v18, %v4588_v40  ;;  %v4660_v49 = vadd.f32 %v3944_v23, %v4588_v40  ;;  %v751_v52 = vmul.f32 0.7978846, %v735_v35 }
  0xf7   : > { %4252 = vtanh.f32 %v750_v33  ;;  %v680_v53 = vmul.f32 %v4650_v43, %v4650_v43  ;;  %v4665_v55 = vadd.f32 %v630_v28, %v4588_v40  ;;  %v3947_v56 = vpop.f32.mrb[8].mxu0 }
  0xf8   : > { %4254 = vtanh.f32 %v741_v34  ;;  %v678_v59 = vmul.f32 %v4657_v48, %v4657_v48  ;;  %v681_v60 = vmul.f32 %v4660_v49, %v4660_v49  ;;  %v4672_v61 = vadd.f32 %v3947_v56, %v4588_v40  ;;  %v643_v62 = vpop.f32.mrb[9].mxu0 }
  0xf9   : > { %4256 = vtanh.f32 %v753_v41  ;;  %v696_v0 = vmul.f32 %v680_v53, %v4650_v43  ;;  %v679_v1 = vmul.f32 %v4665_v55, %v4665_v55  ;;  %v4678_v2 = vadd.f32 %v643_v62, %v4588_v40  ;;  %v3948_v3 = vpop.f32.mrb[10].mxu0 }
  0xfa   : > { %4258 = vtanh.f32 %v739_v47  ;;  %v694_v5 = vmul.f32 %v678_v59, %v4657_v48  ;;  %v697_v6 = vmul.f32 %v681_v60, %v4660_v49  ;;  %v684_v7 = vmul.f32 %v4672_v61, %v4672_v61  ;;  %v646_v8 = vpop.f32.mrb[11].mxu0 }
  0xfb   : > { %4260 = vtanh.f32 %v751_v52  ;;  %v712_v9 = vmul.f32 0.044715, %v696_v0  ;;  %v695_v10 = vmul.f32 %v679_v1, %v4665_v55  ;;  %v682_v11 = vmul.f32 %v4678_v2, %v4678_v2 }
  0xfc   : > { %v710_v12 = vmul.f32 0.044715, %v694_v5  ;;  %v713_v13 = vmul.f32 0.044715, %v697_v6  ;;  %v700_v14 = vmul.f32 %v684_v7, %v4672_v61  ;;  %v4689_v15 = vadd.f32 %v3948_v3, %v4588_v40 }
  0xfd   : > { %v728_v16 = vadd.f32 %v712_v9, %v4650_v43  ;;  %v711_v17 = vmul.f32 0.044715, %v695_v10  ;;  %v698_v18 = vmul.f32 %v682_v11, %v4678_v2  ;;  %v4694_v19 = vadd.f32 %v646_v8, %v4588_v40 }
  0xfe   : > { %v4247_v20 = vpop.eup %4246  ;;  %v726_v21 = vadd.f32 %v710_v12, %v4657_v48  ;;  %v729_v22 = vadd.f32 %v713_v13, %v4660_v49  ;;  %v716_v23 = vmul.f32 0.044715, %v700_v14  ;;  %v685_v24 = vmul.f32 %v4689_v15, %v4689_v15 }
  0xff   : > { %v4249_v25 = vpop.eup %4248  ;;  %v772_v26 = vadd.f32 1.0, %v4247_v20  ;;  %v744_v27 = vmul.f32 0.7978846, %v728_v16  ;;  %v727_v28 = vadd.f32 %v711_v17, %v4665_v55  ;;  %v714_v29 = vmul.f32 0.044715, %v698_v18  ;;  %v1126_v30 = vpop.f32.mrb[12].mxu0 }
 0x100   : > { %v4251_v31 = vpop.eup %4250  ;;  %v784_v32 = vadd.f32 1.0, %v4249_v25  ;;  %v742_v40 = vmul.f32 0.7978846, %v726_v21  ;;  %v745_v33 = vmul.f32 0.7978846, %v729_v22  ;;  %v732_v34 = vadd.f32 %v716_v23, %v4672_v61  ;;  %v3975_v35 = vpop.f32.mrb[13].mxu0 }
 0x101   : > { %v4253_v41 = vpop.eup %4252  ;;  %v788_v47 = vmul.f32 0.5, %v772_v26  ;;  %v770_v52 = vadd.f32 1.0, %v4251_v31  ;;  %4262 = vtanh.f32 %v744_v27  ;;  %v743_v53 = vmul.f32 0.7978846, %v727_v28  ;;  %v1129_v56 = vpop.f32.mrb[14].mxu0 }
 0x102   : > { %v4255_v59 = vpop.eup %4254  ;;  %v800_v60 = vmul.f32 0.5, %v784_v32  ;;  %v782_v62 = vadd.f32 1.0, %v4253_v41  ;;  %4264 = vtanh.f32 %v742_v40  ;;  %v748_v0 = vmul.f32 0.7978846, %v732_v34  ;;  %v3976_v1 = vpop.f32.mrb[15].mxu0 }
 0x103   : > { %v4257_v3 = vpop.eup %4256  ;;  %v804_v5 = vmul.f32 %v788_v47, %v4591_v42  ;;  %v786_v6 = vmul.f32 0.5, %v770_v52  ;;  %v773_v7 = vadd.f32 1.0, %v4255_v59  ;;  %4266 = vtanh.f32 %v745_v33 }
 0x104   : > { %v4259_v8 = vpop.eup %4258  ;;  %v4704_v9 = vmul.f32 %v800_v60, %v4594_v45  ;;  %v798_v10 = vmul.f32 0.5, %v782_v62  ;;  %v785_v11 = vadd.f32 1.0, %v4257_v3  ;;  %4268 = vtanh.f32 %v743_v53 }
 0x105   : > { %v4261_v12 = vpop.eup %4260  ;;  %v802_v13 = vmul.f32 %v786_v6, %v4597_v46  ;;  %v789_v14 = vmul.f32 0.5, %v773_v7  ;;  %v771_v16 = vadd.f32 1.0, %v4259_v8  ;;  %4270 = vtanh.f32 %v748_v0 }
 0x106   : > { %v4708_v17 = vmul.f32 %v798_v10, %v4602_v50  ;;  %v801_v42 = vmul.f32 0.5, %v785_v11  ;;  %v783_v18 = vadd.f32 1.0, %v4261_v12  ;;  %v730_v20 = vadd.f32 %v714_v29, %v4678_v2 }
 0x107   : > { %v805_v21 = vmul.f32 %v789_v14, %v4605_v51  ;;  %v787_v45 = vmul.f32 0.5, %v771_v16  ;;  %v701_v22 = vmul.f32 %v685_v24, %v4689_v15  ;;  %v683_v23 = vmul.f32 %v4694_v19, %v4694_v19 }
 0x108   : > { %v4716_v46 = vmul.f32 %v801_v42, %v4615_v57  ;;  %v799_v25 = vmul.f32 0.5, %v783_v18  ;;  %v746_v26 = vmul.f32 0.7978846, %v730_v20  ;;  %v4719_v50 = vadd.f32 %v1126_v30, %v4654_v44 }
 0x109   : > { %v819_v27 = vpack.c.bf16 %v805_v21, %v804_v5  ;;  %v803_v28 = vmul.f32 %v787_v45, %v4618_v58  ;;  %v717_v29 = vmul.f32 0.044715, %v701_v22  ;;  %v699_v51 = vmul.f32 %v683_v23, %v4694_v19  ;;  %v4225_v58 = vld [vmem:[%s5462_s5] sm:$0xff]  }
 0x10a   : > { %v4724_v31 = vmul.f32 %v799_v25, %v4626_v63  ;;  %4272 = vtanh.f32 %v746_v26  ;;  %v1133_v24 = vmul.f32 %v4719_v50, %v4719_v50  ;;  %v4729_v57 = vadd.f32 %v1129_v56, %v4654_v44 }
 0x10b   : > { %v4263_v32 = vpop.eup %4262  ;;  %v733_v30 = vadd.f32 %v717_v29, %v4689_v15  ;;  %v715_v40 = vmul.f32 0.044715, %v699_v51  ;;  %v818_v33 = vpack.c.bf16 %v803_v28, %v802_v13  ;;  %v825_v63 = vpack.c.bf16 %v4716_v46, %v4704_v9 }
 0x10c   : > { %v4265_v34 = vpop.eup %4264  ;;  %v776_v35 = vadd.f32 1.0, %v4263_v32  ;;  %v1135_v41 = vmul.f32 %v1133_v24, %v4719_v50  ;;  %v1134_v44 = vmul.f32 %v4729_v57, %v4729_v57  ;;  %v824_v47 = vpack.c.bf16 %v4724_v31, %v4708_v17 }
 0x10d   : > { %v4267_v52 = vpop.eup %4266  ;;  %v774_v53 = vadd.f32 1.0, %v4265_v34  ;;  %v749_v56 = vmul.f32 0.7978846, %v733_v30  ;;  %v731_v59 = vadd.f32 %v715_v40, %v4694_v19  ;;  %3955 = vmatprep.mubr.msk.bf16.mxu1 %vm838_vm6, %v818_v33  ;;  %v4780_v31 = vsub.s32 1, %v4576_v37 }
 0x10e   : > { %v4269_v60 = vpop.eup %4268  ;;  %v792_v62 = vmul.f32 0.5, %v776_v35  ;;  %v777_v0 = vadd.f32 1.0, %v4267_v52  ;;  %v1137_v1 = vmul.f32 0.044715, %v1135_v41  ;;  %v1136_v3 = vmul.f32 %v1134_v44, %v4729_v57  ;;  %3956 = vmatmul.mubr.msk.bf16.vlgmr.msra.gmra.mrb[4].mxu1 %vm838_vm6, %v819_v27 }
 0x10f   : > { %v4271_v5 = vpop.eup %4270  ;;  %v790_v6 = vmul.f32 0.5, %v774_v53  ;;  %v775_v7 = vadd.f32 1.0, %v4269_v60  ;;  %4274 = vtanh.f32 %v749_v56  ;;  %v747_v8 = vmul.f32 0.7978846, %v731_v59  ;;  %3978 = vmatpush3.bf16.msra.mxu1 %v4225_v58 }
 0x110   : > { %v793_v10 = vmul.f32 0.5, %v777_v0  ;;  %v1139_v11 = vadd.f32 %v1137_v1, %v4719_v50  ;;  %v1138_v13 = vmul.f32 0.044715, %v1136_v3  ;;  %v808_v14 = vmul.f32 %v792_v62, %v4650_v43 }
 0x111   : > { %v791_v12 = vmul.f32 0.5, %v775_v7  ;;  %4276 = vtanh.f32 %v747_v8  ;;  %v806_v18 = vmul.f32 %v790_v6, %v4657_v48  ;;  %v780_v26 = vadd.f32 1.0, %v4271_v5 }
 0x112   : > { %v809_v16 = vmul.f32 %v793_v10, %v4660_v49  ;;  %v1141_v42 = vmul.f32 0.7978846, %v1139_v11  ;;  %v1140_v21 = vadd.f32 %v1138_v13, %v4729_v57  ;;  %v4784_v9 = vrot.slane %v4584_v39, %v4780_v31 }
 0x113   : > { %v807_v20 = vmul.f32 %v791_v12, %v4665_v55  ;;  %v796_v49 = vmul.f32 0.5, %v780_v26 }
 0x114   : > { %v4273_v45 = vpop.eup %4272  ;;  %4278 = vtanh.f32 %v1141_v42  ;;  %v821_v22 = vpack.c.bf16 %v809_v16, %v808_v14  ;;  %v1142_v23 = vmul.f32 0.7978846, %v1140_v21 }
 0x115   : > { %v820_v25 = vpack.c.bf16 %v807_v20, %v806_v18  ;;  %v778_v27 = vadd.f32 1.0, %v4273_v45  ;;  %v812_v32 = vmul.f32 %v796_v49, %v4672_v61 }
 0x116   : > { %4280 = vtanh.f32 %v1142_v23 }
 0x117   : > { %3959 = vmatprep.mubr.msk.bf16.mxu1 %vm838_vm6, %v820_v25  ;;  %v794_v29 = vmul.f32 0.5, %v778_v27 }
 0x118   : > { %3960 = vmatmul.mubr.msk.bf16.gmra.mrb[8].mxu1 %vm838_vm6, %v821_v22 }
 0x119   : > { %v4275_v43 = vpop.eup %4274  ;;  %v810_v58 = vmul.f32 %v794_v29, %v4678_v2 }
 0x11a   : > { %v781_v28 = vadd.f32 1.0, %v4275_v43 }
 0x11b   : > { %v4277_v48 = vpop.eup %4276 }
 0x11c   : > { %v797_v55 = vmul.f32 0.5, %v781_v28  ;;  %v779_v51 = vadd.f32 1.0, %v4277_v48 }
 0x11e   : > { %v4279_v24 = vpop.eup %4278  ;;  %v813_v30 = vmul.f32 %v797_v55, %v4689_v15  ;;  %v795_v40 = vmul.f32 0.5, %v779_v51 }
 0x11f   : > { %v1145_v33 = vadd.f32 1.0, %v4279_v24 }
 0x120   : > { %v811_v34 = vmul.f32 %v795_v40, %v4694_v19  ;;  %v823_v35 = vpack.c.bf16 %v813_v30, %v812_v32  ;;  %v4281_v41 = vpop.eup %4280  ;;  %v1310_v19 = vrot.slane %v4584_v39, 4 }
 0x121   : > { %v1147_v44 = vmul.f32 0.5, %v1145_v33  ;;  %v1146_v52 = vadd.f32 1.0, %v4281_v41 }
 0x122   : > { %v822_v53 = vpack.c.bf16 %v811_v34, %v810_v58 }
 0x123   : > { %v1148_v56 = vmul.f32 0.5, %v1146_v52  ;;  %v1149_v61 = vmul.f32 %v1147_v44, %v4719_v50  ;;  %v4775_v50 = vsel %vm1085_vm1, %v1310_v19, 0.0  ;;  %v4803_v52 = vsub.s32 3, %v4576_v37 }
 0x124   : > { %3963 = vmatprep.mubr.msk.bf16.mxu1 %vm838_vm6, %v822_v53  ;;  %v1323_v17 = vsel %vm960_vm7, %v4775_v50, 0.0 }
 0x125   : > { %3964 = vmatmul.mubr.msk.bf16.gmra.mrb[12].mxu1 %vm838_vm6, %v823_v35  ;;  %v1150_v15 = vmul.f32 %v1148_v56, %v4729_v57  ;;  %1324 = vadd.xlane.f32.xlu1 %v1323_v17 }
 0x126   : > { %3967 = vmatprep.mubr.msk.bf16.mxu1 %vm838_vm6, %v824_v47 }
 0x127   : > { %v1151_v2 = vpack.c.bf16 %v1150_v15, %v1149_v61 }
 0x12d   : > { %3968 = vmatmul.mubr.msk.bf16.gmra.mrb[16].mxu1 %vm838_vm6, %v825_v63 }
 0x12e   : > { %3979 = vmatprep.mubr.msk.bf16.mxu1 %vm4430_vm4, %v4429_v4 }
 0x135   : > { %3980 = vmatmul.mubr.msk.bf16.vlgmr.msra.gmra.mrb[20].mxu1 %vm838_vm6, %v1151_v2 }
 0x1e1   : > { %v3957_v46 = vpop.f32.mrb[4].mxu1 }
 0x1e2   : > { %v906_v57 = vadd.f32 %v3957_v46, %v4784_v9  ;;  %v897_v63 = vpop.f32.mrb[5].mxu1 }
 0x1e3   : > { %v898_v47 = vadd.f32 %v897_v63, %v4784_v9  ;;  %v3958_v59 = vpop.f32.mrb[6].mxu1 }
 0x1e4   : > { %v975_v60 = vsel %vm960_vm7, %v906_v57, -inf  ;;  %v909_v62 = vadd.f32 %v3958_v59, %v4784_v9  ;;  %v900_v0 = vpop.f32.mrb[7].mxu1  ;;  %v4808_v59 = vrot.slane %v4584_v39, %v4803_v52 }
 0x1e5   : > { %v901_v1 = vadd.f32 %v900_v0, %v4784_v9  ;;  %v976_v3 = vrot.slane %v975_v60, 4  ;;  %v961_v5 = vsel %vm960_vm7, %v898_v47, -inf }
 0x1e6   : > { %v982_v6 = vsel %vm960_vm7, %v909_v62, -inf  ;;  %v962_v8 = vrot.slane %v961_v5, 4 }
 0x1e7   : > { %v968_v7 = vsel %vm960_vm7, %v901_v1, -inf  ;;  %v977_v10 = vmax.f32 %v975_v60, %v976_v3  ;;  %v983_v11 = vrot.slane %v982_v6, 4 }
 0x1e8   : > { %v969_v12 = vrot.slane %v968_v7, 4  ;;  %v963_v42 = vmax.f32 %v961_v5, %v962_v8 }
 0x1e9   : > { %v978_v21 = vrot.slane %v977_v10, 2  ;;  %v984_v45 = vmax.f32 %v982_v6, %v983_v11 }
 0x1ea   : > { %v970_v26 = vmax.f32 %v968_v7, %v969_v12  ;;  %v964_v48 = vrot.slane %v963_v42, 2 }
 0x1eb   : > { %v3961_v13 = vpop.f32.mrb[8].mxu1  ;;  %v979_v24 = vmax.f32 %v977_v10, %v978_v21  ;;  %v985_v32 = vrot.slane %v984_v45, 2 }
 0x1ec   : > { %v922_v14 = vadd.f32 %v3961_v13, %v4784_v9  ;;  %v913_v16 = vpop.f32.mrb[9].mxu1  ;;  %v971_v40 = vrot.slane %v970_v26, 2  ;;  %v965_v41 = vmax.f32 %v963_v42, %v964_v48 }
 0x1ed   : > { %v914_v18 = vadd.f32 %v913_v16, %v4784_v9  ;;  %v3962_v20 = vpop.f32.mrb[10].mxu1  ;;  %v980_v53 = vrot.slane %v979_v24, 1  ;;  %v986_v56 = vmax.f32 %v984_v45, %v985_v32 }
 0x1ee   : > { %v1003_v22 = vsel %vm960_vm7, %v922_v14, -inf  ;;  %v925_v23 = vadd.f32 %v3962_v20, %v4784_v9  ;;  %v916_v25 = vpop.f32.mrb[11].mxu1  ;;  %v972_v15 = vmax.f32 %v970_v26, %v971_v40  ;;  %v966_v46 = vrot.slane %v965_v41, 1 }
 0x1ef   : > { %v1004_v27 = vrot.slane %v1003_v22, 4  ;;  %v989_v43 = vsel %vm960_vm7, %v914_v18, -inf  ;;  %v917_v51 = vadd.f32 %v916_v25, %v4784_v9  ;;  %v4810_v60 = vmax.f32 %v979_v24, %v980_v53 }
 0x1f0   : > { %v990_v49 = vrot.slane %v989_v43, 4  ;;  %v1010_v28 = vsel %vm960_vm7, %v925_v23, -inf  ;;  %v987_v62 = vrot.slane %v986_v56, 1  ;;  %v973_v5 = vrot.slane %v972_v15, 1 }
 0x1f1   : > { %v1005_v29 = vmax.f32 %v1003_v22, %v1004_v27  ;;  %v1011_v55 = vrot.slane %v1010_v28, 4  ;;  %v996_v58 = vsel %vm960_vm7, %v917_v51, -inf  ;;  %v4817_v14 = vmax.f32 %v965_v41, %v966_v46 }
 0x1f2   : > { %v991_v30 = vmax.f32 %v989_v43, %v990_v49  ;;  %v997_v35 = vrot.slane %v996_v58, 4  ;;  %v4821_v23 = vmax.f32 %v986_v56, %v987_v62  ;;  %v4823_v25 = vmax.f32 %v972_v15, %v973_v5 }
 0x1f3   : > { %v1006_v33 = vrot.slane %v1005_v29, 2  ;;  %v1012_v34 = vmax.f32 %v1010_v28, %v1011_v55 }
 0x1f4   : > { %v992_v44 = vrot.slane %v991_v30, 2  ;;  %v998_v61 = vmax.f32 %v996_v58, %v997_v35 }
 0x1f5   : > { %v1007_v2 = vmax.f32 %v1005_v29, %v1006_v33  ;;  %v1013_v19 = vrot.slane %v1012_v34, 2 }
 0x1f6   : > { %v993_v57 = vmax.f32 %v991_v30, %v992_v44  ;;  %v999_v0 = vrot.slane %v998_v61, 2 }
 0x1f7   : > { %v1008_v6 = vrot.slane %v1007_v2, 1  ;;  %v1014_v11 = vmax.f32 %v1012_v34, %v1013_v19 }
 0x1f8   : > { %v3965_v17 = vpop.f32.mrb[12].mxu1  ;;  %v994_v16 = vrot.slane %v993_v57, 1  ;;  %v1000_v20 = vmax.f32 %v998_v61, %v999_v0 }
 0x1f9   : > { %v938_v63 = vadd.f32 %v3965_v17, %v4784_v9  ;;  %v929_v47 = vpop.f32.mrb[13].mxu1  ;;  %v4825_v43 = vmax.f32 %v1007_v2, %v1008_v6  ;;  %v1015_v49 = vrot.slane %v1014_v11, 1 }
 0x1fa   : > { %v930_v1 = vadd.f32 %v929_v47, %v4784_v9  ;;  %v3966_v3 = vpop.f32.mrb[14].mxu1  ;;  %v4827_v55 = vmax.f32 %v993_v57, %v994_v16  ;;  %v1001_v40 = vrot.slane %v1000_v20, 1 }
 0x1fb   : > { %v1031_v7 = vsel %vm960_vm7, %v938_v63, -inf  ;;  %v941_v8 = vadd.f32 %v3966_v3, %v4784_v9  ;;  %v932_v10 = vpop.f32.mrb[15].mxu1  ;;  %v1016_v62 = vmax.f32 %v1014_v11, %v1015_v49 }
 0x1fc   : > { %v1032_v12 = vrot.slane %v1031_v7, 4  ;;  %v1017_v13 = vsel %vm960_vm7, %v930_v1, -inf  ;;  %v933_v39 = vadd.f32 %v932_v10, %v4784_v9  ;;  %v1002_v5 = vmax.f32 %v1000_v20, %v1001_v40 }
 0x1fd   : > { %v1018_v42 = vrot.slane %v1017_v13, 4  ;;  %v1038_v18 = vsel %vm960_vm7, %v941_v8, -inf }
 0x1fe   : > { %v1033_v21 = vmax.f32 %v1031_v7, %v1032_v12  ;;  %v1039_v45 = vrot.slane %v1038_v18, 4  ;;  %v1024_v22 = vsel %vm960_vm7, %v933_v39, -inf }
 0x1ff   : > { %v1019_v26 = vmax.f32 %v1017_v13, %v1018_v42  ;;  %v1025_v27 = vrot.slane %v1024_v22, 4 }
 0x200   : > { %v1034_v28 = vrot.slane %v1033_v21, 2  ;;  %v1040_v48 = vmax.f32 %v1038_v18, %v1039_v45  ;;  %v3969_v29 = vpop.f32.mrb[16].mxu1 }
 0x201   : > { %v1020_v51 = vrot.slane %v1019_v26, 2  ;;  %v1026_v24 = vmax.f32 %v1024_v22, %v1025_v27  ;;  %v954_v32 = vadd.f32 %v3969_v29, %v4784_v9  ;;  %v945_v30 = vpop.f32.mrb[17].mxu1 }
 0x202   : > { %v1035_v33 = vmax.f32 %v1033_v21, %v1034_v28  ;;  %v1041_v58 = vrot.slane %v1040_v48, 2  ;;  %v946_v34 = vadd.f32 %v945_v30, %v4784_v9  ;;  %v3970_v35 = vpop.f32.mrb[18].mxu1 }
 0x203   : > { %v1021_v41 = vmax.f32 %v1019_v26, %v1020_v51  ;;  %v1027_v44 = vrot.slane %v1026_v24, 2  ;;  %v1059_v53 = vsel %vm960_vm7, %v954_v32, -inf  ;;  %v957_v56 = vadd.f32 %v3970_v35, %v4784_v9  ;;  %v948_v61 = vpop.f32.mrb[19].mxu1 }
 0x204   : > { %v1036_v15 = vrot.slane %v1035_v33, 1  ;;  %v1042_v2 = vmax.f32 %v1040_v48, %v1041_v58  ;;  %v1060_v19 = vrot.slane %v1059_v53, 4  ;;  %v1045_v17 = vsel %vm960_vm7, %v946_v34, -inf }
 0x205   : > { %v1022_v46 = vrot.slane %v1021_v41, 1  ;;  %v1028_v57 = vmax.f32 %v1026_v24, %v1027_v44  ;;  %v1046_v63 = vrot.slane %v1045_v17, 4  ;;  %v1066_v47 = vsel %vm960_vm7, %v957_v56, -inf }
 0x206   : > { %v1043_v0 = vrot.slane %v1042_v2, 1  ;;  %v1061_v1 = vmax.f32 %v1059_v53, %v1060_v19  ;;  %v1067_v3 = vrot.slane %v1066_v47, 4  ;;  %v949_v8 = vadd.f32 %v948_v61, %v4784_v9 }
 0x207   : > { %v1029_v6 = vrot.slane %v1028_v57, 1  ;;  %v1047_v7 = vmax.f32 %v1045_v17, %v1046_v63  ;;  %v4836_v10 = vmax.f32 %v1035_v33, %v1036_v15  ;;  %v4838_v12 = vmax.f32 %v1021_v41, %v1022_v46 }
 0x208   : > { %v1062_v13 = vrot.slane %v1061_v1, 2  ;;  %v1068_v39 = vmax.f32 %v1066_v47, %v1067_v3  ;;  %v1201_v16 = vpop.f32.mrb[20].mxu1  ;;  %v4840_v42 = vmax.f32 %v1042_v2, %v1043_v0  ;;  %v1052_v11 = vsel %vm960_vm7, %v949_v8, -inf }
 0x209   : > { %v1048_v18 = vrot.slane %v1047_v7, 2  ;;  %v1202_v21 = vadd.f32 %v1201_v16, %v4808_v59  ;;  %v3981_v20 = vpop.f32.mrb[21].mxu1  ;;  %v1030_v45 = vmax.f32 %v1028_v57, %v1029_v6  ;;  %v1053_v26 = vrot.slane %v1052_v11, 4 }
 0x20a   : > { %v1063_v22 = vmax.f32 %v1061_v1, %v1062_v13  ;;  %v1069_v9 = vrot.slane %v1068_v39, 2  ;;  %v1204_v27 = vpop.f32.mrb[22].mxu1 }
 0x20b   : > { %v1049_v49 = vmax.f32 %v1047_v7, %v1048_v18  ;;  %v1205_v28 = vadd.f32 %v1204_v27, %v4808_v59  ;;  %v3982_v48 = vpop.f32.mrb[23].mxu1  ;;  %v1210_v29 = vrot.slane %v1202_v21, 1  ;;  %v1211_v51 = vrot.slane %v1202_v21, 2 }
 0x20c   : > { %v1064_v24 = vrot.slane %v1063_v22, 1  ;;  %v1070_v32 = vmax.f32 %v1068_v39, %v1069_v9  ;;  %v1054_v30 = vmax.f32 %v1052_v11, %v1053_v26  ;;  %v1212_v40 = vrot.slane %v1202_v21, 3 }
 0x20d   : > { %v1050_v33 = vrot.slane %v1049_v49, 1  ;;  %v1213_v58 = vrot.slane %v1202_v21, 4  ;;  %v1214_v34 = vrot.slane %v1202_v21, 5  ;;  %v1215_v35 = vrot.slane %v1202_v21, 6 }
 0x20e   : > { %v1065_v41 = vmax.f32 %v1063_v22, %v1064_v24  ;;  %v1071_v44 = vrot.slane %v1070_v32, 1  ;;  %v1055_v53 = vrot.slane %v1054_v30, 2  ;;  %v1216_v56 = vrot.slane %v1202_v21, 7 }
 0x20f   : > { %v1051_v59 = vmax.f32 %v1049_v49, %v1050_v33  ;;  %v1240_v61 = vadd.f32 %v1202_v21, %v4817_v14  ;;  %v1241_v15 = vadd.f32 %v1210_v29, %v4823_v25  ;;  %v1242_v2 = vadd.f32 %v1211_v51, %v4810_v60 }
 0x210   : > { %v1072_v19 = vmax.f32 %v1070_v32, %v1071_v44  ;;  %v1056_v17 = vmax.f32 %v1054_v30, %v1055_v53  ;;  %v1243_v46 = vadd.f32 %v1212_v40, %v4821_v23  ;;  %v1244_v57 = vadd.f32 %v1213_v58, %v4827_v55 }
 0x211   : > { %v1245_v63 = vadd.f32 %v1214_v34, %v1002_v5  ;;  %v1246_v47 = vadd.f32 %v1215_v35, %v4825_v43  ;;  %v1247_v0 = vadd.f32 %v1216_v56, %v1016_v62  ;;  %v1272_v1 = vrot.slane %v1241_v15, 7  ;;  %v1325_v15 = vpop.xlane.xlu1 %1324 }
 0x212   : > { %v1057_v3 = vrot.slane %v1056_v17, 1  ;;  %v1275_v6 = vrot.slane %v1242_v2, 6  ;;  %v1278_v7 = vrot.slane %v1243_v46, 5  ;;  %v1281_v8 = vrot.slane %v1244_v57, 4 }
 0x213   : > { %v1274_v14 = vsel %vm1273_vm8, %v1272_v1, %v1240_v61  ;;  %v1284_v25 = vrot.slane %v1245_v63, 3  ;;  %v1287_v13 = vrot.slane %v1246_v47, 2  ;;  %v1290_v60 = vrot.slane %v1247_v0, 1 }
 0x214   : > { %v1058_v39 = vmax.f32 %v1056_v17, %v1057_v3  ;;  %v1277_v16 = vsel %vm1276_vm9, %v1275_v6, %v1274_v14  ;;  %v1217_v23 = vrot.slane %v1205_v28, 1  ;;  %v1218_v18 = vrot.slane %v1205_v28, 2 }
 0x215   : > { %v1280_v55 = vsel %vm1279_vm10, %v1278_v7, %v1277_v16  ;;  %v1219_v5 = vrot.slane %v1205_v28, 3  ;;  %v1220_v43 = vrot.slane %v1205_v28, 4  ;;  %v1221_v62 = vrot.slane %v1205_v28, 5 }
 0x216   : > { %v1283_v11 = vsel %vm1282_vm11, %v1281_v8, %v1280_v55  ;;  %v1222_v21 = vrot.slane %v1205_v28, 6  ;;  %v1223_v20 = vrot.slane %v1205_v28, 7  ;;  %v1248_v22 = vadd.f32 %v1205_v28, %v4838_v12 }
 0x217   : > { %v1286_v9 = vsel %vm1285_vm12, %v1284_v25, %v1283_v11  ;;  %v1249_v26 = vadd.f32 %v1217_v23, %v1030_v45  ;;  %v1250_v27 = vadd.f32 %v1218_v18, %v4836_v10  ;;  %v1251_v49 = vadd.f32 %v1219_v5, %v4840_v42  ;;  %v4226_v25 = vld [vmem:[%s5463_s6] sm:$0xff]  }
 0x218   : > { %v1289_v48 = vsel %vm1288_vm13, %v1287_v13, %v1286_v9  ;;  %v1252_v29 = vadd.f32 %v1220_v43, %v1051_v59  ;;  %v1253_v51 = vadd.f32 %v1221_v62, %v1058_v39  ;;  %v1254_v24 = vadd.f32 %v1222_v21, %v1065_v41  ;;  %v4227_v13 = vld [vmem:[%s5463_s6 + $0x8] sm:$0xff]   ;;  %3983 = vmatprep.subr.bf16.mxu0 %v4226_v25 }
 0x219   : > { %v4861_v32 = vsel %vm1291_vm14, %v1290_v60, %v1289_v48  ;;  %v1255_v30 = vadd.f32 %v1223_v20, %v1072_v19  ;;  %v1293_v40 = vrot.slane %v1249_v26, 7  ;;  %v1295_v33 = vrot.slane %v1250_v27, 6  ;;  %3984 = vmatpush3.bf16.msra.mxu0 %v4226_v25  ;;  %v4893_v27 = vld [vmem:[%s5471_s14] sm:$0xff] }
 0x21a   : > { %v1317_v12 = vsel %vm960_vm7, %v4861_v32, 0.0  ;;  %v1299_v28 = vrot.slane %v1252_v29, 4  ;;  %v1297_v45 = vrot.slane %v1251_v49, 5  ;;  %v1301_v42 = vrot.slane %v1253_v51, 3  ;;  %3985 = vmatprep.subr.bf16.mxu0 %v4227_v13 }
 0x21b   : > { %1318 = vadd.xlane.f32.xlu0 %v1317_v12  ;;  %v1294_v10 = vsel %vm1273_vm8, %v1293_v40, %v1248_v22  ;;  %v1303_v41 = vrot.slane %v1254_v24, 2  ;;  %v1305_v53 = vrot.slane %v1255_v30, 1  ;;  %v1329_v2 = vmul.f32 0.03125, %v1325_v15 }
 0x21c   : > { %v1296_v58 = vsel %vm1276_vm9, %v1295_v33, %v1294_v10  ;;  %v1359_v11 = vsub.s32 5, %v4576_v37  ;;  %v1366_v22 = vsub.s32 6, %v4576_v37 }
 0x21d   : > { %v1298_v34 = vsel %vm1279_vm10, %v1297_v45, %v1296_v58  ;;  %v1332_v46 = vsub.f32 %v4775_v50, %v1329_v2  ;;  %3986 = vmatpush3.bf16.msra.mxu0 %v4227_v13 }
 0x21e   : > { %v1300_v35 = vsel %vm1282_vm11, %v1299_v28, %v1298_v34  ;;  %v1360_v49 = vrot.slane %v4893_v27, %v1359_v11  ;;  %v1367_v51 = vrot.slane %v4893_v27, %v1366_v22 }
 0x21f   : > { %v1302_v44 = vsel %vm1285_vm12, %v1301_v42, %v1300_v35  ;;  %v1335_v47 = vmul.f32 %v1332_v46, %v1332_v46 }
 0x220   : > { %v1304_v56 = vsel %vm1288_vm13, %v1303_v41, %v1302_v44 }
 0x221   : > { %v4872_v59 = vsel %vm1291_vm14, %v1305_v53, %v1304_v56  ;;  %v1342_v6 = vsel %vm960_vm7, %v1335_v47, 0.0 }
 0x222   : > { %v1320_v61 = vsel %vm960_vm7, %v4872_v59, 0.0 }
 0x223   : > { %1321 = vadd.xlane.f32.xlu0 %v1320_v61 }
 0x2a8   : > { %v1319_v19 = vpop.xlane.xlu0 %1318 }
 0x2a9   : > { %v1327_v17 = vmul.f32 0.03125, %v1319_v19 }
 0x2ab   : > { %v1330_v57 = vsub.f32 %v4861_v32, %v1327_v17 }
 0x2ad   : > { %v1333_v63 = vmul.f32 %v1330_v57, %v1330_v57 }
 0x2af   : > { %v1336_v0 = vsel %vm960_vm7, %v1333_v63, 0.0 }
 0x2b0   : > { %v1322_v1 = vpop.xlane.xlu0 %1321  ;;  %1337 = vadd.xlane.f32.xlu1 %v1336_v0 }
 0x2b1   : > { %v1328_v3 = vmul.f32 0.03125, %v1322_v1 }
 0x2b3   : > { %v1331_v7 = vsub.f32 %v4872_v59, %v1328_v3 }
 0x2b4   : > { %1343 = vadd.xlane.f32.xlu1 %v1342_v6 }
 0x2b5   : > { %v1334_v8 = vmul.f32 %v1331_v7, %v1331_v7 }
 0x2b7   : > { %v1339_v14 = vsel %vm960_vm7, %v1334_v8, 0.0 }
 0x2b8   : > { %1340 = vadd.xlane.f32.xlu0 %v1339_v14 }
 0x33d   : > { %v1338_v60 = vpop.xlane.xlu1 %1337 }
 0x33e   : > { %v1345_v39 = vmul.f32 0.03125, %v1338_v60 }
 0x340   : > { %v1348_v16 = vadd.f32 1e-06, %v1345_v39 }
 0x341   : > { %v1344_v23 = vpop.xlane.xlu1 %1343 }
 0x342   : > { %v1347_v18 = vmul.f32 0.03125, %v1344_v23  ;;  %4282 = vrsqrt.f32 %v1348_v16 }
 0x344   : > { %v1350_v55 = vadd.f32 1e-06, %v1347_v18 }
 0x345   : > { %v1341_v5 = vpop.xlane.xlu0 %1340 }
 0x346   : > { %4284 = vrsqrt.f32 %v1350_v55  ;;  %v1346_v43 = vmul.f32 0.03125, %v1341_v5 }
 0x348   : > { %v1349_v62 = vadd.f32 1e-06, %v1346_v43 }
 0x34a   : > { %4286 = vrsqrt.f32 %v1349_v62 }
 0x34c   : > { %v4283_v21 = vpop.eup %4282 }
 0x34d   : > { %v1354_v9 = vmul.f32 %v4283_v21, %v1330_v57 }
 0x34f   : > { %v1361_v30 = vmul.f32 %v1360_v49, %v1354_v9 }
 0x350   : > { %v4285_v20 = vpop.eup %4284 }
 0x351   : > { %v1356_v26 = vmul.f32 %v4285_v20, %v1332_v46  ;;  %v1368_v12 = vadd.f32 %v1367_v51, %v1361_v30  ;;  %v4434_v30 = vmov -1e+30  }
 0x353   : > { %v1363_v48 = vmul.f32 %v1360_v49, %v1356_v26 }
 0x354   : > { %v4287_v29 = vpop.eup %4286 }
 0x355   : > { %v1355_v24 = vmul.f32 %v4287_v29, %v1331_v7  ;;  %v1370_v40 = vadd.f32 %v1367_v51, %v1363_v48  ;;  %v1314_v29 = vand.u32 127, %v544_v36 }
 0x357   : > { %v1362_v33 = vmul.f32 %v1360_v49, %v1355_v24  ;;  %v1372_v10 = vpack.c.bf16 %v1370_v40, %v1370_v40  ;;  %vm1315_vm1 = vcmp.lt.s32.totalorder %v1314_v29, 17 }
 0x358   : > { %v4932_v40 = vsel %vm1315_vm1, 0.0, %v4434_v30 }
 0x359   : > { %v1369_v28 = vadd.f32 %v1367_v51, %v1362_v33 }
 0x35b   : > { %v1371_v45 = vpack.c.bf16 %v1369_v28, %v1368_v12 }
 0x35d   : > { %3987 = vmatprep.mubr.msk.bf16.mxu0 %vm960_vm7, %v1371_v45 }
 0x35e   : > { %3988 = vmatmul.mubr.msk.bf16.vlgmr.msra.gmra.mrb[16].mxu0 %vm960_vm7, %v1372_v10 }
 0x431   : > { %v3989_v42 = vpop.f32.mrb[16].mxu0 }
 0x432   : > { %1490 = vrot.lane.b32.xlu1 %v3989_v42, %s4431_s17  ;;  %v1429_v58 = vpop.f32.mrb[17].mxu0  ;;  %v1514_v25 = vpack.c.bf16 %v3989_v42, %v3989_v42 }
 0x433   : > { %v3990_v34 = vpop.f32.mrb[18].mxu0 }
 0x434   : > { %v1432_v35 = vpop.f32.mrb[19].mxu0 }
 0x435   : > { %v4194_v41 = vpack.i.bf16 %v1432_v35, %v1429_v58  ;;  %v1513_v44 = vpack.c.bf16 %v1432_v35, %v1429_v58 }
 0x437   : > { %4195 = vrot.lane.b32.xlu0 %v4194_v41, %s4431_s17  ;;  %3993 = vmatprep.mubr.msk.bf16.mxu1 %vm1521_vm15, %v1513_v44 }
 0x43b   : > { %4200 = vrot.lane.b32.xlu0 %v4194_v41, %s4432_s20 }
 0x43f   : > { %1499 = vrot.lane.b32.xlu0 %v3989_v42, %s4432_s20 }
 0x443   : > { %4205 = vrot.lane.b32.xlu0 %v4194_v41, %s4433_s21 }
 0x447   : > { %1508 = vrot.lane.b32.xlu0 %v3989_v42, %s4433_s21 }
 0x45b   : > { %1443 = vxpose.xlu1.b32.start [1/3] (short) (narrow) %v1429_v58, 96 }
 0x45f   : > { %1444 = vxpose.xlu1.b32.cont [2/3] (short) (narrow) %v1432_v35, 96 }
 0x463   : > { %1445 = vxpose.xlu1.b32.end [3/3] (short) (narrow) %v3989_v42, 96 }
 0x4a4   : > { %v1491_v2 = vpop.permute.xlu1 %1490 }
 0x4a5   : > { %v1516_v55 = vpack.c.bf16 %v1491_v2, %v1491_v2 }
 0x4a9   : > { %v4196_v53 = vpop.permute.xlu0 %4195 }
 0x4aa   : > { %v4198_v56 = vunpack.i.h.bf16 %v4196_v53  ;;  %v4197_v61 = vunpack.i.l.bf16 %v4196_v53 }
 0x4ac   : > { %v1515_v15 = vpack.c.bf16 %v4198_v56, %v4197_v61 }
 0x4ad   : > { %v4201_v46 = vpop.permute.xlu0 %4200 }
 0x4ae   : > { %3999 = vmatprep.mubr.msk.bf16.mxu0 %vm1521_vm15, %v1515_v15  ;;  %v4203_v3 = vunpack.i.h.bf16 %v4201_v46  ;;  %v4202_v6 = vunpack.i.l.bf16 %v4201_v46 }
 0x4b0   : > { %v1517_v60 = vpack.c.bf16 %v4203_v3, %v4202_v6 }
 0x4b1   : > { %v1500_v47 = vpop.permute.xlu0 %1499 }
 0x4b2   : > { %v1518_v20 = vpack.c.bf16 %v1500_v47, %v1500_v47 }
 0x4b5   : > { %v4206_v7 = vpop.permute.xlu0 %4205 }
 0x4b6   : > { %v4208_v39 = vunpack.i.h.bf16 %v4206_v7  ;;  %v4207_v16 = vunpack.i.l.bf16 %v4206_v7 }
 0x4b8   : > { %v1519_v43 = vpack.c.bf16 %v4208_v39, %v4207_v16 }
 0x4b9   : > { %v1509_v26 = vpop.permute.xlu0 %1508 }
 0x4ba   : > { %v1520_v48 = vpack.c.bf16 %v1509_v26, %v1509_v26 }
 0x4db   : > { %v1459_v19 = vpop.trf.xlu1 }
 0x4df   : > { %v1460_v17 = vpop.trf.xlu1 }
 0x4e3   : > { %v1461_v57 = vpop.trf.xlu1 }
 0x4e7   : > { %v1462_v63 = vpop.trf.xlu1 }
 0x4eb   : > { %v1463_v0 = vpop.trf.xlu1 }
 0x4ec   : > { %v1475_v1 = vpack.c.bf16 %v1463_v0, %v1463_v0 }
 0x4ee   : > { %v1530_v8 = vsel %vm1528_vm0, %v1475_v1, 0  ;;  %4171 = vmatprep.subr.msk.bf16.mxu1 %vm1528_vm0, %v1475_v1 }
 0x4ef   : > { %3992 = vmatpush3.bf16.msra.mxu1 %v1530_v8  ;;  %v1464_v14 = vpop.trf.xlu1 }
 0x4f0   : > { %v1476_v13 = vpack.c.bf16 %v1464_v14, %v1464_v14 }
 0x4f2   : > { %v1587_v23 = vsel %vm1528_vm0, %v1476_v13, 0  ;;  %3994 = vmatmul.mubr.msk.bf16.vlgmr.msra.gmra.mrb[24].mxu1 %vm1521_vm15, %v1514_v25  ;;  %4172 = vmatprep.subr.msk.bf16.mxu0 %vm1528_vm0, %v1476_v13 }
 0x4f3   : > { %3998 = vmatpush3.bf16.msra.mxu0 %v1587_v23  ;;  %v1465_v18 = vpop.trf.xlu1  ;;  %4005 = vmatprep.mubr.msk.bf16.mxu1 %vm1521_vm15, %v1517_v60 }
 0x4f4   : > { %v1477_v5 = vpack.c.bf16 %v1465_v18, %v1465_v18 }
 0x4f6   : > { %v1644_v62 = vsel %vm1528_vm0, %v1477_v5, 0  ;;  %4000 = vmatmul.mubr.msk.bf16.vlgmr.msra.gmra.mrb[20].mxu0 %vm1521_vm15, %v1516_v55  ;;  %4173 = vmatprep.subr.msk.bf16.mxu1 %vm1528_vm0, %v1477_v5 }
 0x4f7   : > { %v1466_v21 = vpop.trf.xlu1  ;;  %4004 = vmatpush3.bf16.msra.mxu1 %v1644_v62  ;;  %4011 = vmatprep.mubr.msk.bf16.mxu0 %vm1521_vm15, %v1519_v43 }
 0x4f8   : > { %v1478_v9 = vpack.c.bf16 %v1466_v21, %v1466_v21  ;;  %4015 = vmatprep.subr.bf16.mxu1 %v4429_v4 }
 0x4fa   : > { %v1701_v49 = vsel %vm1528_vm0, %v1478_v9, 0  ;;  %4006 = vmatmul.mubr.msk.bf16.vlgmr.msra.gmra.mrb[28].mxu1 %vm1521_vm15, %v1518_v20  ;;  %4174 = vmatprep.subr.msk.bf16.mxu0 %vm1528_vm0, %v1478_v9 }
 0x4fb   : > { %4010 = vmatpush3.bf16.msra.mxu0 %v1701_v49  ;;  %4019 = vmatprep.mubr.msk.bf16.mxu1 %vm4430_vm4, %v4429_v4  ;;  %v4982_v30 = vpop.trf.xlu1 }
 0x4fc   : > { %4023 = vmatprep.subr.bf16.mxu0 %v4429_v4 }
 0x4fe   : > { %4012 = vmatmul.mubr.msk.bf16.vlgmr.msra.gmra.mrb[24].mxu0 %vm1521_vm15, %v1520_v48 }
 0x4ff   : > { %4027 = vmatprep.mubr.msk.bf16.mxu0 %vm4430_vm4, %v4429_v4 }
 0x5c5   : > { %v3995_v51 = vpop.f32.mrb[24].mxu1 }
 0x5c6   : > { %v1566_v24 = vpop.f32.mrb[25].mxu1  ;;  %v1753_v33 = vmul.f32 0.35355338, %v3995_v51 }
 0x5c7   : > { %v1751_v12 = vmul.f32 0.35355338, %v1566_v24  ;;  %v3996_v28 = vpop.f32.mrb[26].mxu1 }
 0x5c8   : > { %v1569_v10 = vpop.f32.mrb[27].mxu1  ;;  %v1765_v53 = vadd.f32 %v1753_v33, %v4932_v40  ;;  %v4984_v33 = vpop.trf.xlu1 }
 0x5c9   : > { %v1752_v45 = vmul.f32 0.35355338, %v1569_v10  ;;  %v4001_v42 = vpop.f32.mrb[20].mxu0  ;;  %v4935_v58 = vadd.f32 %v1751_v12, %v4932_v40 }
 0x5ca   : > { %v1623_v34 = vpop.f32.mrb[21].mxu0  ;;  %v1756_v35 = vmul.f32 0.35355338, %v4001_v42  ;;  %v1782_v46 = vsel %vm1775_vm2, %v1765_v53, -inf }
 0x5cb   : > { %v4002_v41 = vpop.f32.mrb[22].mxu0  ;;  %v1776_v36 = vsel %vm1775_vm2, %v4935_v58, -inf  ;;  %v4940_v44 = vadd.f32 %v1752_v45, %v4932_v40  ;;  %v1754_v19 = vmul.f32 0.35355338, %v1623_v34 }
 0x5cc   : > { %v1626_v56 = vpop.f32.mrb[23].mxu0  ;;  %1777 = vmax.xlane.f32.xlu0 %v1776_v36  ;;  %v4947_v57 = vadd.f32 %v1756_v35, %v4932_v40  ;;  %v4986_v12 = vpop.trf.xlu1 }
 0x5cd   : > { %v4007_v61 = vpop.f32.mrb[28].mxu1  ;;  %v1779_v15 = vsel %vm1775_vm2, %v4940_v44, -inf  ;;  %v1755_v1 = vmul.f32 0.35355338, %v1626_v56  ;;  %v1766_v7 = vadd.f32 %v1754_v19, %v4932_v40 }
 0x5ce   : > { %1780 = vmax.xlane.f32.xlu1 %v1779_v15  ;;  %v1680_v2 = vpop.f32.mrb[29].mxu1  ;;  %v1791_v6 = vsel %vm1775_vm2, %v4947_v57, -inf  ;;  %v1759_v21 = vmul.f32 0.35355338, %v4007_v61 }
 0x5cf   : > { %v4008_v17 = vpop.f32.mrb[30].mxu1  ;;  %v1757_v14 = vmul.f32 0.35355338, %v1680_v2  ;;  %v1785_v25 = vsel %vm1775_vm2, %v1766_v7, -inf  ;;  %v1767_v13 = vadd.f32 %v1755_v1, %v4932_v40 }
 0x5d0   : > { %1783 = vmax.xlane.f32.xlu0 %v1782_v46  ;;  %v1683_v63 = vpop.f32.mrb[31].mxu1  ;;  %v4973_v48 = vadd.f32 %v1759_v21, %v4932_v40  ;;  %v4988_v28 = vpop.trf.xlu1 }
 0x5d1   : > { %v4013_v47 = vpop.f32.mrb[24].mxu0  ;;  %v1758_v60 = vmul.f32 0.35355338, %v1683_v63  ;;  %v1788_v39 = vsel %vm1775_vm2, %v1767_v13, -inf  ;;  %v1769_v16 = vadd.f32 %v1757_v14, %v4932_v40 }
 0x5d2   : > { %v1737_v0 = vpop.f32.mrb[25].mxu0  ;;  %v1762_v26 = vmul.f32 0.35355338, %v4013_v47  ;;  %v1800_v29 = vsel %vm1775_vm2, %v4973_v48, -inf }
 0x5d3   : > { %v4014_v3 = vpop.f32.mrb[26].mxu0  ;;  %v1760_v23 = vmul.f32 0.35355338, %v1737_v0  ;;  %v1794_v18 = vsel %vm1775_vm2, %v1769_v16, -inf  ;;  %v4958_v55 = vadd.f32 %v1758_v60, %v4932_v40 }
 0x5d4   : > { %v1740_v8 = vpop.f32.mrb[27].mxu0  ;;  %1792 = vmax.xlane.f32.xlu0 %v1791_v6  ;;  %v4978_v51 = vadd.f32 %v1762_v26, %v4932_v40 }
 0x5d5   : > { %v1761_v5 = vmul.f32 0.35355338, %v1740_v8  ;;  %v1797_v43 = vsel %vm1775_vm2, %v4958_v55, -inf  ;;  %v4963_v62 = vadd.f32 %v1760_v23, %v4932_v40 }
 0x5d6   : > { %v1809_v24 = vsel %vm1775_vm2, %v4978_v51, -inf }
 0x5d7   : > { %v1803_v20 = vsel %vm1775_vm2, %v4963_v62, -inf  ;;  %v4968_v9 = vadd.f32 %v1761_v5, %v4932_v40 }
 0x5d8   : > { %1786 = vmax.xlane.f32.xlu0 %v1785_v25 }
 0x5d9   : > { %v1806_v49 = vsel %vm1775_vm2, %v4968_v9, -inf }
 0x5dc   : > { %1789 = vmax.xlane.f32.xlu0 %v1788_v39 }
 0x5e0   : > { %1795 = vmax.xlane.f32.xlu0 %v1794_v18 }
 0x5e4   : > { %1798 = vmax.xlane.f32.xlu0 %v1797_v43 }
 0x5e8   : > { %1804 = vmax.xlane.f32.xlu0 %v1803_v20 }
 0x5ec   : > { %1807 = vmax.xlane.f32.xlu0 %v1806_v49 }
 0x5f0   : > { %1801 = vmax.xlane.f32.xlu0 %v1800_v29 }
 0x5f4   : > { %1810 = vmax.xlane.f32.xlu0 %v1809_v24 }
 0x659   : > { %v1778_v10 = vpop.xlane.xlu0 %1777 }
 0x65a   : > { %v1812_v45 = vsub.f32 %v4935_v58, %v1778_v10 }
 0x65b   : > { %v1781_v42 = vpop.xlane.xlu1 %1780 }
 0x65c   : > { %v1824_v41 = vmul.f32 1.442695, %v1812_v45  ;;  %v1813_v36 = vsub.f32 %v4940_v44, %v1781_v42 }
 0x65d   : > { %v1784_v34 = vpop.xlane.xlu0 %1783 }
 0x65e   : > { %v1814_v35 = vsub.f32 %v1765_v53, %v1784_v34  ;;  %v1826_v15 = vmul.f32 1.442695, %v1813_v36 }
 0x660   : > { %v1828_v56 = vmul.f32 1.442695, %v1814_v35 }
 0x661   : > { %v1793_v61 = vpop.xlane.xlu0 %1792 }
 0x662   : > { %4288 = vpow2.f32 %v1828_v56  ;;  %v1817_v58 = vsub.f32 %v4947_v57, %v1793_v61 }
 0x663   : > { %4290 = vpow2.f32 %v1824_v41 }
 0x664   : > { %4292 = vpow2.f32 %v1826_v15  ;;  %v1834_v3 = vmul.f32 1.442695, %v1817_v58 }
 0x665   : > { %v1787_v2 = vpop.xlane.xlu0 %1786 }
 0x666   : > { %v1815_v19 = vsub.f32 %v1766_v7, %v1787_v2 }
 0x668   : > { %v1830_v17 = vmul.f32 1.442695, %v1815_v19 }
 0x669   : > { %v1790_v46 = vpop.xlane.xlu0 %1789 }
 0x66a   : > { %v1816_v63 = vsub.f32 %v1767_v13, %v1790_v46  ;;  %4294 = vpow2.f32 %v1830_v17 }
 0x66c   : > { %v4992_v47 = vpop.eup %4288  ;;  %v1832_v53 = vmul.f32 1.442695, %v1816_v63 }
 0x66d   : > { %v1796_v0 = vpop.xlane.xlu0 %1795  ;;  %v1854_v44 = vsel %vm1775_vm2, %v4992_v47, 0.0  ;;  %v4997_v1 = vpop.eup %4290 }
 0x66e   : > { %1855 = vadd.xlane.f32.xlu0 %v1854_v44  ;;  %4296 = vpow2.f32 %v1832_v53  ;;  %v1818_v6 = vsub.f32 %v1769_v16, %v1796_v0  ;;  %v1848_v8 = vsel %vm1775_vm2, %v4997_v1, 0.0  ;;  %v5001_v14 = vpop.eup %4292 }
 0x66f   : > { %4298 = vpow2.f32 %v1834_v3  ;;  %v1851_v60 = vsel %vm1775_vm2, %v5001_v14, 0.0 }
 0x670   : > { %v1836_v57 = vmul.f32 1.442695, %v1818_v6 }
 0x671   : > { %v1799_v7 = vpop.xlane.xlu0 %1798 }
 0x672   : > { %1849 = vadd.xlane.f32.xlu0 %v1848_v8  ;;  %v1819_v25 = vsub.f32 %v4958_v55, %v1799_v7  ;;  %4300 = vpow2.f32 %v1836_v57 }
 0x674   : > { %v5006_v39 = vpop.eup %4294  ;;  %v1838_v16 = vmul.f32 1.442695, %v1819_v25 }
 0x675   : > { %v1805_v13 = vpop.xlane.xlu0 %1804  ;;  %v1857_v5 = vsel %vm1775_vm2, %v5006_v39, 0.0 }
 0x676   : > { %1852 = vadd.xlane.f32.xlu0 %v1851_v60  ;;  %v1821_v23 = vsub.f32 %v4963_v62, %v1805_v13  ;;  %4302 = vpow2.f32 %v1838_v16 }
 0x678   : > { %v5011_v43 = vpop.eup %4296  ;;  %v1842_v55 = vmul.f32 1.442695, %v1821_v23 }
 0x679   : > { %v1808_v18 = vpop.xlane.xlu0 %1807  ;;  %v1860_v49 = vsel %vm1775_vm2, %v5011_v43, 0.0  ;;  %v5016_v29 = vpop.eup %4298 }
 0x67a   : > { %v1822_v21 = vsub.f32 %v4968_v9, %v1808_v18  ;;  %1858 = vadd.xlane.f32.xlu0 %v1857_v5  ;;  %v1863_v9 = vsel %vm1775_vm2, %v5016_v29, 0.0 }
 0x67c   : > { %v1844_v20 = vmul.f32 1.442695, %v1822_v21  ;;  %v5021_v45 = vpop.eup %4300 }
 0x67d   : > { %v1802_v26 = vpop.xlane.xlu0 %1801  ;;  %v1866_v35 = vsel %vm1775_vm2, %v5021_v45, 0.0 }
 0x67e   : > { %4304 = vpow2.f32 %v1844_v20  ;;  %v1820_v62 = vsub.f32 %v4973_v48, %v1802_v26  ;;  %1861 = vadd.xlane.f32.xlu0 %v1860_v49 }
 0x67f   : > { %4306 = vpow2.f32 %v1842_v55 }
 0x680   : > { %v1840_v24 = vmul.f32 1.442695, %v1820_v62  ;;  %v5026_v41 = vpop.eup %4302 }
 0x681   : > { %v1811_v10 = vpop.xlane.xlu0 %1810  ;;  %v1869_v36 = vsel %vm1775_vm2, %v5026_v41, 0.0 }
 0x682   : > { %v1823_v42 = vsub.f32 %v4978_v51, %v1811_v10  ;;  %1864 = vadd.xlane.f32.xlu0 %v1863_v9  ;;  %4308 = vpow2.f32 %v1840_v24 }
 0x684   : > { %v1846_v34 = vmul.f32 1.442695, %v1823_v42  ;;  %v1479_v42 = vpack.c.bf16 %v4982_v30, %v4982_v30 }
 0x686   : > { %4310 = vpow2.f32 %v1846_v34  ;;  %1867 = vadd.xlane.f32.xlu0 %v1866_v35 }
 0x688   : > { %v5028_v48 = vpop.eup %4304 }
 0x689   : > { %v1878_v56 = vsel %vm1775_vm2, %v5028_v48, 0.0  ;;  %v5034_v61 = vpop.eup %4306 }
 0x68a   : > { %1870 = vadd.xlane.f32.xlu0 %v1869_v36  ;;  %1879 = vadd.xlane.f32.xlu1 %v1878_v56  ;;  %v1875_v51 = vsel %vm1775_vm2, %v5034_v61, 0.0 }
 0x68c   : > { %v5038_v15 = vpop.eup %4308 }
 0x68d   : > { %v1872_v19 = vsel %vm1775_vm2, %v5038_v15, 0.0 }
 0x68e   : > { %1876 = vadd.xlane.f32.xlu0 %v1875_v51 }
 0x690   : > { %v5040_v2 = vpop.eup %4310 }
 0x691   : > { %v1881_v17 = vsel %vm1775_vm2, %v5040_v2, 0.0 }
 0x692   : > { %1873 = vadd.xlane.f32.xlu0 %v1872_v19  ;;  %1882 = vadd.xlane.f32.xlu1 %v1881_v17 }
 0x6fb   : > { %v1856_v46 = vpop.xlane.xlu0 %1855 }
 0x6ff   : > { %v1850_v63 = vpop.xlane.xlu0 %1849 }
 0x700   : > { %4312 = vrcp.f32 %v1850_v63  ;;  %v1480_v63 = vpack.c.bf16 %v4984_v33, %v4984_v33 }
 0x703   : > { %v1853_v58 = vpop.xlane.xlu0 %1852 }
 0x704   : > { %4314 = vrcp.f32 %v1853_v58 }
 0x705   : > { %4316 = vrcp.f32 %v1856_v46 }
 0x707   : > { %v1859_v53 = vpop.xlane.xlu0 %1858 }
 0x708   : > { %4318 = vrcp.f32 %v1859_v53 }
 0x70a   : > { %v4313_v44 = vpop.eup %4312 }
 0x70b   : > { %v1862_v0 = vpop.xlane.xlu0 %1861  ;;  %v1896_v7 = vmul.f32 %v4313_v44, %v4997_v1 }
 0x70c   : > { %4320 = vrcp.f32 %v1862_v0 }
 0x70e   : > { %v4315_v3 = vpop.eup %4314 }
 0x70f   : > { %v1865_v6 = vpop.xlane.xlu0 %1864  ;;  %v1897_v8 = vmul.f32 %v4315_v3, %v5001_v14  ;;  %v4317_v57 = vpop.eup %4316 }
 0x710   : > { %4322 = vrcp.f32 %v1865_v6  ;;  %v1898_v16 = vmul.f32 %v4317_v57, %v4992_v47  ;;  %v1481_v6 = vpack.c.bf16 %v4986_v12, %v4986_v12  ;;  %v4228_v12 = vld [vmem:[%s5464_s7] sm:$0xff]  }
 0x711   : > { %v1908_v25 = vpack.c.bf16 %v1897_v8, %v1896_v7 }
 0x712   : > { %v4319_v23 = vpop.eup %4318  ;;  %v1909_v55 = vpack.c.bf16 %v1898_v16, %v1898_v16 }
 0x713   : > { %v1868_v13 = vpop.xlane.xlu0 %1867  ;;  %v1920_v60 = vsel %vm1775_vm2, %v1908_v25, 0  ;;  %v1899_v1 = vmul.f32 %v4319_v23, %v5006_v39 }
 0x714   : > { %4016 = vmatpush3.bf16.xpose.msra.mxu1 %v1920_v60  ;;  %4324 = vrcp.f32 %v1868_v13  ;;  %v1923_v47 = vsel %vm1775_vm2, %v1909_v55, 0 }
 0x715   : > { %4017 = vmatprep.subr.bf16.mxu1 %v4429_v4 }
 0x716   : > { %v4321_v18 = vpop.eup %4320 }
 0x717   : > { %v1880_v5 = vpop.xlane.xlu1 %1879  ;;  %v1871_v21 = vpop.xlane.xlu0 %1870  ;;  %v1900_v14 = vmul.f32 %v4321_v18, %v5011_v43 }
 0x718   : > { %4326 = vrcp.f32 %v1871_v21 }
 0x719   : > { %v1910_v20 = vpack.c.bf16 %v1900_v14, %v1899_v1  ;;  %4328 = vrcp.f32 %v1880_v5 }
 0x71a   : > { %v4323_v26 = vpop.eup %4322 }
 0x71b   : > { %v1877_v49 = vpop.xlane.xlu0 %1876  ;;  %v1969_v62 = vsel %vm1775_vm2, %v1910_v20, 0  ;;  %v1901_v24 = vmul.f32 %v4323_v26, %v5016_v29 }
 0x71c   : > { %4330 = vrcp.f32 %v1877_v49  ;;  %4018 = vmatpush3.bf16.xpose.msra.mxu1 %v1923_v47  ;;  %4024 = vmatpush3.bf16.xpose.msra.mxu0 %v1969_v62 }
 0x71d   : > { %4025 = vmatprep.subr.bf16.mxu0 %v4429_v4  ;;  %4031 = vmatprep.subr.bf16.mxu1 %v4429_v4  ;;  %v1911_v10 = vpack.c.bf16 %v1901_v24, %v1901_v24 }
 0x71e   : > { %v4325_v9 = vpop.eup %4324 }
 0x71f   : > { %v1883_v39 = vpop.xlane.xlu1 %1882  ;;  %v1874_v43 = vpop.xlane.xlu0 %1873  ;;  %v1972_v29 = vsel %vm1775_vm2, %v1911_v10, 0  ;;  %v1902_v36 = vmul.f32 %v4325_v9, %v5021_v45 }
 0x720   : > { %4332 = vrcp.f32 %v1883_v39  ;;  %v2152_v39 = vsub.s32 7, %v4576_v37 }
 0x721   : > { %4334 = vrcp.f32 %v1874_v43 }
 0x722   : > { %v4327_v34 = vpop.eup %4326  ;;  %v2153_v43 = vrot.slane %v4893_v27, %v2152_v39 }
 0x723   : > { %4020 = vmatmul.mubr.msk.bf16.vlgmr.msra.gmra.mrb[32].mxu1 %vm1775_vm2, %v1479_v42  ;;  %v4329_v35 = vpop.eup %4328  ;;  %v1903_v56 = vmul.f32 %v4327_v34, %v5026_v41 }
 0x724   : > { %4026 = vmatpush3.bf16.xpose.msra.mxu0 %v1972_v29  ;;  %4035 = vmatprep.mubr.msk.bf16.mxu1 %vm4430_vm4, %v4429_v4  ;;  %v1906_v17 = vmul.f32 %v4329_v35, %v5028_v48 }
 0x725   : > { %4039 = vmatprep.subr.bf16.mxu0 %v4429_v4  ;;  %v1912_v19 = vpack.c.bf16 %v1903_v56, %v1902_v36 }
 0x726   : > { %v4331_v51 = vpop.eup %4330 }
 0x727   : > { %v1905_v30 = vmul.f32 %v4331_v51, %v5034_v61  ;;  %v2018_v46 = vsel %vm1775_vm2, %v1912_v19, 0 }
 0x728   : > { %4032 = vmatpush3.bf16.xpose.msra.mxu1 %v2018_v46 }
 0x729   : > { %v1914_v45 = vpack.c.bf16 %v1906_v17, %v1905_v30  ;;  %4033 = vmatprep.subr.bf16.mxu1 %v4429_v4 }
 0x72a   : > { %v4333_v58 = vpop.eup %4332 }
 0x72b   : > { %v4335_v41 = vpop.eup %4334  ;;  %4028 = vmatmul.mubr.msk.bf16.vlgmr.msra.gmra.mrb[28].mxu0 %vm1775_vm2, %v1480_v63  ;;  %v2067_v53 = vsel %vm1775_vm2, %v1914_v45, 0  ;;  %v1907_v0 = vmul.f32 %v4333_v58, %v5040_v2 }
 0x72c   : > { %4040 = vmatpush3.bf16.xpose.msra.mxu0 %v2067_v53  ;;  %v1904_v48 = vmul.f32 %v4335_v41, %v5038_v15  ;;  %4043 = vmatprep.mubr.msk.bf16.mxu0 %vm4430_vm4, %v4429_v4  ;;  %v1482_v15 = vpack.c.bf16 %v4988_v28, %v4988_v28  ;;  %v4229_v28 = vld [vmem:[%s5464_s7 + $0x8] sm:$0xff]  }
 0x72d   : > { %4041 = vmatprep.subr.bf16.mxu0 %v4429_v4  ;;  %v1915_v61 = vpack.c.bf16 %v1907_v0, %v1907_v0 }
 0x72e   : > { %v1913_v33 = vpack.c.bf16 %v1904_v48, %v1904_v48 }
 0x72f   : > { %v2070_v3 = vsel %vm1775_vm2, %v1915_v61, 0 }
 0x730   : > { %v2021_v44 = vsel %vm1775_vm2, %v1913_v33, 0 }
 0x731   : > { %4034 = vmatpush3.bf16.xpose.msra.mxu1 %v2021_v44 }
 0x732   : > { %4047 = vmatprep.subr.bf16.mxu1 %v4228_v12 }
 0x734   : > { %4042 = vmatpush3.bf16.xpose.msra.mxu0 %v2070_v3 }
 0x738   : > { %4036 = vmatmul.mubr.msk.bf16.vlgmr.msra.gmra.mrb[36].mxu1 %vm1775_vm2, %v1481_v6  ;;  %v4230_v6 = vld [vmem:[%s5465_s8] sm:$0xff]  }
 0x739   : > { %4048 = vmatpush3.bf16.msra.mxu1 %v4228_v12  ;;  %4055 = vmatprep.subr.bf16.mxu0 %v4230_v6 }
 0x73a   : > { %4049 = vmatprep.subr.bf16.mxu1 %v4229_v28 }
 0x73b   : > { %4044 = vmatmul.mubr.msk.bf16.vlgmr.msra.gmra.mrb[32].mxu0 %vm1775_vm2, %v1482_v15  ;;  %v4231_v15 = vld [vmem:[%s5465_s8 + $0x8] sm:$0xff]  }
 0x73c   : > { %4056 = vmatpush3.bf16.msra.mxu0 %v4230_v6 }
 0x73d   : > { %4050 = vmatpush3.bf16.msra.mxu1 %v4229_v28  ;;  %4057 = vmatprep.subr.bf16.mxu0 %v4231_v15  ;;  %v5130_v28 = vld [vmem:[%s5471_s14 + $0x8] sm:$0xff] }
 0x740   : > { %4058 = vmatpush3.bf16.msra.mxu0 %v4231_v15 }
 0x7f6   : > { %v1959_v2 = vpop.f32.mrb[32].mxu1 }
 0x7f7   : > { %2112 = vxpose.xlu0.b32.start [1/4] (short) (narrow) %v1959_v2, 24  ;;  %v4021_v7 = vpop.f32.mrb[33].mxu1 }
 0x7f8   : > { %v1962_v8 = vpop.f32.mrb[34].mxu1 }
 0x7f9   : > { %v4022_v57 = vpop.f32.mrb[35].mxu1 }
 0x7fe   : > { %v2008_v25 = vpop.f32.mrb[28].mxu0 }
 0x7ff   : > { %2113 = vxpose.xlu0.b32.cont [2/4] (short) (narrow) %v2008_v25, 24  ;;  %v4029_v13 = vpop.f32.mrb[29].mxu0 }
 0x800   : > { %v2011_v60 = vpop.f32.mrb[30].mxu0 }
 0x801   : > { %v4030_v16 = vpop.f32.mrb[31].mxu0 }
 0x80b   : > { %v2057_v23 = vpop.f32.mrb[36].mxu1 }
 0x80c   : > { %2114 = vxpose.xlu0.b32.cont [3/4] (short) (narrow) %v2057_v23, 24  ;;  %v4037_v18 = vpop.f32.mrb[37].mxu1 }
 0x80d   : > { %v2060_v5 = vpop.f32.mrb[38].mxu1 }
 0x80e   : > { %v4038_v21 = vpop.f32.mrb[39].mxu1  ;;  %v2106_v55 = vpop.f32.mrb[32].mxu0  ;;  %v2265_v5 = vrot.slane %v5130_v28, %v4579_v38 }
 0x80f   : > { %v4045_v1 = vpop.f32.mrb[33].mxu0 }
 0x810   : > { %2115 = vxpose.xlu0.b32.end [4/4] (short) (narrow) %v2106_v55, 24  ;;  %v2109_v14 = vpop.f32.mrb[34].mxu0 }
 0x811   : > { %v4046_v20 = vpop.f32.mrb[35].mxu0  ;;  %v2272_v14 = vrot.slane %v5130_v28, %v4780_v31 }
 0x884   : > { %v2128_v26 = vpop.trf.xlu0 }
 0x888   : > { %v2129_v49 = vpop.trf.xlu0 }
 0x889   : > { %v2144_v47 = vpack.c.bf16 %v2129_v49, %v2128_v26 }
 0x88b   : > { %4051 = vmatprep.mubr.msk.bf16.mxu1 %vm960_vm7, %v2144_v47 }
 0x88c   : > { %v2130_v62 = vpop.trf.xlu0 }
 0x88d   : > { %v2145_v24 = vpack.c.bf16 %v2130_v62, %v2130_v62 }
 0x88f   : > { %4052 = vmatmul.mubr.msk.bf16.vlgmr.msra.gmra.mrb[40].mxu1 %vm960_vm7, %v2145_v24 }
 0x962   : > { %v4053_v10 = vpop.f32.mrb[40].mxu1 }
 0x963   : > { %v2206_v9 = vpop.f32.mrb[41].mxu1  ;;  %v2215_v56 = vadd.f32 %v4053_v10, %v2153_v43 }
 0x964   : > { %v2207_v42 = vadd.f32 %v2206_v9, %v2153_v43  ;;  %v4054_v34 = vpop.f32.mrb[42].mxu1 }
 0x965   : > { %v2209_v29 = vpop.f32.mrb[43].mxu1  ;;  %v5109_v30 = vadd.f32 %v2215_v56, %v4775_v50  ;;  %v4233_v34 = vld [vmem:[%s5466_s9 + $0x8] sm:$0xff]   ;;  %v2285_v56 = vrot.slane %v5130_v28, %v4608_v54 }
 0x966   : > { %v5101_v35 = vadd.f32 %v2207_v42, %v4861_v32  ;;  %v2210_v36 = vadd.f32 %v2209_v29, %v2153_v43  ;;  %v4232_v42 = vld [vmem:[%s5466_s9] sm:$0xff]   ;;  %v4234_v29 = vld [vmem:[%s5466_s9 + $0x10] sm:$0xff]  }
 0x967   : > { %v2229_v32 = vsel %vm960_vm7, %v5109_v30, 0.0  ;;  %4063 = vmatprep.subr.bf16.mxu1 %v4232_v42 }
 0x968   : > { %v5104_v51 = vadd.f32 %v2210_v36, %v4872_v59  ;;  %v2223_v19 = vsel %vm960_vm7, %v5101_v35, 0.0  ;;  %4064 = vmatpush3.bf16.msra.mxu1 %v4232_v42  ;;  %v4235_v36 = vld [vmem:[%s5466_s9 + $0x18] sm:$0xff]  }
 0x969   : > { %2224 = vadd.xlane.f32.xlu1 %v2223_v19  ;;  %4065 = vmatprep.subr.bf16.mxu1 %v4233_v34 }
 0x96a   : > { %v2226_v27 = vsel %vm960_vm7, %v5104_v51, 0.0 }
 0x96c   : > { %4066 = vmatpush3.bf16.msra.mxu1 %v4233_v34 }
 0x96d   : > { %2227 = vadd.xlane.f32.xlu1 %v2226_v27  ;;  %4067 = vmatprep.subr.bf16.mxu1 %v4234_v29 }
 0x970   : > { %4068 = vmatpush3.bf16.msra.mxu1 %v4234_v29 }
 0x971   : > { %2230 = vadd.xlane.f32.xlu1 %v2229_v32  ;;  %4069 = vmatprep.subr.bf16.mxu1 %v4235_v36 }
 0x974   : > { %4070 = vmatpush3.bf16.msra.mxu1 %v4235_v36 }
 0x9f6   : > { %v2225_v17 = vpop.xlane.xlu1 %2224 }
 0x9f7   : > { %v2232_v46 = vmul.f32 0.03125, %v2225_v17 }
 0x9f9   : > { %v2235_v59 = vsub.f32 %v5101_v35, %v2232_v46 }
 0x9fa   : > { %v2228_v63 = vpop.xlane.xlu1 %2227 }
 0x9fb   : > { %v2233_v45 = vmul.f32 0.03125, %v2228_v63  ;;  %v2238_v58 = vmul.f32 %v2235_v59, %v2235_v59 }
 0x9fd   : > { %v2236_v41 = vsub.f32 %v5104_v51, %v2233_v45  ;;  %v2241_v50 = vsel %vm960_vm7, %v2238_v58, 0.0 }
 0x9fe   : > { %2242 = vadd.xlane.f32.xlu1 %v2241_v50  ;;  %v2231_v53 = vpop.xlane.xlu1 %2230 }
 0x9ff   : > { %v2234_v0 = vmul.f32 0.03125, %v2231_v53  ;;  %v2239_v48 = vmul.f32 %v2236_v41, %v2236_v41 }
 0xa01   : > { %v2237_v33 = vsub.f32 %v5109_v30, %v2234_v0  ;;  %v2244_v61 = vsel %vm960_vm7, %v2239_v48, 0.0 }
 0xa02   : > { %2245 = vadd.xlane.f32.xlu1 %v2244_v61 }
 0xa03   : > { %v2240_v44 = vmul.f32 %v2237_v33, %v2237_v33 }
 0xa05   : > { %v2247_v3 = vsel %vm960_vm7, %v2240_v44, 0.0 }
 0xa06   : > { %2248 = vadd.xlane.f32.xlu1 %v2247_v3 }
 0xa8b   : > { %v2243_v2 = vpop.xlane.xlu1 %2242 }
 0xa8c   : > { %v2250_v7 = vmul.f32 0.03125, %v2243_v2 }
 0xa8e   : > { %v2253_v8 = vadd.f32 1e-06, %v2250_v7 }
 0xa8f   : > { %v2246_v57 = vpop.xlane.xlu1 %2245 }
 0xa90   : > { %4336 = vrsqrt.f32 %v2253_v8  ;;  %v2251_v25 = vmul.f32 0.03125, %v2246_v57 }
 0xa92   : > { %v2254_v13 = vadd.f32 1e-06, %v2251_v25 }
 0xa93   : > { %v2249_v60 = vpop.xlane.xlu1 %2248 }
 0xa94   : > { %4338 = vrsqrt.f32 %v2254_v13  ;;  %v2252_v16 = vmul.f32 0.03125, %v2249_v60 }
 0xa96   : > { %v2255_v12 = vadd.f32 1e-06, %v2252_v16 }
 0xa98   : > { %4340 = vrsqrt.f32 %v2255_v12 }
 0xa9a   : > { %v4337_v23 = vpop.eup %4336 }
 0xa9b   : > { %v2259_v18 = vmul.f32 %v4337_v23, %v2235_v59 }
 0xa9d   : > { %v2266_v1 = vmul.f32 %v2265_v5, %v2259_v18 }
 0xa9e   : > { %v4339_v21 = vpop.eup %4338 }
 0xa9f   : > { %v2260_v55 = vmul.f32 %v4339_v21, %v2236_v41  ;;  %v2273_v47 = vadd.f32 %v2272_v14, %v2266_v1 }
 0xaa1   : > { %v2267_v20 = vmul.f32 %v2265_v5, %v2260_v55 }
 0xaa2   : > { %v4341_v26 = vpop.eup %4340 }
 0xaa3   : > { %v2261_v49 = vmul.f32 %v4341_v26, %v2237_v33  ;;  %v2274_v62 = vadd.f32 %v2272_v14, %v2267_v20  ;;  %v2392_v20 = vrot.slane %v5130_v28, %v4803_v52 }
 0xaa5   : > { %v2276_v24 = vpack.c.bf16 %v2274_v62, %v2273_v47  ;;  %v2268_v43 = vmul.f32 %v2265_v5, %v2261_v49 }
 0xaa7   : > { %4059 = vmatprep.mubr.msk.bf16.mxu0 %vm960_vm7, %v2276_v24  ;;  %v2275_v10 = vadd.f32 %v2272_v14, %v2268_v43 }
 0xaa9   : > { %v2277_v9 = vpack.c.bf16 %v2275_v10, %v2275_v10 }
 0xaab   : > { %4060 = vmatmul.mubr.msk.bf16.vlgmr.msra.gmra.mrb[36].mxu0 %vm960_vm7, %v2277_v9 }
 0xb7e   : > { %v4061_v19 = vpop.f32.mrb[36].mxu0 }
 0xb7f   : > { %v2347_v27 = vadd.f32 %v4061_v19, %v2285_v56  ;;  %v2338_v32 = vpop.f32.mrb[37].mxu0 }
 0xb80   : > { %v2339_v17 = vadd.f32 %v2338_v32, %v2285_v56  ;;  %v4062_v46 = vpop.f32.mrb[38].mxu0 }
 0xb81   : > { %v2354_v59 = vmul.f32 %v2347_v27, %v2347_v27  ;;  %v2341_v63 = vpop.f32.mrb[39].mxu0 }
 0xb82   : > { %v2352_v45 = vmul.f32 %v2339_v17, %v2339_v17  ;;  %v2342_v58 = vadd.f32 %v2341_v63, %v2285_v56 }
 0xb83   : > { %v2357_v41 = vmul.f32 %v2354_v59, %v2347_v27 }
 0xb84   : > { %v2355_v50 = vmul.f32 %v2352_v45, %v2339_v17  ;;  %v2353_v53 = vmul.f32 %v2342_v58, %v2342_v58 }
 0xb85   : > { %v2360_v0 = vmul.f32 0.044715, %v2357_v41 }
 0xb86   : > { %v2358_v48 = vmul.f32 0.044715, %v2355_v50  ;;  %v2356_v33 = vmul.f32 %v2353_v53, %v2342_v58 }
 0xb87   : > { %v2363_v61 = vadd.f32 %v2360_v0, %v2347_v27  ;;  %v4236_v0 = vld [vmem:[%s5467_s10] sm:$0xff]  }
 0xb88   : > { %v2361_v44 = vadd.f32 %v2358_v48, %v2339_v17  ;;  %v2359_v3 = vmul.f32 0.044715, %v2356_v33  ;;  %v4237_v48 = vld [vmem:[%s5467_s10 + $0x8] sm:$0xff]   ;;  %4075 = vmatprep.subr.bf16.mxu0 %v4236_v0 }
 0xb89   : > { %v2366_v6 = vmul.f32 0.7978846, %v2363_v61  ;;  %4076 = vmatpush3.bf16.msra.mxu0 %v4236_v0 }
 0xb8a   : > { %v2364_v15 = vmul.f32 0.7978846, %v2361_v44  ;;  %v2362_v2 = vadd.f32 %v2359_v3, %v2342_v58  ;;  %4077 = vmatprep.subr.bf16.mxu0 %v4237_v48 }
 0xb8b   : > { %4342 = vtanh.f32 %v2366_v6 }
 0xb8c   : > { %4344 = vtanh.f32 %v2364_v15  ;;  %v2365_v7 = vmul.f32 0.7978846, %v2362_v2 }
 0xb8d   : > { %4078 = vmatpush3.bf16.msra.mxu0 %v4237_v48 }
 0xb8e   : > { %4346 = vtanh.f32 %v2365_v7 }
 0xb95   : > { %v4343_v8 = vpop.eup %4342 }
 0xb96   : > { %v4345_v57 = vpop.eup %4344  ;;  %v2372_v25 = vadd.f32 1.0, %v4343_v8 }
 0xb97   : > { %v2370_v13 = vadd.f32 1.0, %v4345_v57  ;;  %v2516_v57 = vsub.s32 4, %v4576_v37 }
 0xb98   : > { %v4347_v60 = vpop.eup %4346  ;;  %v2375_v16 = vmul.f32 0.5, %v2372_v25 }
 0xb99   : > { %v2373_v12 = vmul.f32 0.5, %v2370_v13  ;;  %v2371_v23 = vadd.f32 1.0, %v4347_v60  ;;  %v2517_v60 = vrot.slane %v5130_v28, %v2516_v57 }
 0xb9a   : > { %v2378_v5 = vmul.f32 %v2375_v16, %v2347_v27 }
 0xb9b   : > { %v2374_v18 = vmul.f32 0.5, %v2371_v23  ;;  %v2376_v21 = vmul.f32 %v2373_v12, %v2339_v17 }
 0xb9c   : > { %v2380_v14 = vpack.c.bf16 %v2378_v5, %v2378_v5 }
 0xb9d   : > { %v2377_v55 = vmul.f32 %v2374_v18, %v2342_v58  ;;  %v2524_v18 = vrot.slane %v5130_v28, %v1359_v11 }
 0xb9f   : > { %v2379_v1 = vpack.c.bf16 %v2377_v55, %v2376_v21 }
 0xba1   : > { %4071 = vmatprep.mubr.msk.bf16.mxu1 %vm2417_vm3, %v2379_v1 }
 0xba2   : > { %4072 = vmatmul.mubr.msk.bf16.vlgmr.msra.gmra.mrb[44].mxu1 %vm2417_vm3, %v2380_v14 }
 0xc75   : > { %v4073_v26 = vpop.f32.mrb[44].mxu1 }
 0xc76   : > { %v2458_v49 = vpop.f32.mrb[45].mxu1  ;;  %v2467_v9 = vadd.f32 %v4073_v26, %v2392_v20 }
 0xc77   : > { %v2459_v47 = vadd.f32 %v2458_v49, %v2392_v20  ;;  %v4074_v62 = vpop.f32.mrb[46].mxu1 }
 0xc78   : > { %v2461_v24 = vpop.f32.mrb[47].mxu1  ;;  %v5165_v29 = vadd.f32 %v2467_v9, %v5109_v30 }
 0xc79   : > { %v5157_v43 = vadd.f32 %v2459_v47, %v5101_v35  ;;  %v2462_v10 = vadd.f32 %v2461_v24, %v2392_v20 }
 0xc7a   : > { %v2481_v35 = vsel %vm960_vm7, %v5165_v29, 0.0 }
 0xc7b   : > { %v5160_v42 = vadd.f32 %v2462_v10, %v5104_v51  ;;  %v2475_v34 = vsel %vm960_vm7, %v5157_v43, 0.0 }
 0xc7c   : > { %2476 = vadd.xlane.f32.xlu1 %v2475_v34 }
 0xc7d   : > { %v2478_v36 = vsel %vm960_vm7, %v5160_v42, 0.0 }
 0xc80   : > { %2479 = vadd.xlane.f32.xlu1 %v2478_v36 }
 0xc84   : > { %2482 = vadd.xlane.f32.xlu1 %v2481_v35 }
 0xd09   : > { %v2477_v56 = vpop.xlane.xlu1 %2476 }
 0xd0a   : > { %v2484_v19 = vmul.f32 0.03125, %v2477_v56 }
 0xd0c   : > { %v2487_v51 = vsub.f32 %v5157_v43, %v2484_v19 }
 0xd0d   : > { %v2480_v27 = vpop.xlane.xlu1 %2479 }
 0xd0e   : > { %v2485_v32 = vmul.f32 0.03125, %v2480_v27  ;;  %v2490_v17 = vmul.f32 %v2487_v51, %v2487_v51 }
 0xd10   : > { %v2488_v46 = vsub.f32 %v5160_v42, %v2485_v32  ;;  %v2493_v30 = vsel %vm960_vm7, %v2490_v17, 0.0 }
 0xd11   : > { %2494 = vadd.xlane.f32.xlu1 %v2493_v30  ;;  %v2483_v59 = vpop.xlane.xlu1 %2482 }
 0xd12   : > { %v2486_v63 = vmul.f32 0.03125, %v2483_v59  ;;  %v2491_v45 = vmul.f32 %v2488_v46, %v2488_v46 }
 0xd14   : > { %v2489_v58 = vsub.f32 %v5165_v29, %v2486_v63  ;;  %v2496_v41 = vsel %vm960_vm7, %v2491_v45, 0.0 }
 0xd15   : > { %2497 = vadd.xlane.f32.xlu1 %v2496_v41 }
 0xd16   : > { %v2492_v50 = vmul.f32 %v2489_v58, %v2489_v58 }
 0xd18   : > { %v2499_v53 = vsel %vm960_vm7, %v2492_v50, 0.0 }
 0xd19   : > { %2500 = vadd.xlane.f32.xlu1 %v2499_v53 }
 0xd9e   : > { %v2495_v33 = vpop.xlane.xlu1 %2494 }
 0xd9f   : > { %v2502_v61 = vmul.f32 0.03125, %v2495_v33 }
 0xda1   : > { %v2505_v44 = vadd.f32 1e-06, %v2502_v61 }
 0xda2   : > { %v2498_v3 = vpop.xlane.xlu1 %2497 }
 0xda3   : > { %4348 = vrsqrt.f32 %v2505_v44  ;;  %v2503_v6 = vmul.f32 0.03125, %v2498_v3 }
 0xda5   : > { %v2506_v15 = vadd.f32 1e-06, %v2503_v6 }
 0xda6   : > { %v2501_v2 = vpop.xlane.xlu1 %2500 }
 0xda7   : > { %4350 = vrsqrt.f32 %v2506_v15  ;;  %v2504_v7 = vmul.f32 0.03125, %v2501_v2 }
 0xda9   : > { %v2507_v8 = vadd.f32 1e-06, %v2504_v7 }
 0xdab   : > { %4352 = vrsqrt.f32 %v2507_v8 }
 0xdad   : > { %v4349_v25 = vpop.eup %4348 }
 0xdae   : > { %v2511_v13 = vmul.f32 %v4349_v25, %v2487_v51 }
 0xdb0   : > { %v2518_v23 = vmul.f32 %v2517_v60, %v2511_v13 }
 0xdb1   : > { %v4351_v16 = vpop.eup %4350 }
 0xdb2   : > { %v2512_v12 = vmul.f32 %v4351_v16, %v2488_v46  ;;  %v2525_v1 = vadd.f32 %v2524_v18, %v2518_v23 }
 0xdb4   : > { %v2519_v5 = vmul.f32 %v2517_v60, %v2512_v12 }
 0xdb5   : > { %v4353_v21 = vpop.eup %4352 }
 0xdb6   : > { %v2513_v55 = vmul.f32 %v4353_v21, %v2489_v58  ;;  %v2526_v14 = vadd.f32 %v2524_v18, %v2519_v5 }
 0xdb8   : > { %v2528_v20 = vpack.c.bf16 %v2526_v14, %v2525_v1  ;;  %v2520_v26 = vmul.f32 %v2517_v60, %v2513_v55 }
 0xdba   : > { %4079 = vmatprep.mubr.msk.bf16.mxu0 %vm960_vm7, %v2528_v20  ;;  %v2527_v49 = vadd.f32 %v2524_v18, %v2520_v26 }
 0xdbc   : > { %v2529_v47 = vpack.c.bf16 %v2527_v49, %v2527_v49 }
 0xdbe   : > { %4080 = vmatmul.mubr.msk.bf16.vlgmr.msra.gmra.mrb[40].mxu0 %vm960_vm7, %v2529_v47 }
 0xe91   : > { %v4081_v62 = vpop.f32.mrb[40].mxu0 }
 0xe92   : > { %2647 = vrot.lane.b32.xlu0 %v4081_v62, %s4431_s17  ;;  %v2586_v24 = vpop.f32.mrb[41].mxu0  ;;  %v2671_v48 = vpack.c.bf16 %v4081_v62, %v4081_v62 }
 0xe93   : > { %v4082_v10 = vpop.f32.mrb[42].mxu0 }
 0xe94   : > { %v2589_v9 = vpop.f32.mrb[43].mxu0 }
 0xe95   : > { %v4214_v11 = vpack.i.bf16 %v2589_v9, %v2586_v24  ;;  %v2670_v34 = vpack.c.bf16 %v2589_v9, %v2586_v24 }
 0xe97   : > { %4215 = vrot.lane.b32.xlu0 %v4214_v11, %s4432_s20  ;;  %4210 = vrot.lane.b32.xlu1 %v4214_v11, %s4431_s17 }
 0xe98   : > { %4085 = vmatprep.mubr.msk.bf16.mxu0 %vm1521_vm15, %v2670_v34 }
 0xe9b   : > { %2656 = vrot.lane.b32.xlu0 %v4081_v62, %s4432_s20 }
 0xe9f   : > { %4220 = vrot.lane.b32.xlu0 %v4214_v11, %s4433_s21 }
 0xea3   : > { %2665 = vrot.lane.b32.xlu0 %v4081_v62, %s4433_s21 }
 0xec0   : > { %2600 = vxpose.xlu1.b32.start [1/3] (short) (narrow) %v2586_v24, 96 }
 0xec4   : > { %2601 = vxpose.xlu1.b32.cont [2/3] (short) (narrow) %v2589_v9, 96 }
 0xec8   : > { %2602 = vxpose.xlu1.b32.end [3/3] (short) (narrow) %v4081_v62, 96 }
 0xf04   : > { %v2648_v27 = vpop.permute.xlu0 %2647 }
 0xf05   : > { %v2673_v2 = vpack.c.bf16 %v2648_v27, %v2648_v27 }
 0xf09   : > { %v4211_v36 = vpop.permute.xlu1 %4210  ;;  %v4216_v17 = vpop.permute.xlu0 %4215 }
 0xf0a   : > { %v4213_v35 = vunpack.i.h.bf16 %v4211_v36  ;;  %v4212_v56 = vunpack.i.l.bf16 %v4211_v36  ;;  %v4218_v58 = vunpack.i.h.bf16 %v4216_v17  ;;  %v4217_v41 = vunpack.i.l.bf16 %v4216_v17 }
 0xf0c   : > { %v2672_v19 = vpack.c.bf16 %v4213_v35, %v4212_v56  ;;  %v2674_v61 = vpack.c.bf16 %v4218_v58, %v4217_v41 }
 0xf0d   : > { %v2657_v59 = vpop.permute.xlu0 %2656 }
 0xf0e   : > { %4091 = vmatprep.mubr.msk.bf16.mxu1 %vm1521_vm15, %v2672_v19  ;;  %v2675_v60 = vpack.c.bf16 %v2657_v59, %v2657_v59 }
 0xf11   : > { %v4221_v50 = vpop.permute.xlu0 %4220 }
 0xf12   : > { %v4223_v44 = vunpack.i.h.bf16 %v4221_v50  ;;  %v4222_v3 = vunpack.i.l.bf16 %v4221_v50 }
 0xf14   : > { %v2676_v8 = vpack.c.bf16 %v4223_v44, %v4222_v3 }
 0xf15   : > { %v2666_v12 = vpop.permute.xlu0 %2665 }
 0xf16   : > { %v2677_v18 = vpack.c.bf16 %v2666_v12, %v2666_v12 }
 0xf40   : > { %v2616_v51 = vpop.trf.xlu1 }
 0xf44   : > { %v2617_v32 = vpop.trf.xlu1 }
 0xf48   : > { %v2618_v46 = vpop.trf.xlu1 }
 0xf4c   : > { %v2619_v30 = vpop.trf.xlu1 }
 0xf50   : > { %v2620_v63 = vpop.trf.xlu1 }
 0xf51   : > { %v2632_v45 = vpack.c.bf16 %v2620_v63, %v2620_v63 }
 0xf53   : > { %v2685_v53 = vsel %vm1528_vm0, %v2632_v45, 0  ;;  %4175 = vmatprep.subr.msk.bf16.mxu0 %vm1528_vm0, %v2632_v45 }
 0xf54   : > { %4084 = vmatpush3.bf16.msra.mxu0 %v2685_v53  ;;  %v2621_v0 = vpop.trf.xlu1 }
 0xf55   : > { %v2633_v33 = vpack.c.bf16 %v2621_v0, %v2621_v0 }
 0xf57   : > { %v2742_v6 = vsel %vm1528_vm0, %v2633_v33, 0  ;;  %4086 = vmatmul.mubr.msk.bf16.vlgmr.msra.gmra.mrb[44].mxu0 %vm1521_vm15, %v2671_v48  ;;  %4176 = vmatprep.subr.msk.bf16.mxu1 %vm1528_vm0, %v2633_v33 }
 0xf58   : > { %4090 = vmatpush3.bf16.msra.mxu1 %v2742_v6  ;;  %v2622_v15 = vpop.trf.xlu1  ;;  %4097 = vmatprep.mubr.msk.bf16.mxu0 %vm1521_vm15, %v2674_v61 }
 0xf59   : > { %v2634_v7 = vpack.c.bf16 %v2622_v15, %v2622_v15 }
 0xf5b   : > { %v2799_v25 = vsel %vm1528_vm0, %v2634_v7, 0  ;;  %4092 = vmatmul.mubr.msk.bf16.vlgmr.msra.gmra.mrb[48].mxu1 %vm1521_vm15, %v2673_v2  ;;  %4177 = vmatprep.subr.msk.bf16.mxu0 %vm1528_vm0, %v2634_v7 }
 0xf5c   : > { %v2623_v13 = vpop.trf.xlu1  ;;  %4096 = vmatpush3.bf16.msra.mxu0 %v2799_v25  ;;  %4103 = vmatprep.mubr.msk.bf16.mxu1 %vm1521_vm15, %v2676_v8 }
 0xf5d   : > { %v2635_v16 = vpack.c.bf16 %v2623_v13, %v2623_v13  ;;  %4107 = vmatprep.subr.bf16.mxu0 %v4429_v4 }
 0xf5f   : > { %v2856_v23 = vsel %vm1528_vm0, %v2635_v16, 0  ;;  %4098 = vmatmul.mubr.msk.bf16.vlgmr.msra.gmra.mrb[48].mxu0 %vm1521_vm15, %v2675_v60  ;;  %4178 = vmatprep.subr.msk.bf16.mxu1 %vm1528_vm0, %v2635_v16 }
 0xf60   : > { %4102 = vmatpush3.bf16.msra.mxu1 %v2856_v23  ;;  %4111 = vmatprep.mubr.msk.bf16.mxu0 %vm4430_vm4, %v4429_v4 }
 0xf61   : > { %4115 = vmatprep.subr.bf16.mxu1 %v4429_v4 }
 0xf63   : > { %4104 = vmatmul.mubr.msk.bf16.vlgmr.msra.gmra.mrb[52].mxu1 %vm1521_vm15, %v2677_v18 }
 0xf64   : > { %4119 = vmatprep.mubr.msk.bf16.mxu1 %vm4430_vm4, %v4429_v4 }
0x102a   : > { %v4087_v5 = vpop.f32.mrb[44].mxu0 }
0x102b   : > { %v2721_v21 = vpop.f32.mrb[45].mxu0  ;;  %v2908_v55 = vmul.f32 0.35355338, %v4087_v5 }
0x102c   : > { %v2906_v1 = vmul.f32 0.35355338, %v2721_v21  ;;  %v4088_v14 = vpop.f32.mrb[46].mxu0 }
0x102d   : > { %v2724_v20 = vpop.f32.mrb[47].mxu0  ;;  %v5227_v34 = vadd.f32 %v2908_v55, %v4932_v40  ;;  %v5265_v55 = vpop.trf.xlu1 }
0x102e   : > { %v2907_v26 = vmul.f32 0.35355338, %v2724_v20  ;;  %v4093_v49 = vpop.f32.mrb[48].mxu1  ;;  %v5221_v47 = vadd.f32 %v2906_v1, %v4932_v40 }
0x102f   : > { %v2778_v62 = vpop.f32.mrb[49].mxu1  ;;  %v2911_v24 = vmul.f32 0.35355338, %v4093_v49  ;;  %v2936_v32 = vsel %vm1775_vm2, %v5227_v34, -inf }
0x1030   : > { %v4094_v10 = vpop.f32.mrb[50].mxu1  ;;  %v2930_v9 = vsel %vm1775_vm2, %v5221_v47, -inf  ;;  %v2919_v11 = vadd.f32 %v2907_v26, %v4932_v40  ;;  %v2909_v51 = vmul.f32 0.35355338, %v2778_v62 }
0x1031   : > { %v2781_v36 = vpop.f32.mrb[51].mxu1  ;;  %2931 = vmax.xlane.f32.xlu0 %v2930_v9  ;;  %v5233_v17 = vadd.f32 %v2911_v24, %v4932_v40  ;;  %v5267_v1 = vpop.trf.xlu1 }
0x1032   : > { %v4099_v35 = vpop.f32.mrb[48].mxu0  ;;  %v2933_v56 = vsel %vm1775_vm2, %v2919_v11, -inf  ;;  %v2910_v63 = vmul.f32 0.35355338, %v2781_v36  ;;  %v2921_v41 = vadd.f32 %v2909_v51, %v4932_v40 }
0x1033   : > { %2934 = vmax.xlane.f32.xlu1 %v2933_v56  ;;  %v2835_v19 = vpop.f32.mrb[49].mxu0  ;;  %v2945_v58 = vsel %vm1775_vm2, %v5233_v17, -inf  ;;  %v2914_v25 = vmul.f32 0.35355338, %v4099_v35 }
0x1034   : > { %v4100_v27 = vpop.f32.mrb[50].mxu0  ;;  %v2912_v53 = vmul.f32 0.35355338, %v2835_v19  ;;  %v2939_v0 = vsel %vm1775_vm2, %v2921_v41, -inf  ;;  %v2922_v48 = vadd.f32 %v2910_v63, %v4932_v40 }
0x1035   : > { %2937 = vmax.xlane.f32.xlu0 %v2936_v32  ;;  %v2838_v46 = vpop.f32.mrb[51].mxu0  ;;  %v5256_v23 = vadd.f32 %v2914_v25, %v4932_v40  ;;  %v5269_v14 = vpop.trf.xlu1 }
0x1036   : > { %v4105_v30 = vpop.f32.mrb[52].mxu1  ;;  %v2913_v33 = vmul.f32 0.35355338, %v2838_v46  ;;  %v2942_v61 = vsel %vm1775_vm2, %v2922_v48, -inf  ;;  %v2924_v44 = vadd.f32 %v2912_v53, %v4932_v40 }
0x1037   : > { %v2892_v59 = vpop.f32.mrb[53].mxu1  ;;  %v2917_v16 = vmul.f32 0.35355338, %v4105_v30  ;;  %v2954_v18 = vsel %vm1775_vm2, %v5256_v23, -inf }
0x1038   : > { %v4106_v45 = vpop.f32.mrb[54].mxu1  ;;  %v2915_v3 = vmul.f32 0.35355338, %v2892_v59  ;;  %v2948_v6 = vsel %vm1775_vm2, %v2924_v44, -inf  ;;  %v2925_v15 = vadd.f32 %v2913_v33, %v4932_v40 }
0x1039   : > { %v2895_v50 = vpop.f32.mrb[55].mxu1  ;;  %2946 = vmax.xlane.f32.xlu0 %v2945_v58  ;;  %v5261_v5 = vadd.f32 %v2917_v16, %v4932_v40  ;;  %v5271_v20 = vpop.trf.xlu1 }
0x103a   : > { %v2916_v2 = vmul.f32 0.35355338, %v2895_v50  ;;  %v2951_v7 = vsel %vm1775_vm2, %v2925_v15, -inf  ;;  %v5246_v8 = vadd.f32 %v2915_v3, %v4932_v40 }
0x103b   : > { %v2963_v21 = vsel %vm1775_vm2, %v5261_v5, -inf }
0x103c   : > { %v2957_v13 = vsel %vm1775_vm2, %v5246_v8, -inf  ;;  %v5251_v60 = vadd.f32 %v2916_v2, %v4932_v40 }
0x103d   : > { %2940 = vmax.xlane.f32.xlu0 %v2939_v0 }
0x103e   : > { %v2960_v12 = vsel %vm1775_vm2, %v5251_v60, -inf }
0x1041   : > { %2943 = vmax.xlane.f32.xlu0 %v2942_v61 }
0x1045   : > { %2949 = vmax.xlane.f32.xlu0 %v2948_v6 }
0x1049   : > { %2952 = vmax.xlane.f32.xlu0 %v2951_v7 }
0x104d   : > { %2958 = vmax.xlane.f32.xlu0 %v2957_v13 }
0x1051   : > { %2961 = vmax.xlane.f32.xlu0 %v2960_v12 }
0x1055   : > { %2955 = vmax.xlane.f32.xlu0 %v2954_v18 }
0x1059   : > { %2964 = vmax.xlane.f32.xlu0 %v2963_v21 }
0x10be   : > { %v2932_v26 = vpop.xlane.xlu0 %2931 }
0x10bf   : > { %v2966_v49 = vsub.f32 %v5221_v47, %v2932_v26 }
0x10c0   : > { %v2935_v62 = vpop.xlane.xlu1 %2934 }
0x10c1   : > { %v2978_v24 = vmul.f32 1.442695, %v2966_v49  ;;  %v2967_v40 = vsub.f32 %v2919_v11, %v2935_v62 }
0x10c2   : > { %v2938_v10 = vpop.xlane.xlu0 %2937 }
0x10c3   : > { %4354 = vpow2.f32 %v2978_v24  ;;  %v2980_v9 = vmul.f32 1.442695, %v2967_v40  ;;  %v2968_v35 = vsub.f32 %v5227_v34, %v2938_v10 }
0x10c5   : > { %4356 = vpow2.f32 %v2980_v9  ;;  %v2982_v27 = vmul.f32 1.442695, %v2968_v35 }
0x10c6   : > { %v2947_v36 = vpop.xlane.xlu0 %2946 }
0x10c7   : > { %v2971_v32 = vsub.f32 %v5233_v17, %v2947_v36 }
0x10c9   : > { %v2988_v63 = vmul.f32 1.442695, %v2971_v32 }
0x10ca   : > { %v2941_v56 = vpop.xlane.xlu0 %2940 }
0x10cb   : > { %v2969_v19 = vsub.f32 %v2921_v41, %v2941_v56 }
0x10cd   : > { %v5275_v51 = vpop.eup %4354  ;;  %v2984_v46 = vmul.f32 1.442695, %v2969_v19 }
0x10ce   : > { %v2944_v30 = vpop.xlane.xlu0 %2943  ;;  %v3002_v47 = vsel %vm1775_vm2, %v5275_v51, 0.0 }
0x10cf   : > { %v5280_v11 = vpop.eup %4356  ;;  %4358 = vpow2.f32 %v2984_v46  ;;  %v2970_v59 = vsub.f32 %v2922_v48, %v2944_v30  ;;  %3003 = vadd.xlane.f32.xlu0 %v3002_v47 }
0x10d0   : > { %4360 = vpow2.f32 %v2982_v27  ;;  %v3005_v58 = vsel %vm1775_vm2, %v5280_v11, 0.0 }
0x10d1   : > { %v2986_v34 = vmul.f32 1.442695, %v2970_v59 }
0x10d2   : > { %v2950_v45 = vpop.xlane.xlu0 %2949 }
0x10d3   : > { %4362 = vpow2.f32 %v2986_v34  ;;  %v2972_v41 = vsub.f32 %v2924_v44, %v2950_v45  ;;  %3006 = vadd.xlane.f32.xlu0 %v3005_v58 }
0x10d4   : > { %4364 = vpow2.f32 %v2988_v63 }
0x10d5   : > { %v2990_v17 = vmul.f32 1.442695, %v2972_v41 }
0x10d6   : > { %v2953_v50 = vpop.xlane.xlu0 %2952 }
0x10d7   : > { %4366 = vpow2.f32 %v2990_v17  ;;  %v2973_v53 = vsub.f32 %v2925_v15, %v2953_v50 }
0x10d9   : > { %v5284_v0 = vpop.eup %4358  ;;  %v2992_v33 = vmul.f32 1.442695, %v2973_v53 }
0x10da   : > { %v2959_v48 = vpop.xlane.xlu0 %2958  ;;  %v3011_v61 = vsel %vm1775_vm2, %v5284_v0, 0.0  ;;  %v5288_v3 = vpop.eup %4360 }
0x10db   : > { %4368 = vpow2.f32 %v2992_v33  ;;  %v2975_v6 = vsub.f32 %v5246_v8, %v2959_v48  ;;  %3012 = vadd.xlane.f32.xlu1 %v3011_v61  ;;  %v3008_v15 = vsel %vm1775_vm2, %v5288_v3, 0.0 }
0x10dd   : > { %v5291_v44 = vpop.eup %4362  ;;  %v2996_v2 = vmul.f32 1.442695, %v2975_v6 }
0x10de   : > { %v2962_v7 = vpop.xlane.xlu0 %2961  ;;  %v3014_v25 = vsel %vm1775_vm2, %v5291_v44, 0.0  ;;  %v5297_v13 = vpop.eup %4364 }
0x10df   : > { %4370 = vpow2.f32 %v2996_v2  ;;  %v2976_v16 = vsub.f32 %v5251_v60, %v2962_v7  ;;  %3009 = vadd.xlane.f32.xlu1 %v3008_v15  ;;  %3015 = vadd.xlane.f32.xlu0 %v3014_v25  ;;  %v3017_v26 = vsel %vm1775_vm2, %v5297_v13, 0.0 }
0x10e1   : > { %v5300_v12 = vpop.eup %4366  ;;  %v2998_v8 = vmul.f32 1.442695, %v2976_v16 }
0x10e2   : > { %v2956_v18 = vpop.xlane.xlu0 %2955  ;;  %v3020_v21 = vsel %vm1775_vm2, %v5300_v12, 0.0 }
0x10e3   : > { %4372 = vpow2.f32 %v2998_v8  ;;  %v2974_v49 = vsub.f32 %v5256_v23, %v2956_v18  ;;  %3021 = vadd.xlane.f32.xlu1 %v3020_v21  ;;  %3018 = vadd.xlane.f32.xlu0 %v3017_v26 }
0x10e5   : > { %v5307_v62 = vpop.eup %4368  ;;  %v2994_v60 = vmul.f32 1.442695, %v2974_v49 }
0x10e6   : > { %v2965_v24 = vpop.xlane.xlu0 %2964  ;;  %v3023_v40 = vsel %vm1775_vm2, %v5307_v62, 0.0 }
0x10e7   : > { %4374 = vpow2.f32 %v2994_v60  ;;  %v2977_v10 = vsub.f32 %v5261_v5, %v2965_v24  ;;  %3024 = vadd.xlane.f32.xlu0 %v3023_v40 }
0x10e9   : > { %v5312_v9 = vpop.eup %4370  ;;  %v3000_v36 = vmul.f32 1.442695, %v2977_v10  ;;  %v2636_v10 = vpack.c.bf16 %v5265_v55, %v5265_v55 }
0x10ea   : > { %v3029_v35 = vsel %vm1775_vm2, %v5312_v9, 0.0 }
0x10eb   : > { %4376 = vpow2.f32 %v3000_v36  ;;  %3030 = vadd.xlane.f32.xlu1 %v3029_v35 }
0x10ed   : > { %v5316_v23 = vpop.eup %4372 }
0x10ee   : > { %v3032_v56 = vsel %vm1775_vm2, %v5316_v23, 0.0 }
0x10ef   : > { %3033 = vadd.xlane.f32.xlu0 %v3032_v56 }
0x10f1   : > { %v5320_v19 = vpop.eup %4374 }
0x10f2   : > { %v3026_v5 = vsel %vm1775_vm2, %v5320_v19, 0.0 }
0x10f3   : > { %3027 = vadd.xlane.f32.xlu1 %v3026_v5 }
0x10f5   : > { %v5324_v27 = vpop.eup %4376 }
0x10f6   : > { %v3035_v32 = vsel %vm1775_vm2, %v5324_v27, 0.0 }
0x10f7   : > { %3036 = vadd.xlane.f32.xlu0 %v3035_v32 }
0x115c   : > { %v3004_v46 = vpop.xlane.xlu0 %3003 }
0x115d   : > { %4378 = vrcp.f32 %v3004_v46 }
0x1160   : > { %v3007_v30 = vpop.xlane.xlu0 %3006 }
0x1161   : > { %4380 = vrcp.f32 %v3007_v30  ;;  %v2637_v30 = vpack.c.bf16 %v5267_v1, %v5267_v1 }
0x1167   : > { %v4379_v59 = vpop.eup %4378 }
0x1168   : > { %v3013_v47 = vpop.xlane.xlu1 %3012  ;;  %v3050_v58 = vmul.f32 %v4379_v59, %v5275_v51 }
0x1169   : > { %4382 = vrcp.f32 %v3013_v47 }
0x116b   : > { %v4381_v63 = vpop.eup %4380 }
0x116c   : > { %v3010_v34 = vpop.xlane.xlu1 %3009  ;;  %v3016_v45 = vpop.xlane.xlu0 %3015  ;;  %v3051_v41 = vmul.f32 %v4381_v63, %v5280_v11 }
0x116d   : > { %4384 = vrcp.f32 %v3010_v34 }
0x116e   : > { %4386 = vrcp.f32 %v3016_v45  ;;  %v3062_v17 = vpack.c.bf16 %v3051_v41, %v3050_v58  ;;  %v2639_v58 = vpack.c.bf16 %v5271_v20, %v5271_v20  ;;  %v4239_v20 = vld [vmem:[%s5468_s11 + $0x8] sm:$0xff]  }
0x1170   : > { %v3022_v50 = vpop.xlane.xlu1 %3021  ;;  %v3019_v53 = vpop.xlane.xlu0 %3018  ;;  %v3074_v33 = vsel %vm1775_vm2, %v3062_v17, 0 }
0x1171   : > { %4108 = vmatpush3.bf16.xpose.msra.mxu0 %v3074_v33  ;;  %4388 = vrcp.f32 %v3019_v53 }
0x1172   : > { %4109 = vmatprep.subr.bf16.mxu0 %v4429_v4  ;;  %4390 = vrcp.f32 %v3022_v50 }
0x1173   : > { %v4383_v61 = vpop.eup %4382 }
0x1174   : > { %v3025_v48 = vpop.xlane.xlu0 %3024  ;;  %v3053_v7 = vmul.f32 %v4383_v61, %v5284_v0 }
0x1175   : > { %4392 = vrcp.f32 %v3025_v48 }
0x1177   : > { %v4385_v6 = vpop.eup %4384 }
0x1178   : > { %v4387_v2 = vpop.eup %4386  ;;  %v3031_v51 = vpop.xlane.xlu1 %3030  ;;  %v3052_v11 = vmul.f32 %v4385_v6, %v5288_v3 }
0x1179   : > { %v3054_v15 = vmul.f32 %v4387_v2, %v5291_v44  ;;  %4394 = vrcp.f32 %v3031_v51 }
0x117a   : > { %v3063_v25 = vpack.c.bf16 %v3052_v11, %v3052_v11 }
0x117b   : > { %v3064_v16 = vpack.c.bf16 %v3054_v15, %v3053_v7  ;;  %v4389_v8 = vpop.eup %4388 }
0x117c   : > { %v3034_v18 = vpop.xlane.xlu0 %3033  ;;  %v3077_v21 = vsel %vm1775_vm2, %v3063_v25, 0  ;;  %v4391_v26 = vpop.eup %4390  ;;  %v3055_v60 = vmul.f32 %v4389_v8, %v5297_v13 }
0x117d   : > { %4396 = vrcp.f32 %v3034_v18  ;;  %4110 = vmatpush3.bf16.xpose.msra.mxu0 %v3077_v21  ;;  %v3123_v49 = vsel %vm1775_vm2, %v3064_v16, 0  ;;  %v3056_v44 = vmul.f32 %v4391_v26, %v5300_v12 }
0x117e   : > { %4116 = vmatpush3.bf16.xpose.msra.mxu1 %v3123_v49  ;;  %4123 = vmatprep.subr.bf16.mxu0 %v4429_v4  ;;  %v3065_v40 = vpack.c.bf16 %v3055_v60, %v3055_v60  ;;  %v3307_v49 = vrot.slane %v5130_v28, %v1366_v22 }
0x117f   : > { %v4393_v0 = vpop.eup %4392  ;;  %4117 = vmatprep.subr.bf16.mxu1 %v4429_v4 }
0x1180   : > { %v3028_v3 = vpop.xlane.xlu1 %3027  ;;  %v3057_v24 = vmul.f32 %v4393_v0, %v5307_v62  ;;  %v3126_v5 = vsel %vm1775_vm2, %v3065_v40, 0 }
0x1181   : > { %4398 = vrcp.f32 %v3028_v3 }
0x1182   : > { %v3066_v36 = vpack.c.bf16 %v3057_v24, %v3056_v44 }
0x1183   : > { %v4395_v56 = vpop.eup %4394 }
0x1184   : > { %4112 = vmatmul.mubr.msk.bf16.vlgmr.msra.gmra.mrb[52].mxu0 %vm1775_vm2, %v2636_v10  ;;  %v3037_v13 = vpop.xlane.xlu0 %3036  ;;  %v3172_v35 = vsel %vm1775_vm2, %v3066_v36, 0  ;;  %v3059_v55 = vmul.f32 %v4395_v56, %v5312_v9 }
0x1185   : > { %4400 = vrcp.f32 %v3037_v13  ;;  %4124 = vmatpush3.bf16.xpose.msra.mxu0 %v3172_v35  ;;  %4127 = vmatprep.mubr.msk.bf16.mxu0 %vm4430_vm4, %v4429_v4 }
0x1186   : > { %4118 = vmatpush3.bf16.xpose.msra.mxu1 %v3126_v5  ;;  %4125 = vmatprep.subr.bf16.mxu0 %v4429_v4 }
0x1187   : > { %v4397_v12 = vpop.eup %4396  ;;  %4131 = vmatprep.subr.bf16.mxu1 %v4429_v4 }
0x1188   : > { %v3060_v62 = vmul.f32 %v4397_v12, %v5316_v23 }
0x118a   : > { %v3068_v32 = vpack.c.bf16 %v3060_v62, %v3059_v55 }
0x118b   : > { %v4399_v46 = vpop.eup %4398 }
0x118c   : > { %v3221_v47 = vsel %vm1775_vm2, %v3068_v32, 0  ;;  %v3058_v59 = vmul.f32 %v4399_v46, %v5320_v19  ;;  %v2638_v19 = vpack.c.bf16 %v5269_v14, %v5269_v14  ;;  %v4238_v14 = vld [vmem:[%s5468_s11] sm:$0xff]  }
0x118d   : > { %4120 = vmatmul.mubr.msk.bf16.vlgmr.msra.gmra.mrb[56].mxu1 %vm1775_vm2, %v2637_v30 }
0x118e   : > { %4132 = vmatpush3.bf16.xpose.msra.mxu1 %v3221_v47  ;;  %v3067_v63 = vpack.c.bf16 %v3058_v59, %v3058_v59  ;;  %4135 = vmatprep.mubr.msk.bf16.mxu1 %vm4430_vm4, %v4429_v4 }
0x118f   : > { %v4401_v34 = vpop.eup %4400  ;;  %4133 = vmatprep.subr.bf16.mxu1 %v4429_v4 }
0x1190   : > { %v3175_v9 = vsel %vm1775_vm2, %v3067_v63, 0  ;;  %v3061_v23 = vmul.f32 %v4401_v34, %v5324_v27 }
0x1191   : > { %4126 = vmatpush3.bf16.xpose.msra.mxu0 %v3175_v9 }
0x1192   : > { %v3069_v1 = vpack.c.bf16 %v3061_v23, %v3061_v23  ;;  %4139 = vmatprep.subr.bf16.mxu0 %v4238_v14  ;;  %v4240_v23 = vld [vmem:[%s5469_s12] sm:$0xff]  }
0x1194   : > { %v3224_v45 = vsel %vm1775_vm2, %v3069_v1, 0  ;;  %v4241_v1 = vld [vmem:[%s5469_s12 + $0x8] sm:$0xff]  }
0x1196   : > { %4134 = vmatpush3.bf16.xpose.msra.mxu1 %v3224_v45 }
0x1197   : > { %4147 = vmatprep.subr.bf16.mxu1 %v4240_v23 }
0x1198   : > { %4128 = vmatmul.mubr.msk.bf16.vlgmr.msra.gmra.mrb[56].mxu0 %vm1775_vm2, %v2638_v19 }
0x1199   : > { %4140 = vmatpush3.bf16.msra.mxu0 %v4238_v14 }
0x119a   : > { %4141 = vmatprep.subr.bf16.mxu0 %v4239_v20 }
0x119d   : > { %4136 = vmatmul.mubr.msk.bf16.vlgmr.msra.gmra.mrb[60].mxu1 %vm1775_vm2, %v2639_v58  ;;  %4142 = vmatpush3.bf16.msra.mxu0 %v4239_v20 }
0x119e   : > { %4148 = vmatpush3.bf16.msra.mxu1 %v4240_v23 }
0x119f   : > { %4149 = vmatprep.subr.bf16.mxu1 %v4241_v1 }
0x11a2   : > { %4150 = vmatpush3.bf16.msra.mxu1 %v4241_v1 }
0x1257   : > { %v3113_v4 = vpop.f32.mrb[52].mxu0 }
0x1258   : > { %3266 = vxpose.xlu1.b32.start [1/4] (short) (narrow) %v3113_v4, 24  ;;  %v4113_v41 = vpop.f32.mrb[53].mxu0 }
0x1259   : > { %v3116_v17 = vpop.f32.mrb[54].mxu0 }
0x125a   : > { %v4114_v27 = vpop.f32.mrb[55].mxu0 }
0x1260   : > { %v3162_v50 = vpop.f32.mrb[56].mxu1 }
0x1261   : > { %3267 = vxpose.xlu1.b32.cont [2/4] (short) (narrow) %v3162_v50, 24  ;;  %v4121_v53 = vpop.f32.mrb[57].mxu1 }
0x1262   : > { %v3165_v33 = vpop.f32.mrb[58].mxu1 }
0x1263   : > { %v4122_v48 = vpop.f32.mrb[59].mxu1 }
0x1264   : > { %v4419_v48 = vld [vmem:[%s5471_s14 + $0x8] sm:$0xff] }
0x1265   : > { %v3419_v14 = vrot.slane %v4419_v48, %v2152_v39 }
0x126b   : > { %v3211_v61 = vpop.f32.mrb[56].mxu0 }
0x126c   : > { %3268 = vxpose.xlu1.b32.cont [3/4] (short) (narrow) %v3211_v61, 24  ;;  %v4129_v6 = vpop.f32.mrb[57].mxu0  ;;  %v5412_v61 = vld [vmem:[%s5471_s14 + $0x10] sm:$0xff] }
0x126d   : > { %v3214_v2 = vpop.f32.mrb[58].mxu0  ;;  %v3546_v48 = vrot.slane %v5412_v61, %v4608_v54 }
0x126e   : > { %v4130_v51 = vpop.f32.mrb[59].mxu0 }
0x1270   : > { %v3260_v11 = vpop.f32.mrb[60].mxu1 }
0x1271   : > { %3269 = vxpose.xlu1.b32.end [4/4] (short) (narrow) %v3260_v11, 24  ;;  %v4137_v7 = vpop.f32.mrb[61].mxu1  ;;  %v3426_v11 = vrot.slane %v5412_v61, %v4579_v38  ;;  %v4243_v38 = vld [vmem:[%s5470_s13 + $0x8] sm:$0xff]  }
0x1272   : > { %v3263_v15 = vpop.f32.mrb[62].mxu1 }
0x1273   : > { %v4138_v25 = vpop.f32.mrb[63].mxu1 }
0x12e5   : > { %v3282_v16 = vpop.trf.xlu1 }
0x12e9   : > { %v3283_v8 = vpop.trf.xlu1 }
0x12ea   : > { %v3298_v18 = vpack.c.bf16 %v3283_v8, %v3282_v16 }
0x12ec   : > { %4143 = vmatprep.mubr.msk.bf16.mxu0 %vm960_vm7, %v3298_v18 }
0x12ed   : > { %v3284_v21 = vpop.trf.xlu1 }
0x12ee   : > { %v3299_v26 = vpack.c.bf16 %v3284_v21, %v3284_v21 }
0x12f0   : > { %4144 = vmatmul.mubr.msk.bf16.vlgmr.msra.gmra.mrb[60].mxu0 %vm960_vm7, %v3299_v26 }
0x13c3   : > { %v4145_v60 = vpop.f32.mrb[60].mxu0 }
0x13c4   : > { %v3360_v0 = vpop.f32.mrb[61].mxu0  ;;  %v3369_v36 = vadd.f32 %v4145_v60, %v3307_v49  ;;  %v4244_v60 = vld [vmem:[%s5470_s13 + $0x10] sm:$0xff]  }
0x13c5   : > { %v3361_v3 = vadd.f32 %v3360_v0, %v3307_v49  ;;  %v4146_v44 = vpop.f32.mrb[62].mxu0  ;;  %v4245_v0 = vld [vmem:[%s5470_s13 + $0x18] sm:$0xff]  }
0x13c6   : > { %v3363_v24 = vpop.f32.mrb[63].mxu0  ;;  %v3376_v56 = vadd.f32 %v3369_v36, %v5165_v29 }
0x13c7   : > { %v5382_v40 = vadd.f32 %v3361_v3, %v5157_v43  ;;  %v3364_v10 = vadd.f32 %v3363_v24, %v3307_v49  ;;  %v4242_v49 = vld [vmem:[%s5470_s13] sm:$0xff]   ;;  %v3439_v3 = vrot.slane %v5412_v61, %v4780_v31 }
0x13c8   : > { %v3383_v28 = vsel %vm960_vm7, %v3376_v56, 0.0  ;;  %4155 = vmatprep.subr.bf16.mxu0 %v4242_v49 }
0x13c9   : > { %v5385_v13 = vadd.f32 %v3364_v10, %v5160_v42  ;;  %v3377_v35 = vsel %vm960_vm7, %v5382_v40, 0.0  ;;  %4156 = vmatpush3.bf16.msra.mxu0 %v4242_v49 }
0x13ca   : > { %3378 = vadd.xlane.f32.xlu0 %v3377_v35  ;;  %4157 = vmatprep.subr.bf16.mxu0 %v4243_v38 }
0x13cb   : > { %v3380_v22 = vsel %vm960_vm7, %v5385_v13, 0.0 }
0x13cd   : > { %4158 = vmatpush3.bf16.msra.mxu0 %v4243_v38 }
0x13ce   : > { %3381 = vadd.xlane.f32.xlu0 %v3380_v22  ;;  %4159 = vmatprep.subr.bf16.mxu0 %v4244_v60 }
0x13d1   : > { %4160 = vmatpush3.bf16.msra.mxu0 %v4244_v60 }
0x13d2   : > { %3384 = vadd.xlane.f32.xlu0 %v3383_v28  ;;  %4161 = vmatprep.subr.bf16.mxu0 %v4245_v0 }
0x13d5   : > { %4162 = vmatpush3.bf16.msra.mxu0 %v4245_v0 }
0x1457   : > { %v3379_v43 = vpop.xlane.xlu0 %3378 }
0x1458   : > { %v3386_v5 = vmul.f32 0.03125, %v3379_v43 }
0x145a   : > { %v3389_v12 = vsub.f32 %v5382_v40, %v3386_v5 }
0x145b   : > { %v3382_v55 = vpop.xlane.xlu0 %3381 }
0x145c   : > { %v3387_v42 = vmul.f32 0.03125, %v3382_v55  ;;  %v3392_v62 = vmul.f32 %v3389_v12, %v3389_v12 }
0x145e   : > { %v3390_v32 = vsub.f32 %v5385_v13, %v3387_v42  ;;  %v3395_v46 = vsel %vm960_vm7, %v3392_v62, 0.0 }
0x145f   : > { %3396 = vadd.xlane.f32.xlu0 %v3395_v46  ;;  %v3385_v29 = vpop.xlane.xlu0 %3384 }
0x1460   : > { %v3388_v30 = vmul.f32 0.03125, %v3385_v29  ;;  %v3393_v47 = vmul.f32 %v3390_v32, %v3390_v32 }
0x1462   : > { %v3391_v59 = vsub.f32 %v3376_v56, %v3388_v30  ;;  %v3398_v63 = vsel %vm960_vm7, %v3393_v47, 0.0 }
0x1463   : > { %3399 = vadd.xlane.f32.xlu0 %v3398_v63 }
0x1464   : > { %v3394_v34 = vmul.f32 %v3391_v59, %v3391_v59 }
0x1466   : > { %v3401_v9 = vsel %vm960_vm7, %v3394_v34, 0.0 }
0x1467   : > { %3402 = vadd.xlane.f32.xlu0 %v3401_v9 }
0x14ec   : > { %v3397_v45 = vpop.xlane.xlu0 %3396 }
0x14ed   : > { %v3404_v19 = vmul.f32 0.03125, %v3397_v45 }
0x14ef   : > { %v3407_v58 = vadd.f32 1e-06, %v3404_v19 }
0x14f0   : > { %v3400_v4 = vpop.xlane.xlu0 %3399 }
0x14f1   : > { %4402 = vrsqrt.f32 %v3407_v58  ;;  %v3405_v41 = vmul.f32 0.03125, %v3400_v4 }
0x14f3   : > { %v3408_v17 = vadd.f32 1e-06, %v3405_v41 }
0x14f4   : > { %v3403_v27 = vpop.xlane.xlu0 %3402 }
0x14f5   : > { %4404 = vrsqrt.f32 %v3408_v17  ;;  %v3406_v50 = vmul.f32 0.03125, %v3403_v27 }
0x14f7   : > { %v3409_v53 = vadd.f32 1e-06, %v3406_v50 }
0x14f9   : > { %4406 = vrsqrt.f32 %v3409_v53 }
0x14fb   : > { %v4403_v33 = vpop.eup %4402 }
0x14fc   : > { %v3413_v20 = vmul.f32 %v4403_v33, %v3389_v12 }
0x14fe   : > { %v3420_v51 = vmul.f32 %v3419_v14, %v3413_v20 }
0x14ff   : > { %v4405_v6 = vpop.eup %4404 }
0x1500   : > { %v3414_v2 = vmul.f32 %v4405_v6, %v3390_v32  ;;  %v3427_v16 = vadd.f32 %v3426_v11, %v3420_v51 }
0x1502   : > { %v3421_v7 = vmul.f32 %v3419_v14, %v3414_v2 }
0x1503   : > { %v4407_v15 = vpop.eup %4406 }
0x1504   : > { %v3415_v25 = vmul.f32 %v4407_v15, %v3391_v59  ;;  %v3428_v8 = vadd.f32 %v3426_v11, %v3421_v7 }
0x1506   : > { %v3430_v18 = vpack.c.bf16 %v3428_v8, %v3427_v16  ;;  %v3422_v21 = vmul.f32 %v3419_v14, %v3415_v25 }
0x1508   : > { %4151 = vmatprep.mubr.msk.bf16.mxu1 %vm960_vm7, %v3430_v18  ;;  %v3429_v39 = vadd.f32 %v3426_v11, %v3422_v21 }
0x150a   : > { %v3431_v26 = vpack.c.bf16 %v3429_v39, %v3429_v39 }
0x150c   : > { %4152 = vmatmul.mubr.msk.bf16.vlgmr.msra.gmra.mrb[64].mxu1 %vm960_vm7, %v3431_v26 }
0x15df   : > { %v4153_v44 = vpop.f32.mrb[64].mxu1 }
0x15e0   : > { %v3501_v24 = vadd.f32 %v4153_v44, %v3439_v3  ;;  %v3492_v10 = vpop.f32.mrb[65].mxu1 }
0x15e1   : > { %v3493_v36 = vadd.f32 %v3492_v10, %v3439_v3  ;;  %v4154_v35 = vpop.f32.mrb[66].mxu1 }
0x15e2   : > { %v3508_v56 = vmul.f32 %v3501_v24, %v3501_v24  ;;  %v3495_v22 = vpop.f32.mrb[67].mxu1 }
0x15e3   : > { %v3506_v28 = vmul.f32 %v3493_v36, %v3493_v36  ;;  %v3496_v43 = vadd.f32 %v3495_v22, %v3439_v3 }
0x15e4   : > { %v3511_v5 = vmul.f32 %v3508_v56, %v3501_v24  ;;  %v3661_v56 = vrot.slane %v5412_v61, %v2516_v57 }
0x15e5   : > { %v3509_v12 = vmul.f32 %v3506_v28, %v3493_v36  ;;  %v3507_v55 = vmul.f32 %v3496_v43, %v3496_v43 }
0x15e6   : > { %v3514_v42 = vmul.f32 0.044715, %v3511_v5 }
0x15e7   : > { %v3512_v62 = vmul.f32 0.044715, %v3509_v12  ;;  %v3510_v32 = vmul.f32 %v3507_v55, %v3496_v43 }
0x15e8   : > { %v3517_v46 = vadd.f32 %v3514_v42, %v3501_v24 }
0x15e9   : > { %v3515_v29 = vadd.f32 %v3512_v62, %v3493_v36  ;;  %v3513_v30 = vmul.f32 0.044715, %v3510_v32 }
0x15ea   : > { %v3520_v47 = vmul.f32 0.7978846, %v3517_v46 }
0x15eb   : > { %v3518_v31 = vmul.f32 0.7978846, %v3515_v29  ;;  %v3516_v59 = vadd.f32 %v3513_v30, %v3496_v43 }
0x15ec   : > { %4408 = vtanh.f32 %v3520_v47 }
0x15ed   : > { %4410 = vtanh.f32 %v3518_v31  ;;  %v3519_v63 = vmul.f32 0.7978846, %v3516_v59 }
0x15ef   : > { %4412 = vtanh.f32 %v3519_v63 }
0x15f6   : > { %v4409_v34 = vpop.eup %4408 }
0x15f7   : > { %v4411_v9 = vpop.eup %4410  ;;  %v3526_v23 = vadd.f32 1.0, %v4409_v34 }
0x15f8   : > { %v3524_v1 = vadd.f32 1.0, %v4411_v9 }
0x15f9   : > { %v4413_v45 = vpop.eup %4412  ;;  %v3529_v19 = vmul.f32 0.5, %v3526_v23 }
0x15fa   : > { %v3527_v58 = vmul.f32 0.5, %v3524_v1  ;;  %v3525_v4 = vadd.f32 1.0, %v4413_v45 }
0x15fb   : > { %v3532_v17 = vmul.f32 %v3529_v19, %v3501_v24 }
0x15fc   : > { %v3528_v41 = vmul.f32 0.5, %v3525_v4  ;;  %v3530_v27 = vmul.f32 %v3527_v58, %v3493_v36  ;;  %v3655_v36 = vrot.slane %v5412_v61, %v4803_v52 }
0x15fd   : > { %v3534_v33 = vpack.c.bf16 %v3532_v17, %v3532_v17 }
0x15fe   : > { %v3531_v50 = vmul.f32 %v3528_v41, %v3496_v43 }
0x1600   : > { %v3533_v53 = vpack.c.bf16 %v3531_v50, %v3530_v27 }
0x1602   : > { %4163 = vmatprep.mubr.msk.bf16.mxu0 %vm2417_vm3, %v3533_v53 }
0x1603   : > { %4164 = vmatmul.mubr.msk.bf16.vlgmr.msra.gmra.mrb[64].mxu0 %vm2417_vm3, %v3534_v33 }
0x16d6   : > { %v4165_v14 = vpop.f32.mrb[64].mxu0 }
0x16d7   : > { %v3611_v20 = vpop.f32.mrb[65].mxu0 }
0x16d8   : > { %v3612_v6 = vadd.f32 %v3611_v20, %v3546_v48  ;;  %v4166_v2 = vpop.f32.mrb[66].mxu0 }
0x16d9   : > { %v3614_v51 = vpop.f32.mrb[67].mxu0 }
0x16da   : > { %v3624_v11 = vadd.f32 %v3612_v6, %v5382_v40  ;;  %v3615_v7 = vadd.f32 %v3614_v51, %v3546_v48 }
0x16dc   : > { %v3625_v15 = vadd.f32 %v3615_v7, %v5385_v13  ;;  %v3626_v25 = vsel %vm960_vm7, %v3624_v11, 0.0 }
0x16dd   : > { %3627 = vadd.xlane.f32.xlu0 %v3626_v25 }
0x16de   : > { %v3629_v16 = vsel %vm960_vm7, %v3625_v15, 0.0 }
0x16e1   : > { %3630 = vadd.xlane.f32.xlu0 %v3629_v16 }
0x176a   : > { %v3628_v8 = vpop.xlane.xlu0 %3627 }
0x176b   : > { %v3632_v18 = vmul.f32 0.03125, %v3628_v8 }
0x176d   : > { %v3634_v21 = vsub.f32 %v3624_v11, %v3632_v18 }
0x176e   : > { %v3631_v54 = vpop.xlane.xlu0 %3630 }
0x176f   : > { %v3633_v39 = vmul.f32 0.03125, %v3631_v54  ;;  %v3636_v26 = vmul.f32 %v3634_v21, %v3634_v21 }
0x1771   : > { %v3635_v49 = vsub.f32 %v3625_v15, %v3633_v39  ;;  %v3638_v38 = vsel %vm960_vm7, %v3636_v26, 0.0 }
0x1772   : > { %3639 = vadd.xlane.f32.xlu0 %v3638_v38 }
0x1773   : > { %v3637_v40 = vmul.f32 %v3635_v49, %v3635_v49 }
0x1775   : > { %v3641_v60 = vsel %vm960_vm7, %v3637_v40, 0.0 }
0x1776   : > { %3642 = vadd.xlane.f32.xlu0 %v3641_v60 }
0x17ff   : > { %v3640_v13 = vpop.xlane.xlu0 %3639 }
0x1800   : > { %v3644_v0 = vmul.f32 0.03125, %v3640_v13 }
0x1802   : > { %v3646_v3 = vadd.f32 1e-06, %v3644_v0 }
0x1803   : > { %v3643_v44 = vpop.xlane.xlu0 %3642 }
0x1804   : > { %4414 = vrsqrt.f32 %v3646_v3  ;;  %v3645_v24 = vmul.f32 0.03125, %v3643_v44 }
0x1806   : > { %v3647_v10 = vadd.f32 1e-06, %v3645_v24 }
0x1808   : > { %4416 = vrsqrt.f32 %v3647_v10 }
0x180e   : > { %v4415_v35 = vpop.eup %4414 }
0x180f   : > { %v3650_v22 = vmul.f32 %v4415_v35, %v3634_v21 }
0x1811   : > { %v3656_v28 = vmul.f32 %v3655_v36, %v3650_v22 }
0x1812   : > { %v4417_v43 = vpop.eup %4416 }
0x1813   : > { %v3662_v5 = vadd.f32 %v3661_v56, %v3656_v28  ;;  %v3651_v12 = vmul.f32 %v4417_v43, %v3635_v49 }
0x1815   : > { %3664 = vst.msk [vmem:[%s514_s24] sm:$0xff] %vm960_vm7, %v3662_v5  ;;  %v3657_v55 = vmul.f32 %v3655_v36, %v3651_v12 }
0x1817   : > { %v3663_v42 = vadd.f32 %v3661_v56, %v3657_v55 }
0x1819   : > { %3665 = vst.msk [vmem:[%s514_s24 + $0x8] sm:$0xff] %vm960_vm7, %v3663_v42 }
0x181a PF: > { %s25_s18 = sadd.s32 1, %s4426_s18  }
0x181b   : > { %p22_p4 = scmp.ge.s32.totalorder %s25_s18, 4  }
0x181d   :  { %24 = sbr.rel (!%p22_p4) target bundleno = 1 (0x1), region = 113 }

// kernel: point_vit_seg_forward.3
= control target key start
LH: loop header
LB: loop body
LE: loop exit
PB: predicated region body
PF: predicated region fallthrough
CT: control target
= control target key end

     0   :  { %s2118_s21 = smov 0   ;;  %s2426_s0 = inlined_call_operand.vmem [shape: bf16[2,32,16], index: 0, kind: input, shape index: {}]   ;;  %s2427_s1 = inlined_call_operand.vmem [shape: bf16[2,64,32], index: 1, kind: input, shape index: {}]   ;;  %s2428_s2 = inlined_call_operand.vmem [shape: f32[2,16,32], index: 2, kind: input, shape index: {}]   ;;  %s2429_s3 = inlined_call_operand.vmem [shape: f32[2,32,6], index: 3, kind: input, shape index: {}]   ;;  %s2430_s4 = inlined_call_operand.vmem [shape: f32[2,64,6], index: 4, kind: input, shape index: {}]   ;;  %s2431_s5 = inlined_call_operand.vmem [shape: bf16[38,24], index: 5, kind: input, shape index: {}]   ;;  %s2432_s6 = inlined_call_operand.vmem [shape: bf16[24,24], index: 6, kind: input, shape index: {}]   ;;  %s2433_s7 = inlined_call_operand.vmem [shape: bf16[30,32], index: 7, kind: input, shape index: {}]   ;;  %s2434_s8 = inlined_call_operand.vmem [shape: bf16[32,32], index: 8, kind: input, shape index: {}]   ;;  %s2435_s9 = inlined_call_operand.vmem [shape: bf16[32,32], index: 9, kind: input, shape index: {}]   ;;  %s2436_s10 = inlined_call_operand.vmem [shape: bf16[32,128], index: 10, kind: input, shape index: {}]   ;;  %s2437_s11 = inlined_call_operand.vmem [shape: f32[8,128], index: 11, kind: input, shape index: {}]   ;;  %s2438_s12 = inlined_call_operand.vmem [shape: f32[2,64,128], index: 12, kind: output, shape index: {}]  }
   0x1 LB: > { %s1720_s22 = sadd.s32 4294967295, %s2049_s21   ;;  %p1724_p0 = scmp.ge.s32.totalorder %s2049_s21, 1  ;;  %s2049_s21 = sphi %s2118_s21, %s22_s21  }
   0x2   : > { %p402_p1 = scmp.lt.s32.totalorder %s2049_s21, 3 }
   0x4   : > { %p403_p2 = pnand %p1724_p0, %p402_p1 }
   0x5   : > { %p464_p3 = scmp.lt.s32.totalorder (!%p403_p2), %s1720_s22, 1  ;;  %v1961_v0 = vld [vmem:[%s2431_s5] sm:$0xff] (!%p403_p2)   ;;  %vm513_vm0 = vcmask (!%p403_p2), 130048   ;;  %s2051_s23 = smov (!%p403_p2), 32   ;;  %v1962_v12 = vld [vmem:[%s2431_s5 + $0x8] sm:$0xff] (!%p403_p2)   ;;  %vm627_vm1 = vcmask (!%p403_p2), 1042432   ;;  %v601_v34 = vlaneseq (!%p403_p2) }
   0x6   : > { %406 = sbr.rel (%p403_p2) target bundleno = 1929 (0x789), region = 68  ;;  %1838 = vmatprep.subr.bf16.mxu1 (!%p403_p2), %v1961_v0  ;;  %v1963_v13 = vld [vmem:[%s2431_s5 + $0x10] ss:$0 sps:$4 sm:$0x77] (!%p403_p2)   ;;  %vm589_vm2 = vcmask (!%p403_p2), 261120   ;;  %vm620_vm3 = vcmask (!%p403_p2), 310272  }
   0x7   : > { %1839 = vmatpush3.bf16.msra.mxu1 (!%p403_p2), %v1961_v0  ;;  %v629_v14 = vsel (!%p403_p2), %vm627_vm1, %v1963_v13, 0  ;;  %v1964_v31 = vld [vmem:[%s2432_s6] sm:$0xff] (!%p403_p2)   ;;  %v1965_v32 = vld [vmem:[%s2432_s6 + $0x8] ss:$0 sps:$4 sm:$0xff] (!%p403_p2)   ;;  %vm741_vm4 = vcmask (!%p403_p2), 1043456   ;;  %v2165_v35 = vshrl.u32 (!%p403_p2), %v601_v34, 7 }
   0x8   : > { %1840 = vmatprep.subr.bf16.mxu1 (!%p403_p2), %v1962_v12  ;;  %v743_v33 = vsel (!%p403_p2), %vm741_vm4, %v1965_v32, 0  ;;  %v2171_v37 = vld [vmem:[%s2437_s11] sm:$0xff] (!%p403_p2)  ;;  %vm734_vm5 = vcmask (!%p403_p2), 195584   ;;  %vm1021_vm6 = vcmask (!%p403_p2), 1046528   ;;  %vm1008_vm7 = vcmask (!%p403_p2), 244736  }
   0x9   : > { %v603_v36 = vsub.s32 (!%p403_p2), 0, %v2165_v35  ;;  %v723_v34 = vsub.s32 (!%p403_p2), 1, %v2165_v35 }
   0xb   : > { %1841 = vmatpush3.bf16.msra.mxu1 (!%p403_p2), %v1962_v12  ;;  %v604_v38 = vrot.slane (!%p403_p2), %v2171_v37, %v603_v36  ;;  %v724_v36 = vrot.slane (!%p403_p2), %v2171_v37, %v723_v34 }
   0xc   : > { %1916 = vmatprep.subr.msk.bf16.mxu1 (!%p403_p2), %vm627_vm1, %v1963_v13 }
   0xd   : > { %s2440_s22 = smov (!%p464_p3, %s1720_s22), 1 }
   0xe   : > { %s1784_s25 = sshll.u32 %s2440_s22, 4  ;;  %s1785_s14 = sshll.u32 %s2440_s22, 5 }
   0xf   : > { %s468_s28 = scalar_lea.vmem %s2426_s0, %s1784_s25  ;;  %s478_s13 = scalar_lea.vmem %s2428_s2, %s1784_s25  ;;  %1843 = vmatpush3.bf16.msra.mxu1 %v629_v14 }
  0x10   : > { %v500_v1 = vld [vmem:[%s478_s13] sm:$0xff]  ;;  %v501_v2 = vld [vmem:[%s478_s13 + $0x8] sm:$0xff]  ;;  %s483_s17 = scalar_lea.vmem %s2429_s3, %s1785_s14  ;;  %s2146_s20 = scalar_lea.vmem %s2427_s1, %s1785_s14  ;;  %1848 = vmatprep.subr.bf16.mxu1 %v1964_v31 }
  0x11   : > { %v502_v3 = vpack.c.bf16 %v501_v2, %v500_v1  ;;  %v1959_v4 = vld [vmem:[%s468_s28] sm:$0xff]   ;;  %v1960_v5 = vld [vmem:[%s468_s28 + $0x8] sm:$0xff]   ;;  %v571_v8 = vld [vmem:[%s483_s17 + $0x10] sm:$0xff]  ;;  %s1788_s16 = sshll.u32 %s2440_s22, 6 }
  0x12   : > { %1834 = vmatprep.mubr.msk.bf16.mxu0 %vm513_vm0, %v1959_v4  ;;  %v569_v6 = vld [vmem:[%s483_s17] sm:$0xff]  ;;  %v570_v7 = vld [vmem:[%s483_s17 + $0x8] sm:$0xff]  ;;  %v572_v10 = vld [vmem:[%s483_s17 + $0x18] sm:$0xff]  ;;  %s488_s19 = scalar_lea.vmem %s2430_s4, %s1788_s16  ;;  %s493_s28 = scalar_lea.vmem %s2438_s12, %s1788_s16 }
  0x13   : > { %1832 = vmatprep.subr.bf16.mxu0 %v502_v3  ;;  %v1929_v9 = vpack.i.bf16 %v570_v7, %v569_v6  ;;  %v1934_v11 = vpack.i.bf16 %v572_v10, %v571_v8 }
  0x14   : > { %1833 = vmatpush3.bf16.msra.mxu0 %v502_v3 }
  0x15   : > { %1930 = vrot.lane.b32.xlu0 %v1929_v9, %s2051_s23 }
  0x17   : > { %1835 = vmatmul.mubr.msk.bf16.vlgmr.msra.gmra.mrb[0].mxu0 %vm513_vm0, %v1960_v5 }
  0x19   : > { %1935 = vrot.lane.b32.xlu0 %v1934_v11, %s2051_s23  ;;  %s2052_s23 = smov 24  }
  0x87   : > { %v1931_v15 = vpop.permute.xlu0 %1930 }
  0x88   : > { %v1932_v19 = vunpack.i.l.bf16 %v1931_v15  ;;  %v1933_v22 = vunpack.i.h.bf16 %v1931_v15 }
  0x8b   : > { %v1936_v16 = vpop.permute.xlu0 %1935 }
  0x8c   : > { %v1938_v17 = vunpack.i.h.bf16 %v1936_v16  ;;  %v1937_v18 = vunpack.i.l.bf16 %v1936_v16 }
  0xea   : > { %v1836_v20 = vpop.f32.mrb[0].mxu0 }
  0xeb   : > { %v554_v21 = vpop.f32.mrb[1].mxu0  ;;  %v592_v24 = vsel %vm589_vm2, %v1836_v20, %v1937_v18 }
  0xec   : > { %v1837_v23 = vpop.f32.mrb[2].mxu0  ;;  %v590_v27 = vsel %vm589_vm2, %v554_v21, %v1932_v19  ;;  %v1966_v21 = vld [vmem:[%s2146_s20] sm:$0xff]  }
  0xed   : > { %v593_v25 = vsel %vm589_vm2, %v1837_v23, %v1938_v17  ;;  %v557_v26 = vpop.f32.mrb[3].mxu0  ;;  %1860 = vmatprep.mubr.msk.bf16.mxu0 %vm589_vm2, %v1966_v21  ;;  %v938_v23 = vld [vmem:[%s488_s19 + $0x8] sm:$0xff]  ;;  %v1968_v21 = vld [vmem:[%s2146_s20 + $0x10] sm:$0xff]  }
  0xee   : > { %v595_v28 = vpack.c.bf16 %v593_v25, %v592_v24  ;;  %v591_v29 = vsel %vm589_vm2, %v557_v26, %v1933_v22  ;;  %v937_v22 = vld [vmem:[%s488_s19] sm:$0xff]  ;;  %v939_v24 = vld [vmem:[%s488_s19 + $0x10] sm:$0xff]  ;;  %v940_v26 = vld [vmem:[%s488_s19 + $0x18] sm:$0xff] }
  0xef   : > { %v594_v30 = vpack.c.bf16 %v591_v29, %v590_v27  ;;  %v1939_v25 = vpack.i.bf16 %v938_v23, %v937_v22  ;;  %v941_v27 = vld [vmem:[%s488_s19 + $0x20] sm:$0xff]  ;;  %v1944_v29 = vpack.i.bf16 %v940_v26, %v939_v24  ;;  %v1969_v22 = vld [vmem:[%s2146_s20 + $0x18] sm:$0xff]   ;;  %v1971_v24 = vld [vmem:[%s2433_s7 + $0x8] sm:$0x7f]  }
  0xf0   : > { %v1970_v23 = vld [vmem:[%s2433_s7] sm:$0xff]  }
  0xf1   : > { %1844 = vmatprep.mubr.msk.bf16.mxu1 %vm620_vm3, %v594_v30  ;;  %1940 = vrot.lane.b32.xlu1 %v1939_v25, %s2052_s23  ;;  %v1023_v25 = vsel %vm1021_vm6, %v1971_v24, 0 }
  0xf2   : > { %1845 = vmatmul.mubr.msk.bf16.vlgmr.msra.gmra.mrb[0].mxu1 %vm620_vm3, %v595_v28  ;;  %v942_v28 = vld [vmem:[%s488_s19 + $0x28] sm:$0xff] }
  0xf3   : > { %1849 = vmatpush3.bf16.msra.mxu1 %v1964_v31  ;;  %v1949_v30 = vpack.i.bf16 %v942_v28, %v941_v27  ;;  %v943_v31 = vld [vmem:[%s488_s19 + $0x30] sm:$0xff] }
  0xf4   : > { %1917 = vmatprep.subr.msk.bf16.mxu1 %vm741_vm4, %v1965_v32  ;;  %v944_v32 = vld [vmem:[%s488_s19 + $0x38] sm:$0xff] }
  0xf5   : > { %1950 = vrot.lane.b32.xlu0 %v1949_v30, %s2052_s23  ;;  %1945 = vrot.lane.b32.xlu1 %v1944_v29, %s2052_s23 }
  0xf7   : > { %1851 = vmatpush3.bf16.msra.mxu1 %v743_v33  ;;  %v1954_v33 = vpack.i.bf16 %v944_v32, %v943_v31 }
  0xf8   : > { %1868 = vmatprep.subr.bf16.mxu1 %v1970_v23 }
  0xf9   : > { %1955 = vrot.lane.b32.xlu1 %v1954_v33, %s2052_s23 }
 0x163   : > { %v1941_v26 = vpop.permute.xlu1 %1940 }
 0x164   : > { %v1942_v30 = vunpack.i.l.bf16 %v1941_v26  ;;  %v1943_v33 = vunpack.i.h.bf16 %v1941_v26 }
 0x167   : > { %v1946_v27 = vpop.permute.xlu1 %1945 }
 0x168   : > { %v1948_v28 = vunpack.i.h.bf16 %v1946_v27  ;;  %v1947_v29 = vunpack.i.l.bf16 %v1946_v27 }
 0x1c5   : > { %v1846_v39 = vpop.f32.mrb[0].mxu1 }
 0x1c6   : > { %v674_v40 = vadd.f32 %v1846_v39, %v604_v38  ;;  %v665_v41 = vpop.f32.mrb[1].mxu1 }
 0x1c7   : > { %v666_v42 = vadd.f32 %v665_v41, %v604_v38  ;;  %v1847_v43 = vpop.f32.mrb[2].mxu1 }
 0x1c8   : > { %v682_v44 = vmul.f32 %v674_v40, %v674_v40  ;;  %v677_v45 = vadd.f32 %v1847_v43, %v604_v38  ;;  %v668_v46 = vpop.f32.mrb[3].mxu1 }
 0x1c9   : > { %v680_v47 = vmul.f32 %v666_v42, %v666_v42  ;;  %v669_v48 = vadd.f32 %v668_v46, %v604_v38 }
 0x1ca   : > { %v686_v49 = vmul.f32 %v682_v44, %v674_v40  ;;  %v683_v50 = vmul.f32 %v677_v45, %v677_v45 }
 0x1cb   : > { %v684_v51 = vmul.f32 %v680_v47, %v666_v42  ;;  %v681_v52 = vmul.f32 %v669_v48, %v669_v48 }
 0x1cc   : > { %v690_v53 = vmul.f32 0.044715, %v686_v49  ;;  %v687_v54 = vmul.f32 %v683_v50, %v677_v45 }
 0x1cd   : > { %v688_v55 = vmul.f32 0.044715, %v684_v51  ;;  %v685_v56 = vmul.f32 %v681_v52, %v669_v48 }
 0x1ce   : > { %v694_v57 = vadd.f32 %v690_v53, %v674_v40  ;;  %v691_v58 = vmul.f32 0.044715, %v687_v54 }
 0x1cf   : > { %v692_v59 = vadd.f32 %v688_v55, %v666_v42  ;;  %v689_v60 = vmul.f32 0.044715, %v685_v56 }
 0x1d0   : > { %v698_v61 = vmul.f32 0.7978846, %v694_v57  ;;  %v695_v62 = vadd.f32 %v691_v58, %v677_v45 }
 0x1d1   : > { %v696_v63 = vmul.f32 0.7978846, %v692_v59  ;;  %v693_v0 = vadd.f32 %v689_v60, %v669_v48 }
 0x1d2   : > { %1978 = vtanh.f32 %v698_v61  ;;  %v699_v1 = vmul.f32 0.7978846, %v695_v62 }
 0x1d3   : > { %1980 = vtanh.f32 %v696_v63  ;;  %v697_v2 = vmul.f32 0.7978846, %v693_v0 }
 0x1d4   : > { %1982 = vtanh.f32 %v699_v1 }
 0x1d5   : > { %1984 = vtanh.f32 %v697_v2 }
 0x1dc   : > { %v1979_v3 = vpop.eup %1978 }
 0x1dd   : > { %v1981_v4 = vpop.eup %1980  ;;  %v706_v5 = vadd.f32 1.0, %v1979_v3 }
 0x1de   : > { %v1983_v6 = vpop.eup %1982  ;;  %v704_v7 = vadd.f32 1.0, %v1981_v4 }
 0x1df   : > { %v1985_v8 = vpop.eup %1984  ;;  %v710_v9 = vmul.f32 0.5, %v706_v5  ;;  %v707_v10 = vadd.f32 1.0, %v1983_v6 }
 0x1e0   : > { %v708_v11 = vmul.f32 0.5, %v704_v7  ;;  %v705_v12 = vadd.f32 1.0, %v1985_v8 }
 0x1e1   : > { %v711_v13 = vmul.f32 0.5, %v707_v10  ;;  %v714_v15 = vmul.f32 %v710_v9, %v674_v40 }
 0x1e2   : > { %v709_v14 = vmul.f32 0.5, %v705_v12  ;;  %v712_v17 = vmul.f32 %v708_v11, %v666_v42 }
 0x1e3   : > { %v715_v16 = vmul.f32 %v711_v13, %v677_v45 }
 0x1e4   : > { %v713_v18 = vmul.f32 %v709_v14, %v669_v48 }
 0x1e5   : > { %v717_v19 = vpack.c.bf16 %v715_v16, %v714_v15 }
 0x1e6   : > { %v716_v20 = vpack.c.bf16 %v713_v18, %v712_v17 }
 0x1e8   : > { %1852 = vmatprep.mubr.msk.bf16.mxu1 %vm734_vm5, %v716_v20  ;;  %v1967_v20 = vld [vmem:[%s2146_s20 + $0x8] sm:$0xff]  }
 0x1e9   : > { %1853 = vmatmul.mubr.msk.bf16.vlgmr.msra.gmra.mrb[4].mxu1 %vm734_vm5, %v717_v19 }
 0x1ea   : > { %1869 = vmatpush3.bf16.msra.mxu1 %v1970_v23 }
 0x1eb   : > { %1918 = vmatprep.subr.msk.bf16.mxu1 %vm1021_vm6, %v1971_v24 }
 0x1ee   : > { %1871 = vmatpush3.bf16.msra.mxu1 %v1023_v25 }
 0x2bc   : > { %v1854_v38 = vpop.f32.mrb[4].mxu1 }
 0x2bd   : > { %v788_v39 = vadd.f32 %v1854_v38, %v724_v36  ;;  %v779_v40 = vpop.f32.mrb[5].mxu1 }
 0x2be   : > { %v780_v41 = vadd.f32 %v779_v40, %v724_v36  ;;  %v1855_v42 = vpop.f32.mrb[6].mxu1 }
 0x2bf   : > { %v796_v43 = vmul.f32 %v788_v39, %v788_v39  ;;  %v791_v44 = vadd.f32 %v1855_v42, %v724_v36  ;;  %v782_v45 = vpop.f32.mrb[7].mxu1 }
 0x2c0   : > { %v794_v46 = vmul.f32 %v780_v41, %v780_v41  ;;  %v783_v47 = vadd.f32 %v782_v45, %v724_v36  ;;  %v1951_v45 = vpop.permute.xlu0 %1950 }
 0x2c1   : > { %v800_v48 = vmul.f32 %v796_v43, %v788_v39  ;;  %v797_v49 = vmul.f32 %v791_v44, %v791_v44  ;;  %v1956_v43 = vpop.permute.xlu1 %1955 }
 0x2c2   : > { %v798_v50 = vmul.f32 %v794_v46, %v780_v41  ;;  %v795_v51 = vmul.f32 %v783_v47, %v783_v47  ;;  %v1958_v46 = vunpack.i.h.bf16 %v1956_v43 }
 0x2c3   : > { %v804_v52 = vmul.f32 0.044715, %v800_v48  ;;  %v801_v53 = vmul.f32 %v797_v49, %v791_v44  ;;  %v1953_v48 = vunpack.i.h.bf16 %v1951_v45  ;;  %v1952_v49 = vunpack.i.l.bf16 %v1951_v45 }
 0x2c4   : > { %v802_v54 = vmul.f32 0.044715, %v798_v50  ;;  %v799_v55 = vmul.f32 %v795_v51, %v783_v47 }
 0x2c5   : > { %v808_v56 = vadd.f32 %v804_v52, %v788_v39  ;;  %v805_v57 = vmul.f32 0.044715, %v801_v53 }
 0x2c6   : > { %v806_v58 = vadd.f32 %v802_v54, %v780_v41  ;;  %v803_v59 = vmul.f32 0.044715, %v799_v55 }
 0x2c7   : > { %v812_v60 = vmul.f32 0.7978846, %v808_v56  ;;  %v809_v61 = vadd.f32 %v805_v57, %v791_v44 }
 0x2c8   : > { %v810_v62 = vmul.f32 0.7978846, %v806_v58  ;;  %v807_v63 = vadd.f32 %v803_v59, %v783_v47 }
 0x2c9   : > { %1986 = vtanh.f32 %v812_v60  ;;  %v813_v0 = vmul.f32 0.7978846, %v809_v61  ;;  %v1972_v60 = vld [vmem:[%s2434_s8] sm:$0xff]   ;;  %v1973_v61 = vld [vmem:[%s2434_s8 + $0x8] sm:$0xff]  }
 0x2ca   : > { %1988 = vtanh.f32 %v810_v62  ;;  %v811_v1 = vmul.f32 0.7978846, %v807_v63  ;;  %v995_v62 = vsub.s32 2, %v2165_v35 }
 0x2cb   : > { %1990 = vtanh.f32 %v813_v0 }
 0x2cc   : > { %1992 = vtanh.f32 %v811_v1  ;;  %v996_v63 = vrot.slane %v2171_v37, %v995_v62 }
 0x2d3   : > { %v1987_v2 = vpop.eup %1986 }
 0x2d4   : > { %v1989_v3 = vpop.eup %1988  ;;  %v820_v4 = vadd.f32 1.0, %v1987_v2 }
 0x2d5   : > { %v1991_v5 = vpop.eup %1990  ;;  %v818_v6 = vadd.f32 1.0, %v1989_v3 }
 0x2d6   : > { %v1993_v7 = vpop.eup %1992  ;;  %v821_v8 = vadd.f32 1.0, %v1991_v5  ;;  %v824_v9 = vmul.f32 0.5, %v820_v4 }
 0x2d7   : > { %v819_v10 = vadd.f32 1.0, %v1993_v7  ;;  %v822_v11 = vmul.f32 0.5, %v818_v6 }
 0x2d8   : > { %v825_v12 = vmul.f32 0.5, %v821_v8  ;;  %v828_v14 = vmul.f32 %v824_v9, %v788_v39 }
 0x2d9   : > { %v823_v13 = vmul.f32 0.5, %v819_v10  ;;  %v826_v16 = vmul.f32 %v822_v11, %v780_v41 }
 0x2da   : > { %v829_v15 = vmul.f32 %v825_v12, %v791_v44 }
 0x2db   : > { %v827_v17 = vmul.f32 %v823_v13, %v783_v47  ;;  %v1957_v47 = vunpack.i.l.bf16 %v1956_v43 }
 0x2dc   : > { %v839_v18 = vpack.c.bf16 %v829_v15, %v828_v14 }
 0x2dd   : > { %v838_v19 = vpack.c.bf16 %v827_v17, %v826_v16 }
 0x2df   : > { %1856 = vmatprep.subr.bf16.mxu0 %v838_v19 }
 0x2e0   : > { %1857 = vmatpush3.bf16.msra.mxu0 %v838_v19 }
 0x2e1   : > { %1858 = vmatprep.subr.bf16.mxu0 %v839_v18 }
 0x2e4   : > { %1859 = vmatpush3.bf16.msra.mxu0 %v839_v18 }
 0x2e5   : > { %1880 = vmatprep.subr.bf16.mxu0 %v1972_v60 }
 0x2e7   : > { %1861 = vmatmul.mubr.msk.bf16.vlgmr.msra.gmra.mrb[4].mxu0 %vm589_vm2, %v1967_v20 }
 0x2e8   : > { %1864 = vmatprep.mubr.msk.bf16.mxu0 %vm589_vm2, %v1968_v21  ;;  %1881 = vmatpush3.bf16.msra.mxu0 %v1972_v60 }
 0x2e9   : > { %1882 = vmatprep.subr.bf16.mxu0 %v1973_v61 }
 0x2ec   : > { %1883 = vmatpush3.bf16.msra.mxu0 %v1973_v61 }
 0x2ef   : > { %1865 = vmatmul.mubr.msk.bf16.gmra.mrb[8].mxu0 %vm589_vm2, %v1969_v22 }
 0x3ba   : > { %v1862_v31 = vpop.f32.mrb[4].mxu0 }
 0x3bb   : > { %v906_v32 = vpop.f32.mrb[5].mxu0  ;;  %v979_v36 = vsel %vm734_vm5, %v1862_v31, %v1947_v29 }
 0x3bc   : > { %v1863_v34 = vpop.f32.mrb[6].mxu0  ;;  %v977_v40 = vsel %vm734_vm5, %v906_v32, %v1942_v30 }
 0x3bd   : > { %v980_v38 = vsel %vm734_vm5, %v1863_v34, %v1948_v28  ;;  %v909_v39 = vpop.f32.mrb[7].mxu0 }
 0x3be   : > { %v986_v41 = vpack.c.bf16 %v980_v38, %v979_v36  ;;  %v978_v42 = vsel %vm734_vm5, %v909_v39, %v1943_v33 }
 0x3bf   : > { %v985_v44 = vpack.c.bf16 %v978_v42, %v977_v40 }
 0x3c1   : > { %1872 = vmatprep.mubr.msk.bf16.mxu1 %vm1008_vm7, %v985_v44 }
 0x3c2   : > { %v1866_v50 = vpop.f32.mrb[8].mxu0  ;;  %1873 = vmatmul.mubr.msk.bf16.vlgmr.msra.gmra.mrb[8].mxu1 %vm1008_vm7, %v986_v41 }
 0x3c3   : > { %v922_v51 = vpop.f32.mrb[9].mxu0  ;;  %v983_v53 = vsel %vm734_vm5, %v1866_v50, %v1957_v47 }
 0x3c4   : > { %v1867_v52 = vpop.f32.mrb[10].mxu0  ;;  %v981_v56 = vsel %vm734_vm5, %v922_v51, %v1952_v49 }
 0x3c5   : > { %v984_v54 = vsel %vm734_vm5, %v1867_v52, %v1958_v46  ;;  %v925_v55 = vpop.f32.mrb[11].mxu0 }
 0x3c6   : > { %v988_v57 = vpack.c.bf16 %v984_v54, %v983_v53  ;;  %v982_v58 = vsel %vm734_vm5, %v925_v55, %v1953_v48 }
 0x3c7   : > { %v987_v59 = vpack.c.bf16 %v982_v58, %v981_v56 }
 0x3c9   : > { %1876 = vmatprep.mubr.msk.bf16.mxu1 %vm1008_vm7, %v987_v59 }
 0x3ca   : > { %1877 = vmatmul.mubr.msk.bf16.gmra.mrb[12].mxu1 %vm1008_vm7, %v988_v57 }
 0x495   : > { %v1874_v0 = vpop.f32.mrb[8].mxu1 }
 0x496   : > { %v2218_v1 = vadd.f32 %v1874_v0, %v996_v63  ;;  %v1059_v2 = vpop.f32.mrb[9].mxu1 }
 0x497   : > { %v2220_v3 = vadd.f32 %v1059_v2, %v996_v63  ;;  %v1875_v4 = vpop.f32.mrb[10].mxu1 }
 0x498   : > { %v1092_v5 = vmul.f32 %v2218_v1, %v2218_v1  ;;  %v2224_v6 = vadd.f32 %v1875_v4, %v996_v63  ;;  %v1062_v7 = vpop.f32.mrb[11].mxu1 }
 0x499   : > { %v1090_v8 = vmul.f32 %v2220_v3, %v2220_v3  ;;  %v2228_v9 = vadd.f32 %v1062_v7, %v996_v63 }
 0x49a   : > { %v1100_v10 = vmul.f32 %v1092_v5, %v2218_v1  ;;  %v1093_v11 = vmul.f32 %v2224_v6, %v2224_v6 }
 0x49b   : > { %v1098_v12 = vmul.f32 %v1090_v8, %v2220_v3  ;;  %v1091_v13 = vmul.f32 %v2228_v9, %v2228_v9 }
 0x49c   : > { %v1108_v14 = vmul.f32 0.044715, %v1100_v10  ;;  %v1101_v15 = vmul.f32 %v1093_v11, %v2224_v6 }
 0x49d   : > { %v1106_v16 = vmul.f32 0.044715, %v1098_v12  ;;  %v1099_v17 = vmul.f32 %v1091_v13, %v2228_v9  ;;  %v1878_v18 = vpop.f32.mrb[12].mxu1 }
 0x49e   : > { %v1116_v19 = vadd.f32 %v1108_v14, %v2218_v1  ;;  %v1109_v20 = vmul.f32 0.044715, %v1101_v15  ;;  %v2239_v21 = vadd.f32 %v1878_v18, %v996_v63  ;;  %v1075_v22 = vpop.f32.mrb[13].mxu1 }
 0x49f   : > { %v1114_v23 = vadd.f32 %v1106_v16, %v2220_v3  ;;  %v1107_v24 = vmul.f32 0.044715, %v1099_v17  ;;  %v2242_v25 = vadd.f32 %v1075_v22, %v996_v63  ;;  %v1879_v26 = vpop.f32.mrb[14].mxu1 }
 0x4a0   : > { %v1124_v27 = vmul.f32 0.7978846, %v1116_v19  ;;  %v1117_v28 = vadd.f32 %v1109_v20, %v2224_v6  ;;  %v1096_v29 = vmul.f32 %v2239_v21, %v2239_v21  ;;  %v2247_v30 = vadd.f32 %v1879_v26, %v996_v63  ;;  %v1078_v31 = vpop.f32.mrb[15].mxu1 }
 0x4a1   : > { %v1122_v32 = vmul.f32 0.7978846, %v1114_v23  ;;  %v1115_v33 = vadd.f32 %v1107_v24, %v2228_v9  ;;  %v1094_v34 = vmul.f32 %v2242_v25, %v2242_v25  ;;  %v2252_v36 = vadd.f32 %v1078_v31, %v996_v63 }
 0x4a2   : > { %1994 = vtanh.f32 %v1124_v27  ;;  %v1125_v38 = vmul.f32 0.7978846, %v1117_v28  ;;  %v1104_v39 = vmul.f32 %v1096_v29, %v2239_v21  ;;  %v1097_v40 = vmul.f32 %v2247_v30, %v2247_v30 }
 0x4a3   : > { %1996 = vtanh.f32 %v1122_v32  ;;  %v1123_v41 = vmul.f32 0.7978846, %v1115_v33  ;;  %v1102_v42 = vmul.f32 %v1094_v34, %v2242_v25  ;;  %v1095_v43 = vmul.f32 %v2252_v36, %v2252_v36  ;;  %v1974_v33 = vld [vmem:[%s2435_s9] sm:$0xff]  }
 0x4a4   : > { %1998 = vtanh.f32 %v1125_v38  ;;  %v1112_v44 = vmul.f32 0.044715, %v1104_v39  ;;  %v1105_v45 = vmul.f32 %v1097_v40, %v2247_v30  ;;  %1892 = vmatprep.subr.bf16.mxu1 %v1974_v33 }
 0x4a5   : > { %2000 = vtanh.f32 %v1123_v41  ;;  %v1110_v46 = vmul.f32 0.044715, %v1102_v42  ;;  %v1103_v47 = vmul.f32 %v1095_v43, %v2252_v36  ;;  %1893 = vmatpush3.bf16.msra.mxu1 %v1974_v33 }
 0x4a6   : > { %v1120_v48 = vadd.f32 %v1112_v44, %v2239_v21  ;;  %v1113_v49 = vmul.f32 0.044715, %v1105_v45 }
 0x4a7   : > { %v1118_v50 = vadd.f32 %v1110_v46, %v2242_v25  ;;  %v1111_v51 = vmul.f32 0.044715, %v1103_v47 }
 0x4a8   : > { %v1128_v52 = vmul.f32 0.7978846, %v1120_v48  ;;  %v1121_v53 = vadd.f32 %v1113_v49, %v2247_v30 }
 0x4a9   : > { %v1126_v54 = vmul.f32 0.7978846, %v1118_v50  ;;  %v1119_v55 = vadd.f32 %v1111_v51, %v2252_v36 }
 0x4aa   : > { %2002 = vtanh.f32 %v1128_v52  ;;  %v1129_v56 = vmul.f32 0.7978846, %v1121_v53 }
 0x4ab   : > { %2004 = vtanh.f32 %v1126_v54  ;;  %v1127_v57 = vmul.f32 0.7978846, %v1119_v55 }
 0x4ac   : > { %v1995_v58 = vpop.eup %1994  ;;  %2006 = vtanh.f32 %v1129_v56 }
 0x4ad   : > { %v1997_v59 = vpop.eup %1996  ;;  %v1140_v60 = vadd.f32 1.0, %v1995_v58  ;;  %2008 = vtanh.f32 %v1127_v57 }
 0x4ae   : > { %v1999_v61 = vpop.eup %1998  ;;  %v1138_v62 = vadd.f32 1.0, %v1997_v59 }
 0x4af   : > { %v2001_v63 = vpop.eup %2000  ;;  %v1148_v0 = vmul.f32 0.5, %v1140_v60  ;;  %v1141_v2 = vadd.f32 1.0, %v1999_v61 }
 0x4b0   : > { %v1146_v4 = vmul.f32 0.5, %v1138_v62  ;;  %v1139_v5 = vadd.f32 1.0, %v2001_v63 }
 0x4b1   : > { %v1149_v7 = vmul.f32 0.5, %v1141_v2  ;;  %v1156_v10 = vmul.f32 %v1148_v0, %v2218_v1 }
 0x4b2   : > { %v1147_v8 = vmul.f32 0.5, %v1139_v5  ;;  %v1154_v13 = vmul.f32 %v1146_v4, %v2220_v3 }
 0x4b3   : > { %v1157_v11 = vmul.f32 %v1149_v7, %v2224_v6 }
 0x4b4   : > { %v2003_v12 = vpop.eup %2002  ;;  %v1155_v14 = vmul.f32 %v1147_v8, %v2228_v9 }
 0x4b5   : > { %v2005_v15 = vpop.eup %2004  ;;  %v1163_v16 = vpack.c.bf16 %v1157_v11, %v1156_v10  ;;  %v1144_v17 = vadd.f32 1.0, %v2003_v12 }
 0x4b6   : > { %v2007_v18 = vpop.eup %2006  ;;  %v1142_v19 = vadd.f32 1.0, %v2005_v15  ;;  %v1162_v20 = vpack.c.bf16 %v1155_v14, %v1154_v13 }
 0x4b7   : > { %v2009_v22 = vpop.eup %2008  ;;  %v1152_v23 = vmul.f32 0.5, %v1144_v17  ;;  %v1145_v24 = vadd.f32 1.0, %v2007_v18 }
 0x4b8   : > { %v1150_v26 = vmul.f32 0.5, %v1142_v19  ;;  %v1143_v27 = vadd.f32 1.0, %v2009_v22  ;;  %1884 = vmatprep.mubr.msk.bf16.mxu0 %vm589_vm2, %v1162_v20 }
 0x4b9   : > { %v1153_v1 = vmul.f32 0.5, %v1145_v24  ;;  %1885 = vmatmul.mubr.msk.bf16.vlgmr.msra.gmra.mrb[12].mxu0 %vm589_vm2, %v1163_v16  ;;  %v1160_v3 = vmul.f32 %v1152_v23, %v2239_v21  ;;  %v1975_v21 = vld [vmem:[%s2435_s9 + $0x8] sm:$0xff]  }
 0x4ba   : > { %v1151_v6 = vmul.f32 0.5, %v1143_v27  ;;  %v1158_v28 = vmul.f32 %v1150_v26, %v2242_v25  ;;  %1894 = vmatprep.subr.bf16.mxu1 %v1975_v21  ;;  %v1172_v25 = vsub.s32 3, %v2165_v35 }
 0x4bb   : > { %v1161_v9 = vmul.f32 %v1153_v1, %v2247_v30  ;;  %1895 = vmatpush3.bf16.msra.mxu1 %v1975_v21 }
 0x4bc   : > { %v1159_v29 = vmul.f32 %v1151_v6, %v2252_v36  ;;  %v1173_v30 = vrot.slane %v2171_v37, %v1172_v25 }
 0x4bd   : > { %v1165_v31 = vpack.c.bf16 %v1161_v9, %v1160_v3 }
 0x4be   : > { %v1164_v32 = vpack.c.bf16 %v1159_v29, %v1158_v28 }
 0x4c0   : > { %1888 = vmatprep.mubr.msk.bf16.mxu0 %vm589_vm2, %v1164_v32 }
 0x4c1   : > { %1889 = vmatmul.mubr.msk.bf16.gmra.mrb[16].mxu0 %vm589_vm2, %v1165_v31 }
 0x58c   : > { %v1886_v34 = vpop.f32.mrb[12].mxu0 }
 0x58d   : > { %v2286_v36 = vadd.f32 %v1886_v34, %v1173_v30  ;;  %v1232_v38 = vpop.f32.mrb[13].mxu0 }
 0x58e   : > { %v2288_v39 = vadd.f32 %v1232_v38, %v1173_v30  ;;  %v1887_v40 = vpop.f32.mrb[14].mxu0 }
 0x58f   : > { %v1265_v41 = vmul.f32 %v2286_v36, %v2286_v36  ;;  %v2292_v42 = vadd.f32 %v1887_v40, %v1173_v30  ;;  %v1235_v43 = vpop.f32.mrb[15].mxu0 }
 0x590   : > { %v1263_v44 = vmul.f32 %v2288_v39, %v2288_v39  ;;  %v2296_v45 = vadd.f32 %v1235_v43, %v1173_v30 }
 0x591   : > { %v1273_v46 = vmul.f32 %v1265_v41, %v2286_v36  ;;  %v1266_v47 = vmul.f32 %v2292_v42, %v2292_v42 }
 0x592   : > { %v1271_v48 = vmul.f32 %v1263_v44, %v2288_v39  ;;  %v1264_v49 = vmul.f32 %v2296_v45, %v2296_v45 }
 0x593   : > { %v1281_v50 = vmul.f32 0.044715, %v1273_v46  ;;  %v1274_v51 = vmul.f32 %v1266_v47, %v2292_v42 }
 0x594   : > { %v1279_v52 = vmul.f32 0.044715, %v1271_v48  ;;  %v1272_v53 = vmul.f32 %v1264_v49, %v2296_v45  ;;  %v1890_v54 = vpop.f32.mrb[16].mxu0 }
 0x595   : > { %v1289_v55 = vadd.f32 %v1281_v50, %v2286_v36  ;;  %v1282_v56 = vmul.f32 0.044715, %v1274_v51  ;;  %v2307_v57 = vadd.f32 %v1890_v54, %v1173_v30  ;;  %v1248_v58 = vpop.f32.mrb[17].mxu0 }
 0x596   : > { %v1287_v59 = vadd.f32 %v1279_v52, %v2288_v39  ;;  %v1280_v60 = vmul.f32 0.044715, %v1272_v53  ;;  %v2310_v61 = vadd.f32 %v1248_v58, %v1173_v30  ;;  %v1891_v62 = vpop.f32.mrb[18].mxu0 }
 0x597   : > { %v1297_v63 = vmul.f32 0.7978846, %v1289_v55  ;;  %v1290_v0 = vadd.f32 %v1282_v56, %v2292_v42  ;;  %v1269_v2 = vmul.f32 %v2307_v57, %v2307_v57  ;;  %v2315_v4 = vadd.f32 %v1891_v62, %v1173_v30  ;;  %v1251_v5 = vpop.f32.mrb[19].mxu0 }
 0x598   : > { %v1295_v7 = vmul.f32 0.7978846, %v1287_v59  ;;  %v1288_v8 = vadd.f32 %v1280_v60, %v2296_v45  ;;  %v1267_v10 = vmul.f32 %v2310_v61, %v2310_v61  ;;  %v2320_v11 = vadd.f32 %v1251_v5, %v1173_v30 }
 0x599   : > { %2010 = vtanh.f32 %v1297_v63  ;;  %v1298_v12 = vmul.f32 0.7978846, %v1290_v0  ;;  %v1277_v13 = vmul.f32 %v1269_v2, %v2307_v57  ;;  %v1270_v14 = vmul.f32 %v2315_v4, %v2315_v4 }
 0x59a   : > { %2012 = vtanh.f32 %v1295_v7  ;;  %v1296_v15 = vmul.f32 0.7978846, %v1288_v8  ;;  %v1275_v16 = vmul.f32 %v1267_v10, %v2310_v61  ;;  %v1268_v17 = vmul.f32 %v2320_v11, %v2320_v11  ;;  %v1976_v8 = vld [vmem:[%s2436_s10] sm:$0xff]  }
 0x59b   : > { %2014 = vtanh.f32 %v1298_v12  ;;  %v1285_v18 = vmul.f32 0.044715, %v1277_v13  ;;  %v1278_v19 = vmul.f32 %v1270_v14, %v2315_v4  ;;  %1904 = vmatprep.subr.bf16.mxu0 %v1976_v8 }
 0x59c   : > { %2016 = vtanh.f32 %v1296_v15  ;;  %v1283_v20 = vmul.f32 0.044715, %v1275_v16  ;;  %v1276_v22 = vmul.f32 %v1268_v17, %v2320_v11  ;;  %1905 = vmatpush3.bf16.msra.mxu0 %v1976_v8 }
 0x59d   : > { %v1293_v23 = vadd.f32 %v1285_v18, %v2307_v57  ;;  %v1286_v24 = vmul.f32 0.044715, %v1278_v19 }
 0x59e   : > { %v1291_v26 = vadd.f32 %v1283_v20, %v2310_v61  ;;  %v1284_v27 = vmul.f32 0.044715, %v1276_v22 }
 0x59f   : > { %v1301_v1 = vmul.f32 0.7978846, %v1293_v23  ;;  %v1294_v6 = vadd.f32 %v1286_v24, %v2315_v4 }
 0x5a0   : > { %v1299_v3 = vmul.f32 0.7978846, %v1291_v26  ;;  %v1292_v9 = vadd.f32 %v1284_v27, %v2320_v11 }
 0x5a1   : > { %2018 = vtanh.f32 %v1301_v1  ;;  %v1302_v28 = vmul.f32 0.7978846, %v1294_v6 }
 0x5a2   : > { %2020 = vtanh.f32 %v1299_v3  ;;  %v1300_v29 = vmul.f32 0.7978846, %v1292_v9 }
 0x5a3   : > { %v2011_v31 = vpop.eup %2010  ;;  %2022 = vtanh.f32 %v1302_v28 }
 0x5a4   : > { %v2013_v32 = vpop.eup %2012  ;;  %v1313_v33 = vadd.f32 1.0, %v2011_v31  ;;  %2024 = vtanh.f32 %v1300_v29 }
 0x5a5   : > { %v2015_v21 = vpop.eup %2014  ;;  %v1311_v25 = vadd.f32 1.0, %v2013_v32 }
 0x5a6   : > { %v2017_v30 = vpop.eup %2016  ;;  %v1321_v34 = vmul.f32 0.5, %v1313_v33  ;;  %v1314_v38 = vadd.f32 1.0, %v2015_v21 }
 0x5a7   : > { %v1319_v40 = vmul.f32 0.5, %v1311_v25  ;;  %v1312_v41 = vadd.f32 1.0, %v2017_v30 }
 0x5a8   : > { %v1322_v43 = vmul.f32 0.5, %v1314_v38  ;;  %v1329_v46 = vmul.f32 %v1321_v34, %v2286_v36 }
 0x5a9   : > { %v1320_v44 = vmul.f32 0.5, %v1312_v41  ;;  %v1327_v49 = vmul.f32 %v1319_v40, %v2288_v39 }
 0x5aa   : > { %v1330_v47 = vmul.f32 %v1322_v43, %v2292_v42 }
 0x5ab   : > { %v2019_v48 = vpop.eup %2018  ;;  %v1328_v50 = vmul.f32 %v1320_v44, %v2296_v45 }
 0x5ac   : > { %v2021_v51 = vpop.eup %2020  ;;  %v1336_v52 = vpack.c.bf16 %v1330_v47, %v1329_v46  ;;  %v1317_v53 = vadd.f32 1.0, %v2019_v48 }
 0x5ad   : > { %v2023_v54 = vpop.eup %2022  ;;  %v1315_v55 = vadd.f32 1.0, %v2021_v51  ;;  %v1335_v56 = vpack.c.bf16 %v1328_v50, %v1327_v49 }
 0x5ae   : > { %v2025_v58 = vpop.eup %2024  ;;  %v1325_v59 = vmul.f32 0.5, %v1317_v53  ;;  %v1318_v60 = vadd.f32 1.0, %v2023_v54 }
 0x5af   : > { %v1323_v62 = vmul.f32 0.5, %v1315_v55  ;;  %v1316_v63 = vadd.f32 1.0, %v2025_v58  ;;  %1896 = vmatprep.mubr.msk.bf16.mxu1 %vm589_vm2, %v1335_v56 }
 0x5b0   : > { %v1326_v36 = vmul.f32 0.5, %v1318_v60  ;;  %1897 = vmatmul.mubr.msk.bf16.vlgmr.msra.gmra.mrb[16].mxu1 %vm589_vm2, %v1336_v52  ;;  %v1333_v39 = vmul.f32 %v1325_v59, %v2307_v57  ;;  %v1977_v57 = vld [vmem:[%s2436_s10 + $0x8] sm:$0xff]  }
 0x5b1   : > { %v1324_v42 = vmul.f32 0.5, %v1316_v63  ;;  %v1331_v0 = vmul.f32 %v1323_v62, %v2310_v61  ;;  %1906 = vmatprep.subr.bf16.mxu0 %v1977_v57  ;;  %v1345_v61 = vsub.s32 4, %v2165_v35 }
 0x5b2   : > { %v1334_v45 = vmul.f32 %v1326_v36, %v2315_v4  ;;  %1907 = vmatpush3.bf16.msra.mxu0 %v1977_v57 }
 0x5b3   : > { %v1332_v2 = vmul.f32 %v1324_v42, %v2320_v11  ;;  %v1346_v4 = vrot.slane %v2171_v37, %v1345_v61 }
 0x5b4   : > { %v1338_v5 = vpack.c.bf16 %v1334_v45, %v1333_v39 }
 0x5b5   : > { %v1337_v7 = vpack.c.bf16 %v1332_v2, %v1331_v0 }
 0x5b7   : > { %1900 = vmatprep.mubr.msk.bf16.mxu1 %vm589_vm2, %v1337_v7 }
 0x5b8   : > { %1901 = vmatmul.mubr.msk.bf16.gmra.mrb[20].mxu1 %vm589_vm2, %v1338_v5 }
 0x683   : > { %v1898_v10 = vpop.f32.mrb[16].mxu1 }
 0x684   : > { %v2354_v11 = vadd.f32 %v1898_v10, %v1346_v4  ;;  %v1405_v12 = vpop.f32.mrb[17].mxu1 }
 0x685   : > { %v2356_v13 = vadd.f32 %v1405_v12, %v1346_v4  ;;  %v1899_v14 = vpop.f32.mrb[18].mxu1 }
 0x686   : > { %v1438_v15 = vmul.f32 %v2354_v11, %v2354_v11  ;;  %v2360_v16 = vadd.f32 %v1899_v14, %v1346_v4  ;;  %v1408_v17 = vpop.f32.mrb[19].mxu1 }
 0x687   : > { %v1436_v18 = vmul.f32 %v2356_v13, %v2356_v13  ;;  %v2364_v19 = vadd.f32 %v1408_v17, %v1346_v4 }
 0x688   : > { %v1446_v37 = vmul.f32 %v1438_v15, %v2354_v11  ;;  %v1439_v20 = vmul.f32 %v2360_v16, %v2360_v16 }
 0x689   : > { %v1444_v22 = vmul.f32 %v1436_v18, %v2356_v13  ;;  %v1437_v23 = vmul.f32 %v2364_v19, %v2364_v19 }
 0x68a   : > { %v1454_v24 = vmul.f32 0.044715, %v1446_v37  ;;  %v1447_v26 = vmul.f32 %v1439_v20, %v2360_v16 }
 0x68b   : > { %v1452_v27 = vmul.f32 0.044715, %v1444_v22  ;;  %v1445_v1 = vmul.f32 %v1437_v23, %v2364_v19  ;;  %v1902_v6 = vpop.f32.mrb[20].mxu1 }
 0x68c   : > { %v1462_v3 = vadd.f32 %v1454_v24, %v2354_v11  ;;  %v1455_v9 = vmul.f32 0.044715, %v1447_v26  ;;  %v2375_v28 = vadd.f32 %v1902_v6, %v1346_v4  ;;  %v1421_v29 = vpop.f32.mrb[21].mxu1 }
 0x68d   : > { %v1460_v31 = vadd.f32 %v1452_v27, %v2356_v13  ;;  %v1453_v32 = vmul.f32 0.044715, %v1445_v1  ;;  %v2378_v33 = vadd.f32 %v1421_v29, %v1346_v4  ;;  %v1903_v21 = vpop.f32.mrb[22].mxu1 }
 0x68e   : > { %v1470_v25 = vmul.f32 0.7978846, %v1462_v3  ;;  %v1463_v30 = vadd.f32 %v1455_v9, %v2360_v16  ;;  %v1442_v34 = vmul.f32 %v2375_v28, %v2375_v28  ;;  %v2383_v38 = vadd.f32 %v1903_v21, %v1346_v4  ;;  %v1424_v40 = vpop.f32.mrb[23].mxu1 }
 0x68f   : > { %v1468_v41 = vmul.f32 0.7978846, %v1460_v31  ;;  %v1461_v43 = vadd.f32 %v1453_v32, %v2364_v19  ;;  %v1440_v44 = vmul.f32 %v2378_v33, %v2378_v33  ;;  %v2388_v46 = vadd.f32 %v1424_v40, %v1346_v4 }
 0x690   : > { %2026 = vtanh.f32 %v1470_v25  ;;  %v1471_v47 = vmul.f32 0.7978846, %v1463_v30  ;;  %v1450_v48 = vmul.f32 %v1442_v34, %v2375_v28  ;;  %v1443_v49 = vmul.f32 %v2383_v38, %v2383_v38 }
 0x691   : > { %2028 = vtanh.f32 %v1468_v41  ;;  %v1469_v50 = vmul.f32 0.7978846, %v1461_v43  ;;  %v1448_v51 = vmul.f32 %v1440_v44, %v2378_v33  ;;  %v1441_v52 = vmul.f32 %v2388_v46, %v2388_v46  ;;  %v2042_v43 = vld [vmem:[%s2437_s11] sm:$0xff] }
 0x692   : > { %2030 = vtanh.f32 %v1471_v47  ;;  %v1458_v53 = vmul.f32 0.044715, %v1450_v48  ;;  %v1451_v54 = vmul.f32 %v1443_v49, %v2383_v38  ;;  %v1518_v41 = vsub.s32 5, %v2165_v35 }
 0x693   : > { %2032 = vtanh.f32 %v1469_v50  ;;  %v1456_v55 = vmul.f32 0.044715, %v1448_v51  ;;  %v1449_v56 = vmul.f32 %v1441_v52, %v2388_v46 }
 0x694   : > { %v1466_v58 = vadd.f32 %v1458_v53, %v2375_v28  ;;  %v1459_v59 = vmul.f32 0.044715, %v1451_v54  ;;  %v1519_v44 = vrot.slane %v2042_v43, %v1518_v41 }
 0x695   : > { %v1464_v60 = vadd.f32 %v1456_v55, %v2378_v33  ;;  %v1457_v62 = vmul.f32 0.044715, %v1449_v56 }
 0x696   : > { %v1474_v63 = vmul.f32 0.7978846, %v1466_v58  ;;  %v1467_v36 = vadd.f32 %v1459_v59, %v2383_v38 }
 0x697   : > { %v1472_v42 = vmul.f32 0.7978846, %v1464_v60  ;;  %v1465_v39 = vadd.f32 %v1457_v62, %v2388_v46 }
 0x698   : > { %2034 = vtanh.f32 %v1474_v63  ;;  %v1475_v45 = vmul.f32 0.7978846, %v1467_v36 }
 0x699   : > { %2036 = vtanh.f32 %v1472_v42  ;;  %v1473_v0 = vmul.f32 0.7978846, %v1465_v39 }
 0x69a   : > { %v2027_v2 = vpop.eup %2026  ;;  %2038 = vtanh.f32 %v1475_v45 }
 0x69b   : > { %v2029_v5 = vpop.eup %2028  ;;  %v1486_v7 = vadd.f32 1.0, %v2027_v2  ;;  %2040 = vtanh.f32 %v1473_v0 }
 0x69c   : > { %v2031_v8 = vpop.eup %2030  ;;  %v1484_v57 = vadd.f32 1.0, %v2029_v5 }
 0x69d   : > { %v2033_v61 = vpop.eup %2032  ;;  %v1494_v4 = vmul.f32 0.5, %v1486_v7  ;;  %v1487_v10 = vadd.f32 1.0, %v2031_v8 }
 0x69e   : > { %v1492_v12 = vmul.f32 0.5, %v1484_v57  ;;  %v1485_v14 = vadd.f32 1.0, %v2033_v61 }
 0x69f   : > { %v1495_v15 = vmul.f32 0.5, %v1487_v10  ;;  %v1502_v18 = vmul.f32 %v1494_v4, %v2354_v11 }
 0x6a0   : > { %v1493_v17 = vmul.f32 0.5, %v1485_v14  ;;  %v1500_v22 = vmul.f32 %v1492_v12, %v2356_v13 }
 0x6a1   : > { %v1503_v37 = vmul.f32 %v1495_v15, %v2360_v16 }
 0x6a2   : > { %v2035_v20 = vpop.eup %2034  ;;  %v1501_v23 = vmul.f32 %v1493_v17, %v2364_v19 }
 0x6a3   : > { %v2037_v24 = vpop.eup %2036  ;;  %v1509_v26 = vpack.c.bf16 %v1503_v37, %v1502_v18  ;;  %v1490_v27 = vadd.f32 1.0, %v2035_v20 }
 0x6a4   : > { %v2039_v1 = vpop.eup %2038  ;;  %v1488_v6 = vadd.f32 1.0, %v2037_v24  ;;  %v1508_v3 = vpack.c.bf16 %v1501_v23, %v1500_v22 }
 0x6a5   : > { %v2041_v9 = vpop.eup %2040  ;;  %v1498_v29 = vmul.f32 0.5, %v1490_v27  ;;  %v1491_v31 = vadd.f32 1.0, %v2039_v1 }
 0x6a6   : > { %v1496_v32 = vmul.f32 0.5, %v1488_v6  ;;  %v1489_v21 = vadd.f32 1.0, %v2041_v9  ;;  %1908 = vmatprep.mubr.msk.bf16.mxu0 %vm589_vm2, %v1508_v3 }
 0x6a7   : > { %v1499_v11 = vmul.f32 0.5, %v1491_v31  ;;  %1909 = vmatmul.mubr.msk.bf16.vlgmr.msra.gmra.mrb[20].mxu0 %vm589_vm2, %v1509_v26  ;;  %v1506_v16 = vmul.f32 %v1498_v29, %v2375_v28 }
 0x6a8   : > { %v1497_v13 = vmul.f32 0.5, %v1489_v21  ;;  %v1504_v25 = vmul.f32 %v1496_v32, %v2378_v33 }
 0x6a9   : > { %v1507_v19 = vmul.f32 %v1499_v11, %v2383_v38 }
 0x6aa   : > { %v1505_v30 = vmul.f32 %v1497_v13, %v2388_v46 }
 0x6ab   : > { %v1511_v34 = vpack.c.bf16 %v1507_v19, %v1506_v16 }
 0x6ac   : > { %v1510_v40 = vpack.c.bf16 %v1505_v30, %v1504_v25 }
 0x6ae   : > { %1912 = vmatprep.mubr.msk.bf16.mxu0 %vm589_vm2, %v1510_v40 }
 0x6af   : > { %1913 = vmatmul.mubr.msk.bf16.gmra.mrb[24].mxu0 %vm589_vm2, %v1511_v34 }
 0x77a   : > { %v1910_v28 = vpop.f32.mrb[20].mxu0 }
 0x77b   : > { %v1587_v33 = vadd.f32 %v1910_v28, %v1519_v44  ;;  %v1578_v38 = vpop.f32.mrb[21].mxu0 }
 0x77c   : > { %v1579_v46 = vadd.f32 %v1578_v38, %v1519_v44  ;;  %v1911_v47 = vpop.f32.mrb[22].mxu0 }
 0x77d   : > { %1611 = vst [vmem:[%s493_s28 + $0x10] sm:$0xff] %v1587_v33  ;;  %v1590_v48 = vadd.f32 %v1911_v47, %v1519_v44  ;;  %v1581_v49 = vpop.f32.mrb[23].mxu0 }
 0x77e   : > { %1609 = vst [vmem:[%s493_s28] sm:$0xff] %v1579_v46  ;;  %v1582_v35 = vadd.f32 %v1581_v49, %v1519_v44 }
 0x77f   : > { %1612 = vst [vmem:[%s493_s28 + $0x18] sm:$0xff] %v1590_v48 }
 0x780   : > { %1610 = vst [vmem:[%s493_s28 + $0x8] sm:$0xff] %v1582_v35 }
 0x782   : > { %v1914_v50 = vpop.f32.mrb[24].mxu0 }
 0x783   : > { %v1603_v51 = vadd.f32 %v1914_v50, %v1519_v44  ;;  %v1594_v52 = vpop.f32.mrb[25].mxu0 }
 0x784   : > { %v1595_v53 = vadd.f32 %v1594_v52, %v1519_v44  ;;  %v1915_v54 = vpop.f32.mrb[26].mxu0 }
 0x785   : > { %1615 = vst [vmem:[%s493_s28 + $0x30] sm:$0xff] %v1603_v51  ;;  %v1606_v55 = vadd.f32 %v1915_v54, %v1519_v44  ;;  %v1597_v56 = vpop.f32.mrb[27].mxu0 }
 0x786   : > { %1613 = vst [vmem:[%s493_s28 + $0x20] sm:$0xff] %v1595_v53  ;;  %v1598_v58 = vadd.f32 %v1597_v56, %v1519_v44 }
 0x787   : > { %1616 = vst [vmem:[%s493_s28 + $0x38] sm:$0xff] %v1606_v55 }
 0x788   : > { %1614 = vst [vmem:[%s493_s28 + $0x28] sm:$0xff] %v1598_v58 }
 0x789 PF: > { %s22_s21 = sadd.s32 1, %s2049_s21  }
 0x78a   : > { %p19_p4 = scmp.ge.s32.totalorder %s22_s21, 4  }
 0x78c   :  { %21 = sbr.rel (!%p19_p4) target bundleno = 1 (0x1), region = 110 }

</bundles_post_ra>
